<compile_context>
chip_gen: v7x
topology: tpu7x:2x2x1
jax: 0.10.0
libtpu: 0.0.40
codegen_flags: <defaults>
</compile_context>

<pallas_src>
import math

import numpy as np
import jax
import jax.numpy as jnp
from jax.experimental import pallas as pl
from jax.experimental.pallas import tpu as pltpu

# ----------------------------- configuration -------------------------------
B = 2             # batch
SEQ = 200         # conv length axis (torch ConvGru "seq" = 200, hard-coded in fc)
LP = 256          # SEQ zero-padded to a lane-dense 256
FEAT = 12         # feature channels (hard-coded 12 in torch fc / outer attention)
HIDDEN = (8, 12)  # hidden dims per ConvGRU layer; last MUST be 12
KSIZE = 3         # ConvGRUCell conv kernel size
A_K = 5           # AttentionBlock conv kernel size (fixed at 5 in torch)
ATT_KSIZE = 12    # outer AttentionBlock k_size -> sqrt_k
FC_HID = 256
OUT_DIM = 5

assert HIDDEN[-1] == FEAT, "torch module hard-codes attention dims=12 and fc=12*200"


# ------------------------------ fused kernel --------------------------------
def _conv_pre(inp, w, b, ksize):
    """'same' 1-D conv over the lane axis of a batch-folded (Cin, B*LP) tile.

    Every batch block has >= ksize//2 zero lanes at its end, so lane rotations
    are exactly equivalent to zero-padded shifts for all real lanes.  The K
    rolled copies are stacked on the sublane axis (im2col) and consumed by one
    deep-contraction MXU matmul.  Returns w @ im2col(inp) + b.
    """
    pad = ksize // 2
    ltot = inp.shape[-1]
    taps = []
    for j in range(ksize):
        s = (pad - j) % ltot
        taps.append(inp if s == 0 else pltpu.roll(inp, shift=s, axis=1))
    stack = jnp.concatenate(taps, axis=0)                     # (K*Cin, B*LP)
    return jnp.dot(w, stack, preferred_element_type=jnp.float32) + b


def _fused_kernel(x_ref, mask_ref, wl1_ref, bl1_ref, wl2_ref, bl2_ref,
                  watt_ref, batt_ref, w1_ref, b1_ref, w2_ref, b2_ref, o_ref):
    mask = mask_ref[...]                                      # (1, B*LP): 1.0 iff t < SEQ

    # --- ConvGRU layer 1: h0 == 0  =>  h = (1 - sigmoid(conv_a(x))) * tanh(conv_y(x))
    pre1 = _conv_pre(x_ref[...], wl1_ref[...], bl1_ref[...], KSIZE)   # (2*H1, B*LP)
    h1_dim = pre1.shape[0] // 2
    h1 = (1.0 - jax.nn.sigmoid(pre1[:h1_dim])) * jnp.tanh(pre1[h1_dim:]) * mask

    # --- ConvGRU layer 2 (same zero-h0 simplification) ---
    pre2 = _conv_pre(h1, wl2_ref[...], bl2_ref[...], KSIZE)           # (2*H2, B*LP)
    h2_dim = pre2.shape[0] // 2
    h_last = (1.0 - jax.nn.sigmoid(pre2[:h2_dim])) * jnp.tanh(pre2[h2_dim:]) * mask

    # --- outer AttentionBlock: K/Q/V convs fused into one im2col matmul ---
    kqv = _conv_pre(h_last, watt_ref[...], batt_ref[...], A_K)        # (3*FEAT, B*LP)
    keys = kqv[:FEAT]
    queries = kqv[FEAT:2 * FEAT] * mask        # keep padded lanes out of the logits sum
    values = kqv[2 * FEAT:]

    inv_sqrt_k = 1.0 / math.sqrt(ATT_KSIZE)
    att_per_batch = []
    for bb in range(B):                        # tiny static loop (B = 2)
        lanes = slice(bb * LP, (bb + 1) * LP)
        qb, kb, vb, xb = (queries[:, lanes], keys[:, lanes],
                          values[:, lanes], h_last[:, lanes])
        # logits[i, j] = sum_t q[i, t] * k[j, t]   (torch bmm(q, k.transpose(2, 1)))
        logits = jax.lax.dot_general(qb, kb, (((1,), (1,)), ((), ())),
                                     preferred_element_type=jnp.float32)   # (D, D)
        m = jnp.max(logits, axis=0, keepdims=True)        # torch softmax dim=1 -> axis 0
        e = jnp.exp(logits - m)
        denom = jnp.sum(e, axis=0, keepdims=True)
        probs = e * (pl.reciprocal(denom, approx=True) * inv_sqrt_k)
        read = jnp.dot(probs, vb, preferred_element_type=jnp.float32)  # (D, LP)
        att_per_batch.append(xb + read)                                # (FEAT, LP)

    # --- fc(2400 -> 256) without flattening: contract (FEAT, SEQ) against the
    #     (FEAT, LP, FC_HID) weight (padded SEQ lanes hit zero weights), then fc1.
    acc = jnp.zeros((B, FC_HID), jnp.float32) + b1_ref[...]
    for f in range(FEAT):
        lhs = jnp.concatenate([att_per_batch[bb][f:f + 1, :] for bb in range(B)],
                              axis=0)                                  # (B, LP)
        acc = acc + jnp.dot(lhs, w1_ref[f], preferred_element_type=jnp.float32)
    out = jnp.dot(acc, w2_ref[...], preferred_element_type=jnp.float32) + b2_ref[...]
    o_ref[...] = out.astype(o_ref.dtype)


# -------------------------------- full forward -------------------------------
def convgrunet_forward(inputs, params):
    """inputs: (B, SEQ, FEAT) — the torch CONVGRUNet input before unsqueeze/permute."""
    # TODO(synk): ConvGru's Dropout(p=0)+Linear(seq->1) head output (o1) is dead in the
    # torch forward (overwritten by self.attention(h1[-1]) before use), so it is omitted.
    x = jnp.transpose(inputs, (0, 2, 1))                      # (B, FEAT, SEQ)  NCL
    x = jnp.pad(x, ((0, 0), (0, 0), (0, LP - SEQ)))           # lane-dense zero pad
    x = jnp.transpose(x, (1, 0, 2)).reshape(FEAT, B * LP)     # batch folded into lanes
    lane = jnp.arange(B * LP, dtype=jnp.int32)
    mask = ((lane % LP) < SEQ).astype(jnp.float32).reshape(1, B * LP)
    return pl.pallas_call(
        _fused_kernel,
        out_shape=jax.ShapeDtypeStruct((B, OUT_DIM), jnp.float32),
    )(x, mask,
      params["wl1"], params["bl1"], params["wl2"], params["bl2"],
      params["watt"], params["batt"],
      params["w1p"], params["b1r"], params["w2t"], params["b2r"])


# ---------------------------- deterministic params ---------------------------
def init_raw_params(key):
    """Torch-layout parameters (Conv1d weight: (Cout, Cin, K); Linear: (out, in))."""
    def nxt():
        nonlocal key
        key, sub = jax.random.split(key)
        return sub

    def dense(shape, fan_in):
        return (jax.random.normal(nxt(), shape, jnp.float32)
                * (1.0 / np.sqrt(fan_in))).astype(jnp.float32)

    raw = {"cells": [], "attn": {}, "fc": {}}
    cin = FEAT
    for H in HIDDEN:
        raw["cells"].append({
            "H": H,
            "wx": dense((2 * H, cin + H, KSIZE), (cin + H) * KSIZE),
            "bx": dense((2 * H,), (cin + H) * KSIZE),
            "wy": dense((H, cin + H, KSIZE), (cin + H) * KSIZE),
            "by": dense((H,), (cin + H) * KSIZE),
        })
        cin = H
    for name in ("k", "q", "v"):
        raw["attn"]["w" + name] = dense((FEAT, FEAT, A_K), FEAT * A_K)
        raw["attn"]["b" + name] = dense((FEAT,), FEAT * A_K)
    raw["fc"]["w1"] = dense((FC_HID, FEAT * SEQ), FEAT * SEQ)
    raw["fc"]["b1"] = dense((FC_HID,), FEAT * SEQ)
    raw["fc"]["w2"] = dense((OUT_DIM, FC_HID), FC_HID)
    raw["fc"]["b2"] = dense((OUT_DIM,), FC_HID)
    return raw


def to_kernel_params(raw):
    """Kernel layouts: merged im2col conv matrices + padded/reshaped fc weight.

    NOTE: the h-path conv weights (wxh / wyh) and the b-gate are dropped — the
    torch forward runs a single GRU step with zero-initialized hidden state, so
    those terms are exactly zero.  Re-add them for any multi-step / nonzero-h0
    variant.
    """
    def im2col_w(w):   # (Cout, Cin, K) -> (Cout, K*Cin), row order (k, cin)
        cout, cin, k = w.shape
        return jnp.transpose(w, (0, 2, 1)).reshape(cout, k * cin)

    p = {}
    cin = FEAT
    names = (("wl1", "bl1"), ("wl2", "bl2"))
    for (wname, bname), cell in zip(names, raw["cells"]):
        H = cell["H"]
        wmerged = jnp.concatenate([cell["wx"][:H, :cin, :],        # a-gate, x-part
                                   cell["wy"][:, :cin, :]], axis=0)  # y conv, x-part
        p[wname] = im2col_w(wmerged)                               # (2H, K*cin)
        p[bname] = jnp.concatenate([cell["bx"][:H], cell["by"]]).reshape(2 * H, 1)
        cin = H
    at = raw["attn"]
    wqkv = jnp.concatenate([at["wk"], at["wq"], at["wv"]], axis=0)  # (3*FEAT, FEAT, 5)
    p["watt"] = im2col_w(wqkv)                                      # (36, 60)
    p["batt"] = jnp.concatenate([at["bk"], at["bq"], at["bv"]]).reshape(3 * FEAT, 1)
    # w1r[f, t, h] == w1[h, f*SEQ + t]; zero-pad the SEQ axis to LP so padded lanes
    # of the in-kernel activation contribute nothing.
    w1r = raw["fc"]["w1"].T.reshape(FEAT, SEQ, FC_HID)
    p["w1p"] = jnp.pad(w1r, ((0, 0), (0, LP - SEQ), (0, 0)))        # (FEAT, LP, FC_HID)
    p["b1r"] = raw["fc"]["b1"].reshape(1, FC_HID)
    p["w2t"] = raw["fc"]["w2"].T
    p["b2r"] = raw["fc"]["b2"].reshape(1, OUT_DIM)
    return p


# ------------------------------ pure-JAX reference ---------------------------
def _ref_conv1d(x, w, b, pad):
    y = jax.lax.conv_general_dilated(x, w, (1,), [(pad, pad)],
                                     dimension_numbers=("NCH", "OIH", "NCH"))
    return y + b[None, :, None]


def ref_forward(inputs, raw):
    x = jnp.transpose(inputs, (0, 2, 1))
    Bn = x.shape[0]
    cur = x
    for cell in raw["cells"]:
        H = cell["H"]
        h = jnp.zeros((Bn, H, SEQ), jnp.float32)
        cx = _ref_conv1d(jnp.concatenate([cur, h], axis=1),
                         cell["wx"], cell["bx"], KSIZE // 2)
        a = jax.nn.sigmoid(cx[:, :H])
        bgate = jax.nn.sigmoid(cx[:, H:])
        y = jnp.tanh(_ref_conv1d(jnp.concatenate([cur, bgate * h], axis=1),
                                 cell["wy"], cell["by"], KSIZE // 2))
        cur = a * h + (1 - a) * y
    h_last = cur
    at = raw["attn"]
    keys = _ref_conv1d(h_last, at["wk"], at["bk"], A_K // 2)
    queries = _ref_conv1d(h_last, at["wq"], at["bq"], A_K // 2)
    values = _ref_conv1d(h_last, at["wv"], at["bv"], A_K // 2)
    logits = jnp.einsum("bdt,bet->bde", queries, keys)
    probs = jax.nn.softmax(logits, axis=1) / math.sqrt(ATT_KSIZE)
    read = jnp.einsum("bde,bet->bdt", probs, values)
    att = h_last + read
    flat = att.reshape(Bn, FEAT * SEQ)
    h1 = flat @ raw["fc"]["w1"].T + raw["fc"]["b1"]
    return h1 @ raw["fc"]["w2"].T + raw["fc"]["b2"]


# ----------------------------------- main ------------------------------------
if __name__ == "__main__":
    key = jax.random.PRNGKey(0)
    pkey, xkey = jax.random.split(key)
    raw = init_raw_params(pkey)
    params = to_kernel_params(raw)
    inputs = jax.random.uniform(xkey, (B, SEQ, FEAT), jnp.float32)

    fwd = jax.jit(convgrunet_forward)
    out = jax.block_until_ready(fwd(inputs, params))
    ref = jax.block_until_ready(ref_forward(inputs, raw))

    assert out.shape == (B, OUT_DIM)
    np.testing.assert_allclose(np.asarray(out), np.asarray(ref), rtol=3e-3, atol=3e-3)
    print("KERNEL_OK")
</pallas_src>

<mosaic_0001>
module attributes {stable_mosaic.version = 11 : i64} {
  func.func @_fused_kernel(%arg0: memref<12x512xf32, #tpu.memory_space<vmem>>, %arg1: memref<1x512xf32, #tpu.memory_space<vmem>>, %arg2: memref<16x36xf32, #tpu.memory_space<vmem>>, %arg3: memref<16x1xf32, #tpu.memory_space<vmem>>, %arg4: memref<24x24xf32, #tpu.memory_space<vmem>>, %arg5: memref<24x1xf32, #tpu.memory_space<vmem>>, %arg6: memref<36x60xf32, #tpu.memory_space<vmem>>, %arg7: memref<36x1xf32, #tpu.memory_space<vmem>>, %arg8: memref<12x256x256xf32, #tpu.memory_space<vmem>>, %arg9: memref<1x256xf32, #tpu.memory_space<vmem>>, %arg10: memref<256x5xf32, #tpu.memory_space<vmem>>, %arg11: memref<1x5xf32, #tpu.memory_space<vmem>>, %arg12: memref<2x5xf32, #tpu.memory_space<vmem>>) attributes {dimension_semantics = [], scalar_prefetch = 0 : i64, scratch_operands = 0 : i64, tpu.core_type = #tpu.core_type<tc>} {
    %c0 = arith.constant 0 : index
    %c0_0 = arith.constant 0 : index
    %0 = vector.load %arg1[%c0, %c0_0] : memref<1x512xf32, #tpu.memory_space<vmem>>, vector<1x512xf32>
    %c0_1 = arith.constant 0 : index
    %c0_2 = arith.constant 0 : index
    %1 = vector.load %arg0[%c0_1, %c0_2] : memref<12x512xf32, #tpu.memory_space<vmem>>, vector<12x512xf32>
    %c0_3 = arith.constant 0 : index
    %c0_4 = arith.constant 0 : index
    %2 = vector.load %arg2[%c0_3, %c0_4] : memref<16x36xf32, #tpu.memory_space<vmem>>, vector<16x36xf32>
    %c0_5 = arith.constant 0 : index
    %c0_6 = arith.constant 0 : index
    %3 = vector.load %arg3[%c0_5, %c0_6] : memref<16x1xf32, #tpu.memory_space<vmem>>, vector<16x1xf32>
    %c1_i32 = arith.constant 1 : i32
    %4 = tpu.dynamic_rotate %1 by %c1_i32 dim 1 : vector<12x512xf32>, i32 -> vector<12x512xf32>
    %c511_i32 = arith.constant 511 : i32
    %5 = tpu.dynamic_rotate %1 by %c511_i32 dim 1 : vector<12x512xf32>, i32 -> vector<12x512xf32>
    %6 = tpu.concatenate %4, %1, %5 in 0 : vector<12x512xf32>, vector<12x512xf32>, vector<12x512xf32> -> vector<36x512xf32>
    %cst = arith.constant dense<0.000000e+00> : vector<16x512xf32>
    %7 = tpu.matmul %2, %6, %cst {dimension_numbers = #tpu.dot_dimension_numbers<[1], [0], [0], [1], [0, 0, 1, 1], [], []>} : vector<16x36xf32>, vector<36x512xf32>, vector<16x512xf32> -> vector<16x512xf32>
    %8 = vector.broadcast %3 : vector<16x1xf32> to vector<16x512xf32>
    %9 = arith.addf %7, %8 : vector<16x512xf32>
    %10 = vector.extract_strided_slice %9 {offsets = [0, 0], sizes = [8, 512], strides = [1, 1]} : vector<16x512xf32> to vector<8x512xf32>
    %11 = arith.negf %10 : vector<8x512xf32>
    %12 = math.exp %11 : vector<8x512xf32>
    %cst_7 = arith.constant 1.000000e+00 : f32
    %13 = vector.broadcast %cst_7 : f32 to vector<8x512xf32>
    %14 = arith.addf %13, %12 : vector<8x512xf32>
    %15 = arith.divf %13, %14 : vector<8x512xf32>
    %cst_8 = arith.constant 1.000000e+00 : f32
    %16 = vector.broadcast %cst_8 : f32 to vector<8x512xf32>
    %17 = arith.subf %16, %15 : vector<8x512xf32>
    %18 = vector.extract_strided_slice %9 {offsets = [8, 0], sizes = [8, 512], strides = [1, 1]} : vector<16x512xf32> to vector<8x512xf32>
    %19 = math.tanh %18 : vector<8x512xf32>
    %20 = arith.mulf %17, %19 : vector<8x512xf32>
    %21 = vector.broadcast %0 : vector<1x512xf32> to vector<8x512xf32>
    %22 = arith.mulf %20, %21 : vector<8x512xf32>
    %c0_9 = arith.constant 0 : index
    %c0_10 = arith.constant 0 : index
    %23 = vector.load %arg4[%c0_9, %c0_10] : memref<24x24xf32, #tpu.memory_space<vmem>>, vector<24x24xf32>
    %c0_11 = arith.constant 0 : index
    %c0_12 = arith.constant 0 : index
    %24 = vector.load %arg5[%c0_11, %c0_12] : memref<24x1xf32, #tpu.memory_space<vmem>>, vector<24x1xf32>
    %c1_i32_13 = arith.constant 1 : i32
    %25 = tpu.dynamic_rotate %22 by %c1_i32_13 dim 1 : vector<8x512xf32>, i32 -> vector<8x512xf32>
    %c511_i32_14 = arith.constant 511 : i32
    %26 = tpu.dynamic_rotate %22 by %c511_i32_14 dim 1 : vector<8x512xf32>, i32 -> vector<8x512xf32>
    %27 = tpu.concatenate %25, %22, %26 in 0 : vector<8x512xf32>, vector<8x512xf32>, vector<8x512xf32> -> vector<24x512xf32>
    %cst_15 = arith.constant dense<0.000000e+00> : vector<24x512xf32>
    %28 = tpu.matmul %23, %27, %cst_15 {dimension_numbers = #tpu.dot_dimension_numbers<[1], [0], [0], [1], [0, 0, 1, 1], [], []>} : vector<24x24xf32>, vector<24x512xf32>, vector<24x512xf32> -> vector<24x512xf32>
    %29 = vector.broadcast %24 : vector<24x1xf32> to vector<24x512xf32>
    %30 = arith.addf %28, %29 : vector<24x512xf32>
    %31 = vector.extract_strided_slice %30 {offsets = [0, 0], sizes = [12, 512], strides = [1, 1]} : vector<24x512xf32> to vector<12x512xf32>
    %32 = arith.negf %31 : vector<12x512xf32>
    %33 = math.exp %32 : vector<12x512xf32>
    %cst_16 = arith.constant 1.000000e+00 : f32
    %34 = vector.broadcast %cst_16 : f32 to vector<12x512xf32>
    %35 = arith.addf %34, %33 : vector<12x512xf32>
    %36 = arith.divf %34, %35 : vector<12x512xf32>
    %cst_17 = arith.constant 1.000000e+00 : f32
    %37 = vector.broadcast %cst_17 : f32 to vector<12x512xf32>
    %38 = arith.subf %37, %36 : vector<12x512xf32>
    %39 = vector.extract_strided_slice %30 {offsets = [12, 0], sizes = [12, 512], strides = [1, 1]} : vector<24x512xf32> to vector<12x512xf32>
    %40 = math.tanh %39 : vector<12x512xf32>
    %41 = arith.mulf %38, %40 : vector<12x512xf32>
    %42 = vector.broadcast %0 : vector<1x512xf32> to vector<12x512xf32>
    %43 = arith.mulf %41, %42 : vector<12x512xf32>
    %c0_18 = arith.constant 0 : index
    %c0_19 = arith.constant 0 : index
    %44 = vector.load %arg6[%c0_18, %c0_19] : memref<36x60xf32, #tpu.memory_space<vmem>>, vector<36x60xf32>
    %c0_20 = arith.constant 0 : index
    %c0_21 = arith.constant 0 : index
    %45 = vector.load %arg7[%c0_20, %c0_21] : memref<36x1xf32, #tpu.memory_space<vmem>>, vector<36x1xf32>
    %c2_i32 = arith.constant 2 : i32
    %46 = tpu.dynamic_rotate %43 by %c2_i32 dim 1 : vector<12x512xf32>, i32 -> vector<12x512xf32>
    %c1_i32_22 = arith.constant 1 : i32
    %47 = tpu.dynamic_rotate %43 by %c1_i32_22 dim 1 : vector<12x512xf32>, i32 -> vector<12x512xf32>
    %c511_i32_23 = arith.constant 511 : i32
    %48 = tpu.dynamic_rotate %43 by %c511_i32_23 dim 1 : vector<12x512xf32>, i32 -> vector<12x512xf32>
    %c510_i32 = arith.constant 510 : i32
    %49 = tpu.dynamic_rotate %43 by %c510_i32 dim 1 : vector<12x512xf32>, i32 -> vector<12x512xf32>
    %50 = tpu.concatenate %46, %47, %43, %48, %49 in 0 : vector<12x512xf32>, vector<12x512xf32>, vector<12x512xf32>, vector<12x512xf32>, vector<12x512xf32> -> vector<60x512xf32>
    %cst_24 = arith.constant dense<0.000000e+00> : vector<36x512xf32>
    %51 = tpu.matmul %44, %50, %cst_24 {dimension_numbers = #tpu.dot_dimension_numbers<[1], [0], [0], [1], [0, 0, 1, 1], [], []>} : vector<36x60xf32>, vector<60x512xf32>, vector<36x512xf32> -> vector<36x512xf32>
    %52 = vector.broadcast %45 : vector<36x1xf32> to vector<36x512xf32>
    %53 = arith.addf %51, %52 : vector<36x512xf32>
    %54 = vector.extract_strided_slice %53 {offsets = [0, 0], sizes = [12, 512], strides = [1, 1]} : vector<36x512xf32> to vector<12x512xf32>
    %55 = vector.extract_strided_slice %53 {offsets = [12, 0], sizes = [12, 512], strides = [1, 1]} : vector<36x512xf32> to vector<12x512xf32>
    %56 = vector.broadcast %0 : vector<1x512xf32> to vector<12x512xf32>
    %57 = arith.mulf %55, %56 : vector<12x512xf32>
    %58 = vector.extract_strided_slice %53 {offsets = [24, 0], sizes = [12, 512], strides = [1, 1]} : vector<36x512xf32> to vector<12x512xf32>
    %59 = vector.extract_strided_slice %57 {offsets = [0, 0], sizes = [12, 256], strides = [1, 1]} : vector<12x512xf32> to vector<12x256xf32>
    %60 = vector.extract_strided_slice %54 {offsets = [0, 0], sizes = [12, 256], strides = [1, 1]} : vector<12x512xf32> to vector<12x256xf32>
    %61 = vector.extract_strided_slice %58 {offsets = [0, 0], sizes = [12, 256], strides = [1, 1]} : vector<12x512xf32> to vector<12x256xf32>
    %62 = vector.extract_strided_slice %43 {offsets = [0, 0], sizes = [12, 256], strides = [1, 1]} : vector<12x512xf32> to vector<12x256xf32>
    %cst_25 = arith.constant dense<0.000000e+00> : vector<12x12xf32>
    %63 = tpu.matmul %59, %60, %cst_25 {dimension_numbers = #tpu.dot_dimension_numbers<[1], [1], [0], [0], [0, 0, 1, 0], [], []>} : vector<12x256xf32>, vector<12x256xf32>, vector<12x12xf32> -> vector<12x12xf32>
    %cst_26 = arith.constant dense<0xFF800000> : vector<12xf32>
    %64 = vector.multi_reduction <maximumf>, %63, %cst_26 [0] : vector<12x12xf32> to vector<12xf32>
    %65 = vector.shape_cast %64 : vector<12xf32> to vector<1x12xf32>
    %66 = vector.broadcast %65 : vector<1x12xf32> to vector<12x12xf32>
    %67 = arith.subf %63, %66 : vector<12x12xf32>
    %68 = math.exp %67 : vector<12x12xf32>
    %cst_27 = arith.constant dense<0.000000e+00> : vector<12xf32>
    %69 = vector.multi_reduction <add>, %68, %cst_27 [0] : vector<12x12xf32> to vector<12xf32>
    %70 = vector.shape_cast %69 : vector<12xf32> to vector<1x12xf32>
    %71 = tpu.reciprocal %70 {approx = true} : vector<1x12xf32> -> vector<1x12xf32>
    %cst_28 = arith.constant 0.288675129 : f32
    %72 = vector.broadcast %cst_28 : f32 to vector<1x12xf32>
    %73 = arith.mulf %71, %72 : vector<1x12xf32>
    %74 = vector.broadcast %73 : vector<1x12xf32> to vector<12x12xf32>
    %75 = arith.mulf %68, %74 : vector<12x12xf32>
    %cst_29 = arith.constant dense<0.000000e+00> : vector<12x256xf32>
    %76 = tpu.matmul %75, %61, %cst_29 {dimension_numbers = #tpu.dot_dimension_numbers<[1], [0], [0], [1], [0, 0, 1, 1], [], []>} : vector<12x12xf32>, vector<12x256xf32>, vector<12x256xf32> -> vector<12x256xf32>
    %77 = arith.addf %62, %76 : vector<12x256xf32>
    %78 = vector.extract_strided_slice %57 {offsets = [0, 256], sizes = [12, 256], strides = [1, 1]} : vector<12x512xf32> to vector<12x256xf32>
    %79 = vector.extract_strided_slice %54 {offsets = [0, 256], sizes = [12, 256], strides = [1, 1]} : vector<12x512xf32> to vector<12x256xf32>
    %80 = vector.extract_strided_slice %58 {offsets = [0, 256], sizes = [12, 256], strides = [1, 1]} : vector<12x512xf32> to vector<12x256xf32>
    %81 = vector.extract_strided_slice %43 {offsets = [0, 256], sizes = [12, 256], strides = [1, 1]} : vector<12x512xf32> to vector<12x256xf32>
    %cst_30 = arith.constant dense<0.000000e+00> : vector<12x12xf32>
    %82 = tpu.matmul %78, %79, %cst_30 {dimension_numbers = #tpu.dot_dimension_numbers<[1], [1], [0], [0], [0, 0, 1, 0], [], []>} : vector<12x256xf32>, vector<12x256xf32>, vector<12x12xf32> -> vector<12x12xf32>
    %cst_31 = arith.constant dense<0xFF800000> : vector<12xf32>
    %83 = vector.multi_reduction <maximumf>, %82, %cst_31 [0] : vector<12x12xf32> to vector<12xf32>
    %84 = vector.shape_cast %83 : vector<12xf32> to vector<1x12xf32>
    %85 = vector.broadcast %84 : vector<1x12xf32> to vector<12x12xf32>
    %86 = arith.subf %82, %85 : vector<12x12xf32>
    %87 = math.exp %86 : vector<12x12xf32>
    %cst_32 = arith.constant dense<0.000000e+00> : vector<12xf32>
    %88 = vector.multi_reduction <add>, %87, %cst_32 [0] : vector<12x12xf32> to vector<12xf32>
    %89 = vector.shape_cast %88 : vector<12xf32> to vector<1x12xf32>
    %90 = tpu.reciprocal %89 {approx = true} : vector<1x12xf32> -> vector<1x12xf32>
    %cst_33 = arith.constant 0.288675129 : f32
    %91 = vector.broadcast %cst_33 : f32 to vector<1x12xf32>
    %92 = arith.mulf %90, %91 : vector<1x12xf32>
    %93 = vector.broadcast %92 : vector<1x12xf32> to vector<12x12xf32>
    %94 = arith.mulf %87, %93 : vector<12x12xf32>
    %cst_34 = arith.constant dense<0.000000e+00> : vector<12x256xf32>
    %95 = tpu.matmul %94, %80, %cst_34 {dimension_numbers = #tpu.dot_dimension_numbers<[1], [0], [0], [1], [0, 0, 1, 1], [], []>} : vector<12x12xf32>, vector<12x256xf32>, vector<12x256xf32> -> vector<12x256xf32>
    %96 = arith.addf %81, %95 : vector<12x256xf32>
    %cst_35 = arith.constant 0.000000e+00 : f32
    %97 = vector.broadcast %cst_35 : f32 to vector<2x256xf32>
    %c0_36 = arith.constant 0 : index
    %c0_37 = arith.constant 0 : index
    %98 = vector.load %arg9[%c0_36, %c0_37] : memref<1x256xf32, #tpu.memory_space<vmem>>, vector<1x256xf32>
    %99 = vector.broadcast %98 : vector<1x256xf32> to vector<2x256xf32>
    %100 = arith.addf %97, %99 : vector<2x256xf32>
    %101 = vector.extract_strided_slice %77 {offsets = [0, 0], sizes = [1, 256], strides = [1, 1]} : vector<12x256xf32> to vector<1x256xf32>
    %102 = vector.extract_strided_slice %96 {offsets = [0, 0], sizes = [1, 256], strides = [1, 1]} : vector<12x256xf32> to vector<1x256xf32>
    %103 = tpu.concatenate %101, %102 in 0 : vector<1x256xf32>, vector<1x256xf32> -> vector<2x256xf32>
    %c0_38 = arith.constant 0 : index
    %c0_39 = arith.constant 0 : index
    %c0_40 = arith.constant 0 : index
    %104 = vector.load %arg8[%c0_38, %c0_39, %c0_40] : memref<12x256x256xf32, #tpu.memory_space<vmem>>, vector<1x256x256xf32>
    %105 = vector.shape_cast %104 : vector<1x256x256xf32> to vector<256x256xf32>
    %cst_41 = arith.constant dense<0.000000e+00> : vector<2x256xf32>
    %106 = tpu.matmul %103, %105, %cst_41 {dimension_numbers = #tpu.dot_dimension_numbers<[1], [0], [0], [1], [0, 0, 1, 1], [], []>} : vector<2x256xf32>, vector<256x256xf32>, vector<2x256xf32> -> vector<2x256xf32>
    %107 = arith.addf %100, %106 : vector<2x256xf32>
    %108 = vector.extract_strided_slice %77 {offsets = [1, 0], sizes = [1, 256], strides = [1, 1]} : vector<12x256xf32> to vector<1x256xf32>
    %109 = vector.extract_strided_slice %96 {offsets = [1, 0], sizes = [1, 256], strides = [1, 1]} : vector<12x256xf32> to vector<1x256xf32>
    %110 = tpu.concatenate %108, %109 in 0 : vector<1x256xf32>, vector<1x256xf32> -> vector<2x256xf32>
    %c1 = arith.constant 1 : index
    %c0_42 = arith.constant 0 : index
    %c0_43 = arith.constant 0 : index
    %111 = vector.load %arg8[%c1, %c0_42, %c0_43] : memref<12x256x256xf32, #tpu.memory_space<vmem>>, vector<1x256x256xf32>
    %112 = vector.shape_cast %111 : vector<1x256x256xf32> to vector<256x256xf32>
    %cst_44 = arith.constant dense<0.000000e+00> : vector<2x256xf32>
    %113 = tpu.matmul %110, %112, %cst_44 {dimension_numbers = #tpu.dot_dimension_numbers<[1], [0], [0], [1], [0, 0, 1, 1], [], []>} : vector<2x256xf32>, vector<256x256xf32>, vector<2x256xf32> -> vector<2x256xf32>
    %114 = arith.addf %107, %113 : vector<2x256xf32>
    %115 = vector.extract_strided_slice %77 {offsets = [2, 0], sizes = [1, 256], strides = [1, 1]} : vector<12x256xf32> to vector<1x256xf32>
    %116 = vector.extract_strided_slice %96 {offsets = [2, 0], sizes = [1, 256], strides = [1, 1]} : vector<12x256xf32> to vector<1x256xf32>
    %117 = tpu.concatenate %115, %116 in 0 : vector<1x256xf32>, vector<1x256xf32> -> vector<2x256xf32>
    %c2 = arith.constant 2 : index
    %c0_45 = arith.constant 0 : index
    %c0_46 = arith.constant 0 : index
    %118 = vector.load %arg8[%c2, %c0_45, %c0_46] : memref<12x256x256xf32, #tpu.memory_space<vmem>>, vector<1x256x256xf32>
    %119 = vector.shape_cast %118 : vector<1x256x256xf32> to vector<256x256xf32>
    %cst_47 = arith.constant dense<0.000000e+00> : vector<2x256xf32>
    %120 = tpu.matmul %117, %119, %cst_47 {dimension_numbers = #tpu.dot_dimension_numbers<[1], [0], [0], [1], [0, 0, 1, 1], [], []>} : vector<2x256xf32>, vector<256x256xf32>, vector<2x256xf32> -> vector<2x256xf32>
    %121 = arith.addf %114, %120 : vector<2x256xf32>
    %122 = vector.extract_strided_slice %77 {offsets = [3, 0], sizes = [1, 256], strides = [1, 1]} : vector<12x256xf32> to vector<1x256xf32>
    %123 = vector.extract_strided_slice %96 {offsets = [3, 0], sizes = [1, 256], strides = [1, 1]} : vector<12x256xf32> to vector<1x256xf32>
    %124 = tpu.concatenate %122, %123 in 0 : vector<1x256xf32>, vector<1x256xf32> -> vector<2x256xf32>
    %c3 = arith.constant 3 : index
    %c0_48 = arith.constant 0 : index
    %c0_49 = arith.constant 0 : index
    %125 = vector.load %arg8[%c3, %c0_48, %c0_49] : memref<12x256x256xf32, #tpu.memory_space<vmem>>, vector<1x256x256xf32>
    %126 = vector.shape_cast %125 : vector<1x256x256xf32> to vector<256x256xf32>
    %cst_50 = arith.constant dense<0.000000e+00> : vector<2x256xf32>
    %127 = tpu.matmul %124, %126, %cst_50 {dimension_numbers = #tpu.dot_dimension_numbers<[1], [0], [0], [1], [0, 0, 1, 1], [], []>} : vector<2x256xf32>, vector<256x256xf32>, vector<2x256xf32> -> vector<2x256xf32>
    %128 = arith.addf %121, %127 : vector<2x256xf32>
    %129 = vector.extract_strided_slice %77 {offsets = [4, 0], sizes = [1, 256], strides = [1, 1]} : vector<12x256xf32> to vector<1x256xf32>
    %130 = vector.extract_strided_slice %96 {offsets = [4, 0], sizes = [1, 256], strides = [1, 1]} : vector<12x256xf32> to vector<1x256xf32>
    %131 = tpu.concatenate %129, %130 in 0 : vector<1x256xf32>, vector<1x256xf32> -> vector<2x256xf32>
    %c4 = arith.constant 4 : index
    %c0_51 = arith.constant 0 : index
    %c0_52 = arith.constant 0 : index
    %132 = vector.load %arg8[%c4, %c0_51, %c0_52] : memref<12x256x256xf32, #tpu.memory_space<vmem>>, vector<1x256x256xf32>
    %133 = vector.shape_cast %132 : vector<1x256x256xf32> to vector<256x256xf32>
    %cst_53 = arith.constant dense<0.000000e+00> : vector<2x256xf32>
    %134 = tpu.matmul %131, %133, %cst_53 {dimension_numbers = #tpu.dot_dimension_numbers<[1], [0], [0], [1], [0, 0, 1, 1], [], []>} : vector<2x256xf32>, vector<256x256xf32>, vector<2x256xf32> -> vector<2x256xf32>
    %135 = arith.addf %128, %134 : vector<2x256xf32>
    %136 = vector.extract_strided_slice %77 {offsets = [5, 0], sizes = [1, 256], strides = [1, 1]} : vector<12x256xf32> to vector<1x256xf32>
    %137 = vector.extract_strided_slice %96 {offsets = [5, 0], sizes = [1, 256], strides = [1, 1]} : vector<12x256xf32> to vector<1x256xf32>
    %138 = tpu.concatenate %136, %137 in 0 : vector<1x256xf32>, vector<1x256xf32> -> vector<2x256xf32>
    %c5 = arith.constant 5 : index
    %c0_54 = arith.constant 0 : index
    %c0_55 = arith.constant 0 : index
    %139 = vector.load %arg8[%c5, %c0_54, %c0_55] : memref<12x256x256xf32, #tpu.memory_space<vmem>>, vector<1x256x256xf32>
    %140 = vector.shape_cast %139 : vector<1x256x256xf32> to vector<256x256xf32>
    %cst_56 = arith.constant dense<0.000000e+00> : vector<2x256xf32>
    %141 = tpu.matmul %138, %140, %cst_56 {dimension_numbers = #tpu.dot_dimension_numbers<[1], [0], [0], [1], [0, 0, 1, 1], [], []>} : vector<2x256xf32>, vector<256x256xf32>, vector<2x256xf32> -> vector<2x256xf32>
    %142 = arith.addf %135, %141 : vector<2x256xf32>
    %143 = vector.extract_strided_slice %77 {offsets = [6, 0], sizes = [1, 256], strides = [1, 1]} : vector<12x256xf32> to vector<1x256xf32>
    %144 = vector.extract_strided_slice %96 {offsets = [6, 0], sizes = [1, 256], strides = [1, 1]} : vector<12x256xf32> to vector<1x256xf32>
    %145 = tpu.concatenate %143, %144 in 0 : vector<1x256xf32>, vector<1x256xf32> -> vector<2x256xf32>
    %c6 = arith.constant 6 : index
    %c0_57 = arith.constant 0 : index
    %c0_58 = arith.constant 0 : index
    %146 = vector.load %arg8[%c6, %c0_57, %c0_58] : memref<12x256x256xf32, #tpu.memory_space<vmem>>, vector<1x256x256xf32>
    %147 = vector.shape_cast %146 : vector<1x256x256xf32> to vector<256x256xf32>
    %cst_59 = arith.constant dense<0.000000e+00> : vector<2x256xf32>
    %148 = tpu.matmul %145, %147, %cst_59 {dimension_numbers = #tpu.dot_dimension_numbers<[1], [0], [0], [1], [0, 0, 1, 1], [], []>} : vector<2x256xf32>, vector<256x256xf32>, vector<2x256xf32> -> vector<2x256xf32>
    %149 = arith.addf %142, %148 : vector<2x256xf32>
    %150 = vector.extract_strided_slice %77 {offsets = [7, 0], sizes = [1, 256], strides = [1, 1]} : vector<12x256xf32> to vector<1x256xf32>
    %151 = vector.extract_strided_slice %96 {offsets = [7, 0], sizes = [1, 256], strides = [1, 1]} : vector<12x256xf32> to vector<1x256xf32>
    %152 = tpu.concatenate %150, %151 in 0 : vector<1x256xf32>, vector<1x256xf32> -> vector<2x256xf32>
    %c7 = arith.constant 7 : index
    %c0_60 = arith.constant 0 : index
    %c0_61 = arith.constant 0 : index
    %153 = vector.load %arg8[%c7, %c0_60, %c0_61] : memref<12x256x256xf32, #tpu.memory_space<vmem>>, vector<1x256x256xf32>
    %154 = vector.shape_cast %153 : vector<1x256x256xf32> to vector<256x256xf32>
    %cst_62 = arith.constant dense<0.000000e+00> : vector<2x256xf32>
    %155 = tpu.matmul %152, %154, %cst_62 {dimension_numbers = #tpu.dot_dimension_numbers<[1], [0], [0], [1], [0, 0, 1, 1], [], []>} : vector<2x256xf32>, vector<256x256xf32>, vector<2x256xf32> -> vector<2x256xf32>
    %156 = arith.addf %149, %155 : vector<2x256xf32>
    %157 = vector.extract_strided_slice %77 {offsets = [8, 0], sizes = [1, 256], strides = [1, 1]} : vector<12x256xf32> to vector<1x256xf32>
    %158 = vector.extract_strided_slice %96 {offsets = [8, 0], sizes = [1, 256], strides = [1, 1]} : vector<12x256xf32> to vector<1x256xf32>
    %159 = tpu.concatenate %157, %158 in 0 : vector<1x256xf32>, vector<1x256xf32> -> vector<2x256xf32>
    %c8 = arith.constant 8 : index
    %c0_63 = arith.constant 0 : index
    %c0_64 = arith.constant 0 : index
    %160 = vector.load %arg8[%c8, %c0_63, %c0_64] : memref<12x256x256xf32, #tpu.memory_space<vmem>>, vector<1x256x256xf32>
    %161 = vector.shape_cast %160 : vector<1x256x256xf32> to vector<256x256xf32>
    %cst_65 = arith.constant dense<0.000000e+00> : vector<2x256xf32>
    %162 = tpu.matmul %159, %161, %cst_65 {dimension_numbers = #tpu.dot_dimension_numbers<[1], [0], [0], [1], [0, 0, 1, 1], [], []>} : vector<2x256xf32>, vector<256x256xf32>, vector<2x256xf32> -> vector<2x256xf32>
    %163 = arith.addf %156, %162 : vector<2x256xf32>
    %164 = vector.extract_strided_slice %77 {offsets = [9, 0], sizes = [1, 256], strides = [1, 1]} : vector<12x256xf32> to vector<1x256xf32>
    %165 = vector.extract_strided_slice %96 {offsets = [9, 0], sizes = [1, 256], strides = [1, 1]} : vector<12x256xf32> to vector<1x256xf32>
    %166 = tpu.concatenate %164, %165 in 0 : vector<1x256xf32>, vector<1x256xf32> -> vector<2x256xf32>
    %c9 = arith.constant 9 : index
    %c0_66 = arith.constant 0 : index
    %c0_67 = arith.constant 0 : index
    %167 = vector.load %arg8[%c9, %c0_66, %c0_67] : memref<12x256x256xf32, #tpu.memory_space<vmem>>, vector<1x256x256xf32>
    %168 = vector.shape_cast %167 : vector<1x256x256xf32> to vector<256x256xf32>
    %cst_68 = arith.constant dense<0.000000e+00> : vector<2x256xf32>
    %169 = tpu.matmul %166, %168, %cst_68 {dimension_numbers = #tpu.dot_dimension_numbers<[1], [0], [0], [1], [0, 0, 1, 1], [], []>} : vector<2x256xf32>, vector<256x256xf32>, vector<2x256xf32> -> vector<2x256xf32>
    %170 = arith.addf %163, %169 : vector<2x256xf32>
    %171 = vector.extract_strided_slice %77 {offsets = [10, 0], sizes = [1, 256], strides = [1, 1]} : vector<12x256xf32> to vector<1x256xf32>
    %172 = vector.extract_strided_slice %96 {offsets = [10, 0], sizes = [1, 256], strides = [1, 1]} : vector<12x256xf32> to vector<1x256xf32>
    %173 = tpu.concatenate %171, %172 in 0 : vector<1x256xf32>, vector<1x256xf32> -> vector<2x256xf32>
    %c10 = arith.constant 10 : index
    %c0_69 = arith.constant 0 : index
    %c0_70 = arith.constant 0 : index
    %174 = vector.load %arg8[%c10, %c0_69, %c0_70] : memref<12x256x256xf32, #tpu.memory_space<vmem>>, vector<1x256x256xf32>
    %175 = vector.shape_cast %174 : vector<1x256x256xf32> to vector<256x256xf32>
    %cst_71 = arith.constant dense<0.000000e+00> : vector<2x256xf32>
    %176 = tpu.matmul %173, %175, %cst_71 {dimension_numbers = #tpu.dot_dimension_numbers<[1], [0], [0], [1], [0, 0, 1, 1], [], []>} : vector<2x256xf32>, vector<256x256xf32>, vector<2x256xf32> -> vector<2x256xf32>
    %177 = arith.addf %170, %176 : vector<2x256xf32>
    %178 = vector.extract_strided_slice %77 {offsets = [11, 0], sizes = [1, 256], strides = [1, 1]} : vector<12x256xf32> to vector<1x256xf32>
    %179 = vector.extract_strided_slice %96 {offsets = [11, 0], sizes = [1, 256], strides = [1, 1]} : vector<12x256xf32> to vector<1x256xf32>
    %180 = tpu.concatenate %178, %179 in 0 : vector<1x256xf32>, vector<1x256xf32> -> vector<2x256xf32>
    %c11 = arith.constant 11 : index
    %c0_72 = arith.constant 0 : index
    %c0_73 = arith.constant 0 : index
    %181 = vector.load %arg8[%c11, %c0_72, %c0_73] : memref<12x256x256xf32, #tpu.memory_space<vmem>>, vector<1x256x256xf32>
    %182 = vector.shape_cast %181 : vector<1x256x256xf32> to vector<256x256xf32>
    %cst_74 = arith.constant dense<0.000000e+00> : vector<2x256xf32>
    %183 = tpu.matmul %180, %182, %cst_74 {dimension_numbers = #tpu.dot_dimension_numbers<[1], [0], [0], [1], [0, 0, 1, 1], [], []>} : vector<2x256xf32>, vector<256x256xf32>, vector<2x256xf32> -> vector<2x256xf32>
    %184 = arith.addf %177, %183 : vector<2x256xf32>
    %c0_75 = arith.constant 0 : index
    %c0_76 = arith.constant 0 : index
    %185 = vector.load %arg10[%c0_75, %c0_76] : memref<256x5xf32, #tpu.memory_space<vmem>>, vector<256x5xf32>
    %cst_77 = arith.constant dense<0.000000e+00> : vector<2x5xf32>
    %186 = tpu.matmul %184, %185, %cst_77 {dimension_numbers = #tpu.dot_dimension_numbers<[1], [0], [0], [1], [0, 0, 1, 1], [], []>} : vector<2x256xf32>, vector<256x5xf32>, vector<2x5xf32> -> vector<2x5xf32>
    %c0_78 = arith.constant 0 : index
    %c0_79 = arith.constant 0 : index
    %187 = vector.load %arg11[%c0_78, %c0_79] : memref<1x5xf32, #tpu.memory_space<vmem>>, vector<1x5xf32>
    %188 = vector.broadcast %187 : vector<1x5xf32> to vector<2x5xf32>
    %189 = arith.addf %186, %188 : vector<2x5xf32>
    %c0_80 = arith.constant 0 : index
    %c0_81 = arith.constant 0 : index
    %190 = vector.load %arg12[%c0_80, %c0_81] : memref<2x5xf32, #tpu.memory_space<vmem>>, vector<2x5xf32>
    tpu.vector_store %arg12[%c0_80, %c0_81], %189 {strides = array<i32>} : memref<2x5xf32, #tpu.memory_space<vmem>>, vector<2x5xf32>,
    return
  }
}

</mosaic_0001>

<bundles_post_ra>
// kernel: convgrunet_forward.1
= control target key start
LH: loop header
LB: loop body
LE: loop exit
PB: predicated region body
PF: predicated region fallthrough
CT: control target
= control target key end

     0   :  { %17 = vsyncpa [#allocation3], 0  ;;  %s5995_s0 = inlined_call_operand.vmem [shape: f32[12,512], index: 0, kind: input, shape index: {}]   ;;  %s5996_s1 = inlined_call_operand.vmem [shape: f32[1,512], index: 1, kind: input, shape index: {}]   ;;  %s5997_s2 = inlined_call_operand.hbm [shape: f32[16,36], index: 2, kind: input, shape index: {}]   ;;  %s5998_s3 = inlined_call_operand.vmem [shape: f32[16,1], index: 3, kind: input, shape index: {}]   ;;  %s5999_s4 = inlined_call_operand.hbm [shape: f32[24,24], index: 4, kind: input, shape index: {}]   ;;  %s6000_s5 = inlined_call_operand.vmem [shape: f32[24,1], index: 5, kind: input, shape index: {}]   ;;  %s6001_s6 = inlined_call_operand.hbm [shape: f32[36,60], index: 6, kind: input, shape index: {}]   ;;  %s6002_s7 = inlined_call_operand.vmem [shape: f32[36,1], index: 7, kind: input, shape index: {}]   ;;  %s6003_s8 = inlined_call_operand.hbm [shape: f32[12,256,256], index: 8, kind: input, shape index: {}]   ;;  %s6004_s9 = inlined_call_operand.hbm [shape: f32[1,256], index: 9, kind: input, shape index: {}]   ;;  %s6005_s10 = inlined_call_operand.vmem [shape: f32[256,5], index: 10, kind: input, shape index: {}]   ;;  %s6006_s11 = inlined_call_operand.hbm [shape: f32[1,5], index: 11, kind: input, shape index: {}]   ;;  %s6007_s12 = inlined_call_operand.hbm [shape: f32[2,5], index: 12, kind: output, shape index: {}]  }
   0x1   :  { %18 = vsyncpa [#allocation6], 0 }
   0x2   :  { %19 = vsyncpa [#allocation9], 0 }
   0x3   :  { %20 = vsyncpa [#allocation12], 0 }
   0x4   :  { %21 = vsyncpa [#allocation4], 0  ;;  %s4926_s21 = smov [#allocation5]   ;;  %s4927_s23 = smov [#allocation8]  }
   0x5   :  { %s45_s22 = sshll.u32 %s4926_s21, 4  ;;  %s73_s24 = sshll.u32 %s4927_s23, 4  ;;  %s46_s22 = int_to_ptr.vmem [resolvable:$true] %s45_s22  ;;  %s5009_s24 = int_to_ptr.vmem [resolvable:$true] %s73_s24 }
   0x6   :  { %s4762_s27 = scalar_lea.hbm %s5999_s4, 384 }
   0x7   :  { %p4763_p0 = scmp.ne.s32.totalorder %s5999_s4, %s4762_s27  ;;  %p4766_p1 = scmp.lt.u32.totalorder %s4762_s27, %s5999_s4 }
   0x9   :  { %p4768_p2 = pnand %p4766_p1, %p4763_p0 }
   0xb   :  { %4771 = shalt.err (!%p4768_p2)
}
   0xc   :  { %s4772_s14 = scalar_lea.vmem %s46_s22, 384  ;;  %p4777_p4 = scmp.lt.s32.totalorder %s46_s22, %s46_s22 }
   0xd   :  { %p4773_p3 = scmp.ne.s32.totalorder %s46_s22, %s4772_s14  ;;  %p4778_p5 = scmp.lt.s32.totalorder %s4772_s14, %s4772_s14 }
   0xf   :  { %p4779_p6 = por %p4778_p5, %p4777_p4 }
  0x11   :  { %p4780_p7 = pnand %p4779_p6, %p4773_p3 }
  0x13   :  { %4783 = shalt.err (!%p4780_p7)
}
  0x14   :  { %s4928_s15 = smov 128   ;;  %s4929_s16 = smov 8  }
  0x15   :  { %51 = dma.hbm_to_vmem [thread:$0]  %s5999_s4, 384, %s46_s22, [#allocation6], %s4928_s15, %s4928_s15, %s4929_s16  }
  0x16   :  { %s4784_s21 = scalar_lea.hbm %s6003_s8, 98304 }
  0x17   :  { %p4785_p8 = scmp.ne.s32.totalorder %s6003_s8, %s4784_s21  ;;  %p4788_p9 = scmp.lt.u32.totalorder %s4784_s21, %s6003_s8 }
  0x19   :  { %p4790_p10 = pnand %p4788_p9, %p4785_p8 }
  0x1b   :  { %4793 = shalt.err (!%p4790_p10)
}
  0x1c   :  { %s4794_s28 = scalar_lea.vmem %s5009_s24, 98304  ;;  %p4799_p12 = scmp.lt.s32.totalorder %s5009_s24, %s5009_s24 }
  0x1d   :  { %p4795_p11 = scmp.ne.s32.totalorder %s5009_s24, %s4794_s28  ;;  %p4800_p13 = scmp.lt.s32.totalorder %s4794_s28, %s4794_s28 }
  0x1f   :  { %p4801_p0 = por %p4800_p13, %p4799_p12 }
  0x21   :  { %p4802_p1 = pnand %p4801_p0, %p4795_p11 }
  0x23   :  { %4805 = shalt.err (!%p4802_p1)
}
  0x24   :  { %s4930_s4 = smov 256   ;;  %s4931_s22 = smov 16  }
  0x25   :  { %79 = dma.hbm_to_vmem [thread:$0]  %s6003_s8, 98304, %s5009_s24, [#allocation9], %s4930_s4, %s4930_s4, %s4931_s22  }
  0x26   :  { %s4932_s13 = smov [#allocation2]   ;;  %s4933_s17 = smov [#allocation7]  }
  0x27   :  { %s31_s14 = sshll.u32 %s4932_s13, 4  ;;  %s59_s18 = sshll.u32 %s4933_s17, 4  ;;  %s32_s14 = int_to_ptr.vmem [resolvable:$true] %s31_s14  ;;  %s5043_s18 = int_to_ptr.vmem [resolvable:$true] %s59_s18 }
  0x28   :  { %s4806_s21 = scalar_lea.hbm %s5997_s2, 256 }
  0x29   :  { %p4807_p2 = scmp.ne.s32.totalorder %s5997_s2, %s4806_s21  ;;  %p4810_p3 = scmp.lt.u32.totalorder %s4806_s21, %s5997_s2 }
  0x2b   :  { %p4812_p4 = pnand %p4810_p3, %p4807_p2 }
  0x2d   :  { %4815 = shalt.err (!%p4812_p4)
}
  0x2e   :  { %s4816_s8 = scalar_lea.vmem %s32_s14, 256  ;;  %p4821_p6 = scmp.lt.s32.totalorder %s32_s14, %s32_s14 }
  0x2f   :  { %p4817_p5 = scmp.ne.s32.totalorder %s32_s14, %s4816_s8  ;;  %p4822_p7 = scmp.lt.s32.totalorder %s4816_s8, %s4816_s8 }
  0x31   :  { %p4823_p8 = por %p4822_p7, %p4821_p6 }
  0x33   :  { %p4824_p9 = pnand %p4823_p8, %p4817_p5 }
  0x35   :  { %4827 = shalt.err (!%p4824_p9)
}
  0x36   :  { %37 = dma.hbm_to_vmem [thread:$0]  %s5997_s2, 256, %s32_s14, [#allocation3], %s4928_s15, %s4928_s15, %s4929_s16  }
  0x37   :  { %s4828_s29 = scalar_lea.hbm %s6001_s6, 640 }
  0x38   :  { %p4829_p10 = scmp.ne.s32.totalorder %s6001_s6, %s4828_s29  ;;  %p4832_p11 = scmp.lt.u32.totalorder %s4828_s29, %s6001_s6 }
  0x3a   :  { %p4834_p12 = pnand %p4832_p11, %p4829_p10 }
  0x3c   :  { %4837 = shalt.err (!%p4834_p12)
}
  0x3d   :  { %s4838_s20 = scalar_lea.vmem %s5043_s18, 640  ;;  %p4843_p0 = scmp.lt.s32.totalorder %s5043_s18, %s5043_s18 }
  0x3e   :  { %p4839_p13 = scmp.ne.s32.totalorder %s5043_s18, %s4838_s20  ;;  %p4844_p1 = scmp.lt.s32.totalorder %s4838_s20, %s4838_s20 }
  0x40   :  { %p4845_p2 = por %p4844_p1, %p4843_p0 }
  0x42   :  { %p4846_p3 = pnand %p4845_p2, %p4839_p13 }
  0x44   :  { %4849 = shalt.err (!%p4846_p3)
}
  0x45   :  { %65 = dma.hbm_to_vmem [thread:$0]  %s6001_s6, 640, %s5043_s18, [#allocation6], %s4928_s15, %s4928_s15, %s4929_s16  }
  0x46   :  { %s4934_s21 = smov [#allocation10]   ;;  %s4935_s25 = smov [#allocation11]  }
  0x47   :  { %s86_s23 = sshll.u32 %s4934_s21, 4  ;;  %s98_s26 = sshll.u32 %s4935_s25, 4  ;;  %s87_s23 = int_to_ptr.vmem [resolvable:$true] %s86_s23  ;;  %s99_s26 = int_to_ptr.vmem [resolvable:$true] %s98_s26 }
  0x48   :  { %s4850_s24 = scalar_lea.hbm %s6004_s9, 32 }
  0x49   :  { %p4851_p4 = scmp.ne.s32.totalorder %s6004_s9, %s4850_s24  ;;  %p4854_p5 = scmp.lt.u32.totalorder %s4850_s24, %s6004_s9 }
  0x4b   :  { %p4856_p6 = pnand %p4854_p5, %p4851_p4 }
  0x4d   :  { %4859 = shalt.err (!%p4856_p6)
}
  0x4e   :  { %s4860_s6 = scalar_lea.vmem %s87_s23, 32  ;;  %p4865_p8 = scmp.lt.s32.totalorder %s87_s23, %s87_s23 }
  0x4f   :  { %p4861_p7 = scmp.ne.s32.totalorder %s87_s23, %s4860_s6  ;;  %p4866_p9 = scmp.lt.s32.totalorder %s4860_s6, %s4860_s6 }
  0x51   :  { %p4867_p10 = por %p4866_p9, %p4865_p8 }
  0x53   :  { %p4868_p11 = pnand %p4867_p10, %p4861_p7 }
  0x55   :  { %4871 = shalt.err (!%p4868_p11)
}
  0x56   :  { %89 = dma.hbm_to_vmem [thread:$0]  %s6004_s9, 32, %s87_s23, [#allocation9]  }
  0x57   :  { %s4872_s13 = scalar_lea.hbm %s6006_s11, 16 }
  0x58   :  { %p4873_p12 = scmp.ne.s32.totalorder %s6006_s11, %s4872_s13  ;;  %p4876_p13 = scmp.lt.u32.totalorder %s4872_s13, %s6006_s11 }
  0x5a   :  { %p4878_p0 = pnand %p4876_p13, %p4873_p12 }
  0x5c   :  { %4881 = shalt.err (!%p4878_p0)
}
  0x5d   :  { %s4882_s14 = scalar_lea.vmem %s99_s26, 16  ;;  %s4886_s21 = scalar_lea.vmem %s99_s26, 32 }
  0x5e   :  { %p4883_p1 = scmp.ne.s32.totalorder %s99_s26, %s4882_s14  ;;  %p4887_p2 = scmp.lt.s32.totalorder %s99_s26, %s99_s26 }
  0x5f   :  { %p4888_p3 = scmp.lt.s32.totalorder %s4886_s21, %s4882_s14 }
  0x61   :  { %p4889_p4 = por %p4888_p3, %p4887_p2 }
  0x63   :  { %p4890_p5 = pnand %p4889_p4, %p4883_p1 }
  0x65   :  { %4893 = shalt.err (!%p4890_p5)
}
  0x66   :  { %101 = dma.hbm_to_vmem [thread:$0]  %s6006_s11, 16, %s99_s26, [#allocation12]  }
  0x67   :  { %4916 = dma.done.wait [#allocation3], 256  }
  0x68   :  { %4917 = vsyncadd [#allocation3], 4294967040 }
  0x69   :  { %4918 = dma.done.wait [#allocation6], 1024  }
  0x6a   :  { %4919 = vsyncadd [#allocation6], 4294966272 }
  0x6b   :  { %4920 = dma.done.wait [#allocation9], 98336  }
  0x6c   :  { %4921 = vsyncadd [#allocation9], 4294868960 }
  0x6d   :  { %4922 = dma.done.wait [#allocation12], 16  }
  0x6e   :  { %4923 = vsyncadd [#allocation12], 4294967280  ;;  %v127_v0 = vld [vmem:[%s5995_s0 + $0x30] sm:$0xf]  ;;  %v128_v1 = vld [vmem:[%s5995_s0 + $0x38] sm:$0xf]  ;;  %v149_v30 = vlaneseq }
  0x6f   :  { %v125_v2 = vld [vmem:[%s5995_s0 + $0x20] sm:$0xf]  ;;  %v204_v3 = vrot.slane %v128_v1, 4  ;;  %v4571_v4 = vpack.i.bf16 %v128_v1, %v127_v0  ;;  %v202_v5 = vrot.slane %v127_v0, 4  ;;  %v126_v6 = vld [vmem:[%s5995_s0 + $0x28] sm:$0xf] }
  0x70   :  { %v5119_v7 = vld [vmem:[%s5995_s0 + $0x10] sm:$0xff]  ;;  %v200_v8 = vrot.slane %v126_v6, 4  ;;  %v4561_v9 = vpack.i.bf16 %v126_v6, %v125_v2  ;;  %v198_v10 = vrot.slane %v125_v2, 4  ;;  %v124_v11 = vld [vmem:[%s5995_s0 + $0x18] sm:$0xff]  ;;  %v121_v12 = vld [vmem:[%s5995_s0] sm:$0xff]  ;;  %s4936_s17 = smov 1  }
  0x71   :  { %v122_v13 = vld [vmem:[%s5995_s0 + $0x8] sm:$0xff]  ;;  %v196_v14 = vrot.slane %v5119_v7, 4  ;;  %4572 = vrot.lane.b32.xlu1 %v4571_v4, %s4936_s17  ;;  %v4576_v15 = vpack.i.bf16 %v124_v11, %v5119_v7  ;;  %vm193_vm0 = vcmask 1043456   ;;  %v197_v18 = vrot.slane %v124_v11, 4  ;;  %s4938_s0 = smov 127   ;;  %v131_v29 = vld [vmem:[%s5998_s3] sm:$0xff] }
  0x72   :  { %v4566_v16 = vpack.i.bf16 %v122_v13, %v121_v12  ;;  %4562 = vrot.lane.b32.xlu0 %v4561_v9, %s4936_s17  ;;  %v195_v17 = vrot.slane %v122_v13, 4  ;;  %v194_v19 = vrot.slane %v121_v12, 4  ;;  %v4586_v24 = vpack.i.bf16 %v124_v11, %v121_v12  ;;  %v132_v28 = vld [vmem:[%s5998_s3 + $0x8] sm:$0xff]  ;;  %s4941_s24 = smov 126  }
  0x73   :  { %v5135_v20 = vsel %vm193_vm0, %v196_v14, %v202_v5  ;;  %v5141_v22 = vsel %vm193_vm0, %v197_v18, %v204_v3  ;;  %v4581_v25 = vpack.i.bf16 %v5119_v7, %v122_v13  ;;  %v4937_v26 = vmov 0.0  }
  0x74   :  { %v5138_v21 = vsel %vm193_vm0, %v195_v17, %v200_v8  ;;  %v5144_v23 = vsel %vm193_vm0, %v194_v19, %v198_v10  ;;  %311 = vmatprep.mubr.f32.mxu0 %v4937_v26  ;;  %388 = vmatprep.mubr.f32.mxu1 %v4937_v26  ;;  %v4939_v27 = vmov 0   ;;  %v5164_v31 = vand.u32 127, %v149_v30 }
  0x75   :  { %4577 = vrot.lane.b32.xlu1 %v4576_v15, %s4936_s17  ;;  %4591 = vset.pattern.permute.xlu0 %v4939_v27  ;;  %vm228_vm3 = vcmask 293888   ;;  %vm507_vm4 = vcmask 195584   ;;  %vm4942_vm7 = vmmov 1   ;;  %vm988_vm9 = vcmask 490496  }
  0x76   :  { %4567 = vrot.lane.b32.xlu0 %v4566_v16, %s4936_s17  ;;  %4592 = vset.pattern.permute.xlu1 %v4939_v27  ;;  %vm151_vm1 = vcmp.lt.s32.totalorder %v5164_v31, 1  ;;  %vm176_vm2 = vcmp.lt.s32.totalorder %v5164_v31, 127  ;;  %vm817_vm5 = vcmp.lt.s32.totalorder %v5164_v31, 2  ;;  %vm890_vm6 = vcmp.lt.s32.totalorder %v5164_v31, 126  ;;  %vm5482_vm8 = vmpackc.low %vm193_vm0, %vm4942_vm7  ;;  %v795_v31 = vld [vmem:[#allocation7 + $0x20] sm:$0xf] }
  0x77   :  { %vm1303_vm10 = vcmask 97280   ;;  %vm1305_vm11 = vcmask 93184   ;;  %vm1656_vm12 = vcmask 1040384   ;;  %vm3527_vm13 = vcmask 33792  }
  0x79   :  { %4587 = vrot.lane.b32.xlu1 %v4586_v24, %s4938_s0 }
  0x7a   :  { %4582 = vrot.lane.b32.xlu0 %v4581_v25, %s4938_s0 }
  0x7d   :  { %170 = vrot.lane.b32.xlu1 %v127_v0, %s4938_s0 }
  0x7e   :  { %166 = vrot.lane.b32.xlu0 %v126_v6, %s4938_s0 }
  0x81   :  { %174 = vrot.lane.b32.xlu1 %v128_v1, %s4938_s0 }
  0x82   :  { %162 = vrot.lane.b32.xlu0 %v125_v2, %s4938_s0 }
  0x85   :  { %225 = vperm.xlu1 %4592, %v132_v28  }
  0x86   :  { %220 = vperm.xlu0 %4591, %v131_v29  }
  0xe3   :  { %v4573_v32 = vpop.permute.xlu1 %4572 }
  0xe4   :  { %v4575_v33 = vunpack.i.h.bf16 %v4573_v32  ;;  %v4574_v34 = vunpack.i.l.bf16 %v4573_v32  ;;  %v4563_v35 = vpop.permute.xlu0 %4562 }
  0xe5   :  { %v4565_v36 = vunpack.i.h.bf16 %v4563_v35  ;;  %v4564_v37 = vunpack.i.l.bf16 %v4563_v35 }
  0xe6   :  { %v153_v38 = vsel %vm151_vm1, %v4574_v34, %v4575_v33 }
  0xe7   :  { %v4578_v39 = vpop.permute.xlu1 %4577  ;;  %v157_v40 = vsel %vm151_vm1, %v4564_v37, %v4565_v36  ;;  %v159_v41 = vsel %vm151_vm1, %v4575_v33, %v4564_v37  ;;  %v155_v42 = vsel %vm151_vm1, %v4565_v36, %v4574_v34  ;;  %v217_v48 = vsel %vm193_vm0, %v153_v38, %v197_v18  ;;  %v129_v18 = vld [vmem:[#allocation2] sm:$0xff] }
  0xe8   :  { %v4580_v43 = vunpack.i.h.bf16 %v4578_v39  ;;  %v4579_v44 = vunpack.i.l.bf16 %v4578_v39  ;;  %v4568_v45 = vpop.permute.xlu0 %4567  ;;  %v215_v49 = vsel %vm193_vm0, %v157_v40, %v195_v17  ;;  %v214_v51 = vsel %vm193_vm0, %v159_v41, %v194_v19  ;;  %v130_v19 = vld [vmem:[#allocation2 + $0x8] sm:$0xff] }
  0xe9   :  { %v4570_v46 = vunpack.i.h.bf16 %v4568_v45  ;;  %v4569_v47 = vunpack.i.l.bf16 %v4568_v45  ;;  %v216_v52 = vsel %vm193_vm0, %v155_v42, %v196_v14 }
  0xea   :  { %v152_v50 = vsel %vm151_vm1, %v4579_v44, %v4580_v43 }
  0xeb   :  { %v4588_v53 = vpop.permute.xlu1 %4587  ;;  %v156_v54 = vsel %vm151_vm1, %v4569_v47, %v4570_v46  ;;  %v3639_v55 = vpack.c.bf16 %v217_v48, %v152_v50  ;;  %v158_v56 = vsel %vm151_vm1, %v4580_v43, %v4569_v47  ;;  %v154_v57 = vsel %vm151_vm1, %v4570_v46, %v4579_v44 }
  0xec   :  { %v4590_v58 = vunpack.i.h.bf16 %v4588_v53  ;;  %v4589_v59 = vunpack.i.l.bf16 %v4588_v53  ;;  %v4583_v60 = vpop.permute.xlu0 %4582  ;;  %v3631_v61 = vpack.c.bf16 %v215_v49, %v156_v54  ;;  %v3633_v62 = vpack.c.bf16 %v214_v51, %v158_v56 }
  0xed   :  { %v4585_v63 = vunpack.i.h.bf16 %v4583_v60  ;;  %v4584_v0 = vunpack.i.l.bf16 %v4583_v60  ;;  %3640 = vmatprep.subr.bf16.mxu1 %v3639_v55  ;;  %v3641_v1 = vpack.c.bf16 %v216_v52, %v154_v57  ;;  %v5217_v53 = vshrl.u32 %v149_v30, 7 }
  0xee   :  { %3632 = vmatprep.subr.bf16.mxu0 %v3631_v61  ;;  %v183_v2 = vsel %vm176_vm2, %v4590_v58, %v4589_v59 }
  0xef   :  { %3634 = vmatpush1.bf16.msra.mxu0 %v3633_v62  ;;  %3642 = vmatpush1.bf16.msra.mxu1 %v3641_v1  ;;  %v171_v3 = vpop.permute.xlu1 %170  ;;  %v179_v4 = vsel %vm176_vm2, %v4584_v0, %v4585_v63  ;;  %v3643_v5 = vpack.c.bf16 %v183_v2, %v5141_v22  ;;  %v181_v6 = vsel %vm176_vm2, %v4589_v59, %v4584_v0  ;;  %v440_v56 = vsub.s32 0, %v5217_v53 }
  0xf0   :  { %v167_v7 = vpop.permute.xlu0 %166  ;;  %v3635_v8 = vpack.c.bf16 %v179_v4, %v5138_v21  ;;  %v3637_v9 = vpack.c.bf16 %v181_v6, %v5144_v23  ;;  %v177_v10 = vsel %vm176_vm2, %v4585_v63, %v4590_v58  ;;  %v120_v58 = vld [vmem:[%s5996_s1] sm:$0xf]  ;;  %v448_v59 = vsub.s32 2, %v5217_v53 }
  0xf1   :  { %v180_v11 = vsel %vm176_vm2, %v167_v7, %v171_v3  ;;  %3644 = vmatprep.subr.bf16.mxu1 %v3643_v5  ;;  %v3645_v12 = vpack.c.bf16 %v177_v10, %v5135_v20  ;;  %v6008_v61 = vsub.s32 1, %v5217_v53  ;;  %v452_v63 = vsub.s32 3, %v5217_v53 }
  0xf2   :  { %3636 = vmatprep.subr.bf16.mxu0 %v3635_v8  ;;  %v5228_v1 = vrot.slane %v120_v58, %v440_v56  ;;  %v5230_v4 = vrot.slane %v120_v58, %v448_v59 }
  0xf3   :  { %3638 = vmatpush1.bf16.msra.mxu0 %v3637_v9  ;;  %3646 = vmatpush1.bf16.msra.mxu1 %v3645_v12  ;;  %v175_v13 = vpop.permute.xlu1 %174  ;;  %v5234_v8 = vrot.slane %v120_v58, %v6008_v61 }
  0xf4   :  { %v178_v14 = vsel %vm176_vm2, %v171_v3, %v175_v13  ;;  %v163_v15 = vpop.permute.xlu0 %162  ;;  %3547 = vmatprep.subr.msk.mxu0 %vm193_vm0, %v180_v11  ;;  %v5236_v11 = vrot.slane %v120_v58, %v452_v63 }
  0xf5   :  { %v182_v16 = vsel %vm176_vm2, %v163_v15, %v167_v7  ;;  %v184_v17 = vsel %vm176_vm2, %v175_v13, %v163_v15 }
  0xf6   :  { %3551 = vmatprep.subr.msk.mxu1 %vm193_vm0, %v184_v17 }
  0xf7   :  { %3548 = vmatpush1.msk.msra.mxu0 %vm193_vm0, %v182_v16  ;;  %3552 = vmatpush1.msk.msra.mxu1 %vm193_vm0, %v178_v14 }
  0xf8   :  { %3549 = vmatmul.mubr.msk.f32.vlgmr.msra.gmra.mrb[0].mxu0 %vm228_vm3, %v129_v18  ;;  %3553 = vmatmul.mubr.msk.f32.vlgmr.msra.gmra.mrb[0].mxu1 %vm228_vm3, %v129_v18 }
  0xf9   :  { %317 = vmatprep.mubr.f32.mxu0 %v4937_v26  ;;  %394 = vmatprep.mubr.f32.mxu1 %v4937_v26 }
  0xfc   :  { %3550 = vmatmul.mubr.msk.f32.gmra.mrb[2].mxu0 %vm228_vm3, %v130_v19  ;;  %3554 = vmatmul.mubr.msk.f32.gmra.mrb[2].mxu1 %vm228_vm3, %v130_v19 }
  0xfd   :  { %581 = vmatprep.mubr.f32.mxu0 %v4937_v26  ;;  %664 = vmatprep.mubr.f32.mxu1 %v4937_v26 }
 0x104   :  { %v226_v40 = vpop.permute.xlu1 %225 }
 0x105   :  { %v221_v20 = vpop.permute.xlu0 %220 }
 0x1cb   :  { %v313_v21 = vpop.f32.mrb[0].mxu0  ;;  %v390_v22 = vpop.f32.mrb[0].mxu1 }
 0x1cc   :  { %v314_v23 = vadd.f32 %v313_v21, %v221_v20  ;;  %v391_v24 = vadd.f32 %v390_v22, %v221_v20  ;;  %v315_v25 = vpop.f32.mrb[1].mxu0  ;;  %v392_v27 = vpop.f32.mrb[1].mxu1  ;;  %v466_v21 = vld [vmem:[%s6000_s5 + $0x8] sm:$0xff]  ;;  %v467_v22 = vld [vmem:[%s6000_s5 + $0x10] sm:$0xff] }
 0x1cd   :  { %v316_v28 = vadd.f32 %v315_v25, %v221_v20  ;;  %v393_v29 = vadd.f32 %v392_v27, %v221_v20  ;;  %v465_v20 = vld [vmem:[%s6000_s5] sm:$0xff]  ;;  %s4940_s5 = smov 2  }
 0x1ce   :  { %v3555_v32 = vmul.f32 -1.442695, %v314_v23  ;;  %v3557_v33 = vmul.f32 -1.442695, %v391_v24 }
 0x1cf   :  { %v3556_v34 = vmul.f32 -1.442695, %v316_v28  ;;  %v3558_v35 = vmul.f32 -1.442695, %v393_v29  ;;  %v319_v36 = vpop.f32.mrb[2].mxu0  ;;  %v396_v37 = vpop.f32.mrb[2].mxu1 }
 0x1d0   :  { %4678 = vpow2.f32 %v3555_v32  ;;  %v321_v38 = vpop.f32.mrb[3].mxu0  ;;  %v398_v39 = vpop.f32.mrb[3].mxu1  ;;  %v320_v41 = vadd.f32 %v319_v36, %v226_v40  ;;  %v397_v43 = vadd.f32 %v396_v37, %v226_v40 }
 0x1d1   :  { %4680 = vpow2.f32 %v3557_v33  ;;  %v322_v42 = vadd.f32 %v321_v38, %v226_v40  ;;  %v399_v44 = vadd.f32 %v398_v39, %v226_v40 }
 0x1d2   :  { %4682 = vpow2.f32 %v3556_v34 }
 0x1d3   :  { %4684 = vpow2.f32 %v3558_v35 }
 0x1d4   :  { %4686 = vtanh.f32 %v320_v41 }
 0x1d5   :  { %4688 = vtanh.f32 %v322_v42 }
 0x1d6   :  { %4690 = vtanh.f32 %v397_v43 }
 0x1d7   :  { %4692 = vtanh.f32 %v399_v44 }
 0x1da   :  { %v4679_v45 = vpop.eup %4678 }
 0x1db   :  { %v4681_v46 = vpop.eup %4680  ;;  %v413_v47 = vadd.f32 1.0, %v4679_v45 }
 0x1dc   :  { %v4683_v48 = vpop.eup %4682  ;;  %v415_v49 = vadd.f32 1.0, %v4681_v46  ;;  %v462_v46 = vld [vmem:[#allocation5] sm:$0xff] }
 0x1dd   :  { %v4685_v50 = vpop.eup %4684  ;;  %4694 = vrcp.f32 %v413_v47  ;;  %v414_v51 = vadd.f32 1.0, %v4683_v48 }
 0x1de   :  { %4696 = vrcp.f32 %v415_v49  ;;  %v416_v52 = vadd.f32 1.0, %v4685_v50  ;;  %v4687_v54 = vpop.eup %4686  ;;  %v463_v49 = vld [vmem:[#allocation5 + $0x8] sm:$0xff]  ;;  %v464_v50 = vld [vmem:[#allocation5 + $0x10] sm:$0xff] }
 0x1df   :  { %4698 = vrcp.f32 %v414_v51  ;;  %v4689_v55 = vpop.eup %4688 }
 0x1e0   :  { %4700 = vrcp.f32 %v416_v52  ;;  %v4691_v57 = vpop.eup %4690 }
 0x1e1   :  { %v4693_v60 = vpop.eup %4692 }
 0x1e7   :  { %v4695_v62 = vpop.eup %4694 }
 0x1e8   :  { %v4697_v0 = vpop.eup %4696  ;;  %v425_v30 = vsub.f32 1.0, %v4695_v62 }
 0x1e9   :  { %v4699_v2 = vpop.eup %4698  ;;  %v427_v3 = vsub.f32 1.0, %v4697_v0 }
 0x1ea   :  { %v4701_v5 = vpop.eup %4700  ;;  %v426_v6 = vsub.f32 1.0, %v4699_v2  ;;  %v433_v7 = vmul.f32 %v4687_v54, %v425_v30 }
 0x1eb   :  { %v428_v9 = vsub.f32 1.0, %v4701_v5  ;;  %v435_v10 = vmul.f32 %v4691_v57, %v427_v3 }
 0x1ec   :  { %v434_v12 = vmul.f32 %v4689_v55, %v426_v6  ;;  %v458_v13 = vmul.f32 %v5228_v1, %v433_v7 }
 0x1ed   :  { %v436_v14 = vmul.f32 %v4693_v60, %v428_v9  ;;  %v460_v15 = vmul.f32 %v5230_v4, %v435_v10 }
 0x1ee   :  { %v459_v16 = vmul.f32 %v5234_v8, %v434_v12 }
 0x1ef   :  { %v461_v17 = vmul.f32 %v5236_v11, %v436_v14 }
 0x1f0   :  { %v4593_v18 = vpack.i.bf16 %v459_v16, %v458_v13 }
 0x1f1   :  { %v4598_v19 = vpack.i.bf16 %v461_v17, %v460_v15 }
 0x1f2   :  { %4594 = vrot.lane.b32.xlu1 %v4593_v18, %s4936_s17 }
 0x1f3   :  { %4599 = vrot.lane.b32.xlu0 %v4598_v19, %s4936_s17 }
 0x1f6   :  { %482 = vrot.lane.b32.xlu1 %v459_v16, %s4938_s0 }
 0x1f7   :  { %484 = vrot.lane.b32.xlu0 %v460_v15, %s4938_s0 }
 0x1fa   :  { %480 = vrot.lane.b32.xlu1 %v458_v13, %s4938_s0 }
 0x1fb   :  { %486 = vrot.lane.b32.xlu0 %v461_v17, %s4938_s0 }
 0x1fe   :  { %494 = vperm.xlu1 %4592, %v465_v20  }
 0x1ff   :  { %499 = vperm.xlu0 %4591, %v466_v21  }
 0x202   :  { %504 = vperm.xlu1 %4592, %v467_v22  }
 0x264   :  { %v4595_v23 = vpop.permute.xlu1 %4594 }
 0x265   :  { %v4600_v24 = vpop.permute.xlu0 %4599  ;;  %v4597_v25 = vunpack.i.h.bf16 %v4595_v23  ;;  %v4596_v27 = vunpack.i.l.bf16 %v4595_v23 }
 0x266   :  { %v4602_v28 = vunpack.i.h.bf16 %v4600_v24  ;;  %v4601_v29 = vunpack.i.l.bf16 %v4600_v24 }
 0x267   :  { %v478_v32 = vsel %vm151_vm1, %v4596_v27, %v4597_v25 }
 0x268   :  { %v477_v33 = vsel %vm151_vm1, %v4597_v25, %v4601_v29  ;;  %v479_v34 = vsel %vm151_vm1, %v4602_v28, %v4596_v27  ;;  %v483_v35 = vpop.permute.xlu1 %482  ;;  %v3647_v36 = vpack.c.bf16 %v459_v16, %v478_v32  ;;  %v476_v37 = vsel %vm151_vm1, %v4601_v29, %v4602_v28 }
 0x269   :  { %v3653_v38 = vpack.c.bf16 %v460_v15, %v477_v33  ;;  %v3649_v39 = vpack.c.bf16 %v458_v13, %v479_v34  ;;  %v485_v40 = vpop.permute.xlu0 %484  ;;  %v3651_v41 = vpack.c.bf16 %v461_v17, %v476_v37 }
 0x26a   :  { %3648 = vmatprep.subr.bf16.mxu0 %v3647_v36  ;;  %v489_v42 = vsel %vm176_vm2, %v483_v35, %v485_v40 }
 0x26b   :  { %3652 = vmatprep.subr.bf16.mxu1 %v3651_v41  ;;  %3650 = vmatpush1.bf16.msra.mxu0 %v3649_v39 }
 0x26c   :  { %3654 = vmatpush1.bf16.msra.mxu1 %v3653_v38  ;;  %v481_v43 = vpop.permute.xlu1 %480  ;;  %521 = vmatprep.subr.mxu0 %v489_v42 }
 0x26d   :  { %v487_v44 = vpop.permute.xlu0 %486  ;;  %v490_v45 = vsel %vm176_vm2, %v481_v43, %v483_v35 }
 0x26e   :  { %v488_v47 = vsel %vm176_vm2, %v485_v40, %v487_v44  ;;  %v491_v48 = vsel %vm176_vm2, %v487_v44, %v481_v43 }
 0x26f   :  { %604 = vmatprep.subr.mxu1 %v491_v48  ;;  %522 = vmatpush1.msra.mxu0 %v490_v45 }
 0x270   :  { %605 = vmatpush1.msra.mxu1 %v488_v47  ;;  %3559 = vmatmul.mubr.msk.f32.vlgmr.msra.gmra.mrb[4].mxu0 %vm507_vm4, %v462_v46 }
 0x271   :  { %3562 = vmatmul.mubr.msk.f32.vlgmr.msra.gmra.mrb[4].mxu1 %vm507_vm4, %v462_v46  ;;  %587 = vmatprep.mubr.f32.mxu0 %v4937_v26 }
 0x272   :  { %670 = vmatprep.mubr.f32.mxu1 %v4937_v26 }
 0x274   :  { %3560 = vmatmul.mubr.msk.f32.gmra.mrb[6].mxu0 %vm507_vm4, %v463_v49 }
 0x275   :  { %3563 = vmatmul.mubr.msk.f32.gmra.mrb[6].mxu1 %vm507_vm4, %v463_v49  ;;  %593 = vmatprep.mubr.f32.mxu0 %v4937_v26 }
 0x276   :  { %676 = vmatprep.mubr.f32.mxu1 %v4937_v26 }
 0x278   :  { %3561 = vmatmul.mubr.msk.f32.gmra.mrb[8].mxu0 %vm507_vm4, %v464_v50 }
 0x279   :  { %3564 = vmatmul.mubr.msk.f32.gmra.mrb[8].mxu1 %vm507_vm4, %v464_v50  ;;  %1080 = vmatprep.mubr.f32.mxu0 %v4937_v26 }
 0x27a   :  { %1199 = vmatprep.mubr.f32.mxu1 %v4937_v26 }
 0x27d   :  { %v495_v51 = vpop.permute.xlu1 %494 }
 0x27e   :  { %v500_v0 = vpop.permute.xlu0 %499 }
 0x281   :  { %v505_v23 = vpop.permute.xlu1 %504 }
 0x343   :  { %v583_v52 = vpop.f32.mrb[4].mxu0 }
 0x344   :  { %v584_v54 = vadd.f32 %v583_v52, %v495_v51  ;;  %v666_v55 = vpop.f32.mrb[4].mxu1  ;;  %v585_v57 = vpop.f32.mrb[5].mxu0 }
 0x345   :  { %v667_v58 = vadd.f32 %v666_v55, %v495_v51  ;;  %v586_v59 = vadd.f32 %v585_v57, %v495_v51  ;;  %v668_v60 = vpop.f32.mrb[5].mxu1 }
 0x346   :  { %v3565_v62 = vmul.f32 -1.442695, %v584_v54  ;;  %v669_v63 = vadd.f32 %v668_v60, %v495_v51 }
 0x347   :  { %v3567_v30 = vmul.f32 -1.442695, %v667_v58  ;;  %v3566_v2 = vmul.f32 -1.442695, %v586_v59  ;;  %v589_v3 = vpop.f32.mrb[6].mxu0 }
 0x348   :  { %4702 = vpow2.f32 %v3565_v62  ;;  %v3568_v5 = vmul.f32 -1.442695, %v669_v63  ;;  %v590_v6 = vadd.f32 %v589_v3, %v500_v0  ;;  %v672_v7 = vpop.f32.mrb[6].mxu1  ;;  %v591_v9 = vpop.f32.mrb[7].mxu0 }
 0x349   :  { %4704 = vpow2.f32 %v3567_v30  ;;  %v673_v10 = vadd.f32 %v672_v7, %v500_v0  ;;  %v592_v12 = vadd.f32 %v591_v9, %v500_v0  ;;  %v674_v13 = vpop.f32.mrb[7].mxu1 }
 0x34a   :  { %4706 = vpow2.f32 %v3566_v2  ;;  %v3569_v14 = vmul.f32 -1.442695, %v590_v6  ;;  %v675_v15 = vadd.f32 %v674_v13, %v500_v0 }
 0x34b   :  { %4708 = vpow2.f32 %v3568_v5  ;;  %v3571_v16 = vmul.f32 -1.442695, %v673_v10  ;;  %v595_v17 = vpop.f32.mrb[8].mxu0  ;;  %v3570_v18 = vmul.f32 -1.442695, %v592_v12 }
 0x34c   :  { %4710 = vpow2.f32 %v3569_v14  ;;  %v678_v19 = vpop.f32.mrb[8].mxu1  ;;  %v597_v20 = vpop.f32.mrb[9].mxu0  ;;  %v3572_v22 = vmul.f32 -1.442695, %v675_v15  ;;  %v596_v24 = vadd.f32 %v595_v17, %v505_v23 }
 0x34d   :  { %4712 = vtanh.f32 %v590_v6  ;;  %v680_v21 = vpop.f32.mrb[9].mxu1  ;;  %v679_v37 = vadd.f32 %v678_v19, %v505_v23  ;;  %v598_v41 = vadd.f32 %v597_v20, %v505_v23 }
 0x34e   :  { %4714 = vpow2.f32 %v3571_v16  ;;  %v681_v45 = vadd.f32 %v680_v21, %v505_v23 }
 0x34f   :  { %4716 = vtanh.f32 %v673_v10 }
 0x350   :  { %4718 = vpow2.f32 %v3570_v18 }
 0x351   :  { %4720 = vtanh.f32 %v592_v12 }
 0x352   :  { %v4703_v25 = vpop.eup %4702  ;;  %4722 = vpow2.f32 %v3572_v22 }
 0x353   :  { %v4705_v27 = vpop.eup %4704  ;;  %v707_v28 = vadd.f32 1.0, %v4703_v25  ;;  %4724 = vtanh.f32 %v675_v15 }
 0x354   :  { %v4707_v29 = vpop.eup %4706  ;;  %v709_v32 = vadd.f32 1.0, %v4705_v27  ;;  %4726 = vtanh.f32 %v596_v24 }
 0x355   :  { %v4709_v33 = vpop.eup %4708  ;;  %4728 = vrcp.f32 %v707_v28  ;;  %v708_v34 = vadd.f32 1.0, %v4707_v29 }
 0x356   :  { %v4711_v35 = vpop.eup %4710  ;;  %4730 = vrcp.f32 %v709_v32  ;;  %v710_v36 = vadd.f32 1.0, %v4709_v33 }
 0x357   :  { %v4713_v38 = vpop.eup %4712  ;;  %4732 = vrcp.f32 %v708_v34  ;;  %v711_v39 = vadd.f32 1.0, %v4711_v35 }
 0x358   :  { %v4715_v40 = vpop.eup %4714  ;;  %4734 = vrcp.f32 %v710_v36  ;;  %v755_v54 = vrot.slane %v4713_v38, 4 }
 0x359   :  { %v4717_v42 = vpop.eup %4716  ;;  %4736 = vrcp.f32 %v711_v39  ;;  %v713_v43 = vadd.f32 1.0, %v4715_v40 }
 0x35a   :  { %v4719_v44 = vpop.eup %4718  ;;  %4738 = vtanh.f32 %v679_v37  ;;  %v761_v6 = vrot.slane %v4717_v42, 4 }
 0x35b   :  { %v4721_v46 = vpop.eup %4720  ;;  %4740 = vrcp.f32 %v713_v43  ;;  %v712_v47 = vadd.f32 1.0, %v4719_v44 }
 0x35c   :  { %v4723_v48 = vpop.eup %4722  ;;  %4742 = vtanh.f32 %v598_v41  ;;  %v758_v15 = vrot.slane %v4721_v46, 4 }
 0x35d   :  { %v4725_v49 = vpop.eup %4724  ;;  %4744 = vrcp.f32 %v712_v47  ;;  %v714_v50 = vadd.f32 1.0, %v4723_v48 }
 0x35e   :  { %v4727_v51 = vpop.eup %4726  ;;  %4746 = vtanh.f32 %v681_v45  ;;  %v764_v24 = vrot.slane %v4725_v49, 4 }
 0x35f   :  { %v4729_v52 = vpop.eup %4728  ;;  %4748 = vrcp.f32 %v714_v50  ;;  %v756_v55 = vrot.slane %v4727_v51, 4 }
 0x360   :  { %v4731_v57 = vpop.eup %4730  ;;  %v731_v58 = vsub.f32 1.0, %v4729_v52 }
 0x361   :  { %v4733_v59 = vpop.eup %4732  ;;  %v757_v60 = vsel %vm193_vm0, %v755_v54, %v756_v55  ;;  %v733_v2 = vsub.f32 1.0, %v4731_v57  ;;  %v798_v57 = vld [vmem:[%s6002_s7 + $0x10] sm:$0xff] }
 0x362   :  { %v4735_v62 = vpop.eup %4734  ;;  %v775_v63 = vmul.f32 %v757_v60, %v731_v58  ;;  %v732_v10 = vsub.f32 1.0, %v4733_v59  ;;  %v797_v58 = vld [vmem:[%s6002_s7 + $0x8] sm:$0xff]  ;;  %v800_v59 = vld [vmem:[%s6002_s7 + $0x20] sm:$0xf]  ;;  %v799_v60 = vld [vmem:[%s6002_s7 + $0x18] sm:$0xff] }
 0x363   :  { %v4737_v0 = vpop.eup %4736  ;;  %v734_v19 = vsub.f32 1.0, %v4735_v62 }
 0x364   :  { %v4739_v30 = vpop.eup %4738  ;;  %v735_v3 = vsub.f32 1.0, %v4737_v0  ;;  %v5289_v28 = vmul.f32 %v775_v63, %v5228_v1 }
 0x365   :  { %v4741_v5 = vpop.eup %4740  ;;  %v762_v7 = vrot.slane %v4739_v30, 4 }
 0x366   :  { %v4743_v9 = vpop.eup %4742  ;;  %v779_v12 = vmul.f32 %v756_v55, %v735_v3  ;;  %v737_v13 = vsub.f32 1.0, %v4741_v5  ;;  %v796_v55 = vld [vmem:[%s6002_s7] sm:$0xff] }
 0x367   :  { %v4745_v14 = vpop.eup %4744  ;;  %v763_v16 = vsel %vm193_vm0, %v761_v6, %v762_v7  ;;  %v759_v17 = vrot.slane %v4743_v9, 4 }
 0x368   :  { %v4747_v18 = vpop.eup %4746  ;;  %v777_v20 = vmul.f32 %v763_v16, %v733_v2  ;;  %v781_v21 = vmul.f32 %v762_v7, %v737_v13  ;;  %v736_v22 = vsub.f32 1.0, %v4745_v14  ;;  %v5293_v35 = vmul.f32 %v779_v12, %v5228_v1 }
 0x369   :  { %v4749_v23 = vpop.eup %4748  ;;  %v760_v25 = vsel %vm193_vm0, %v758_v15, %v759_v17  ;;  %v765_v27 = vrot.slane %v4747_v18, 4 }
 0x36a   :  { %v776_v29 = vmul.f32 %v760_v25, %v732_v10  ;;  %v780_v32 = vmul.f32 %v759_v17, %v736_v22  ;;  %v738_v33 = vsub.f32 1.0, %v4749_v23  ;;  %v5316_v45 = vmul.f32 %v781_v21, %v5230_v4 }
 0x36b   :  { %v766_v34 = vsel %vm193_vm0, %v764_v24, %v765_v27  ;;  %v5323_v48 = vmul.f32 %v777_v20, %v5230_v4  ;;  %v4643_v51 = vpack.i.bf16 %v5293_v35, %v5289_v28 }
 0x36c   :  { %v5296_v36 = vmul.f32 %v776_v29, %v5234_v8  ;;  %v5299_v37 = vmul.f32 %v780_v32, %v5234_v8  ;;  %v778_v38 = vmul.f32 %v766_v34, %v734_v19  ;;  %v782_v39 = vmul.f32 %v765_v27, %v738_v33 }
 0x36d   :  { %v4633_v49 = vpack.i.bf16 %v5316_v45, %v5323_v48  ;;  %v4663_v52 = vpack.i.bf16 %v5323_v48, %v5316_v45 }
 0x36e   :  { %v5302_v40 = vmul.f32 %v778_v38, %v5236_v11  ;;  %v4608_v41 = vpack.i.bf16 %v5296_v36, %v5289_v28  ;;  %v4618_v43 = vpack.i.bf16 %v5299_v37, %v5293_v35  ;;  %v5312_v44 = vmul.f32 %v782_v39, %v5236_v11 }
 0x36f   :  { %v4638_v50 = vpack.i.bf16 %v5299_v37, %v5296_v36 }
 0x370   :  { %4609 = vrot.lane.b32.xlu1 %v4608_v41, %s4940_s5  ;;  %4604 = vrot.lane.b32.xlu0 %v4608_v41, %s4936_s17  ;;  %v4613_v42 = vpack.i.bf16 %v5293_v35, %v5302_v40  ;;  %v4628_v46 = vpack.i.bf16 %v5312_v44, %v5299_v37  ;;  %v4623_v47 = vpack.i.bf16 %v5302_v40, %v5312_v44 }
 0x371   :  { %v4668_v54 = vpack.i.bf16 %v5312_v44, %v5302_v40 }
 0x374   :  { %4614 = vrot.lane.b32.xlu1 %v4613_v42, %s4936_s17  ;;  %4619 = vrot.lane.b32.xlu0 %v4618_v43, %s4940_s5 }
 0x378   :  { %4629 = vrot.lane.b32.xlu1 %v4628_v46, %s4936_s17  ;;  %4624 = vrot.lane.b32.xlu0 %v4623_v47, %s4940_s5 }
 0x37c   :  { %4634 = vrot.lane.b32.xlu1 %v4633_v49, %s4938_s0  ;;  %4639 = vrot.lane.b32.xlu0 %v4638_v50, %s4938_s0 }
 0x380   :  { %4654 = vrot.lane.b32.xlu1 %v4638_v50, %s4941_s24  ;;  %4644 = vrot.lane.b32.xlu0 %v4643_v51, %s4938_s0 }
 0x384   :  { %4659 = vrot.lane.b32.xlu1 %v4643_v51, %s4941_s24  ;;  %4649 = vrot.lane.b32.xlu0 %v4633_v49, %s4941_s24 }
 0x388   :  { %4664 = vrot.lane.b32.xlu1 %v4663_v52, %s4940_s5  ;;  %834 = vrot.lane.b32.xlu0 %v5323_v48, %s4936_s17 }
 0x38c   :  { %4669 = vrot.lane.b32.xlu1 %v4668_v54, %s4938_s0  ;;  %836 = vrot.lane.b32.xlu0 %v5316_v45, %s4936_s17 }
 0x390   :  { %965 = vperm.xlu1 %4592, %v796_v55   ;;  %4674 = vrot.lane.b32.xlu0 %v4668_v54, %s4941_s24 }
 0x394   :  { %975 = vperm.xlu1 %4592, %v798_v57   ;;  %970 = vperm.xlu0 %4591, %v797_v58  }
 0x398   :  { %985 = vperm.xlu1 %4592, %v800_v59   ;;  %980 = vperm.xlu0 %4591, %v799_v60  }
 0x3e2   :  { %v5359_v62 = vpop.permute.xlu1 %4609  ;;  %v5361_v63 = vpop.permute.xlu0 %4604 }
 0x3e3   :  { %v4607_v0 = vunpack.i.h.bf16 %v5361_v63  ;;  %v4606_v30 = vunpack.i.l.bf16 %v5361_v63  ;;  %v4612_v3 = vunpack.i.h.bf16 %v5359_v62  ;;  %v4611_v5 = vunpack.i.l.bf16 %v5359_v62 }
 0x3e5   :  { %v846_v2 = vsel %vm151_vm1, %v4606_v30, %v4607_v0  ;;  %v822_v19 = vsel %vm817_vm5, %v4611_v5, %v4612_v3 }
 0x3e6   :  { %v5371_v6 = vpop.permute.xlu1 %4614  ;;  %v5373_v7 = vpop.permute.xlu0 %4619  ;;  %v908_v13 = vrot.slane %v846_v2, 4 }
 0x3e7   :  { %v4616_v9 = vunpack.i.l.bf16 %v5371_v6  ;;  %v4622_v10 = vunpack.i.h.bf16 %v5373_v7  ;;  %v4621_v12 = vunpack.i.l.bf16 %v5373_v7  ;;  %v4617_v16 = vunpack.i.h.bf16 %v5371_v6 }
 0x3e9   :  { %v848_v14 = vsel %vm151_vm1, %v4616_v9, %v4606_v30  ;;  %v823_v15 = vsel %vm817_vm5, %v4621_v12, %v4622_v10 }
 0x3ea   :  { %v5388_v17 = vpop.permute.xlu1 %4629  ;;  %v5390_v18 = vpop.permute.xlu0 %4624  ;;  %v956_v20 = vsel %vm193_vm0, %v823_v15, %v908_v13  ;;  %v907_v25 = vrot.slane %v848_v14, 4 }
 0x3eb   :  { %v4632_v21 = vunpack.i.h.bf16 %v5388_v17  ;;  %v4631_v22 = vunpack.i.l.bf16 %v5388_v17  ;;  %v4627_v23 = vunpack.i.h.bf16 %v5390_v18  ;;  %v4626_v24 = vunpack.i.l.bf16 %v5390_v18 }
 0x3ec   :  { %v3655_v27 = vpack.c.bf16 %v956_v20, %v822_v19 }
 0x3ed   :  { %v847_v29 = vsel %vm151_vm1, %v4617_v16, %v4631_v22  ;;  %v849_v32 = vsel %vm151_vm1, %v4632_v21, %v4617_v16  ;;  %v824_v33 = vsel %vm817_vm5, %v4627_v23, %v4611_v5  ;;  %v825_v34 = vsel %vm817_vm5, %v4626_v24, %v4621_v12 }
 0x3ee   :  { %v911_v38 = vrot.slane %v849_v32, 4  ;;  %v913_v39 = vrot.slane %v847_v29, 4  ;;  %v955_v41 = vsel %vm193_vm0, %v825_v34, %v907_v25  ;;  %3656 = vmatprep.subr.bf16.mxu0 %v3655_v27  ;;  %v5418_v42 = vpop.permute.xlu1 %4634  ;;  %v4640_v43 = vpop.permute.xlu0 %4639 }
 0x3ef   :  { %v3657_v46 = vpack.c.bf16 %v955_v41, %v824_v33  ;;  %v4637_v47 = vunpack.i.h.bf16 %v5418_v42  ;;  %v4636_v49 = vunpack.i.l.bf16 %v5418_v42  ;;  %v4642_v50 = vunpack.i.h.bf16 %v4640_v43 }
 0x3f0   :  { %v4641_v51 = vunpack.i.l.bf16 %v4640_v43  ;;  %v914_v52 = vsel %vm193_vm0, %v908_v13, %v913_v39  ;;  %v912_v54 = vsel %vm193_vm0, %v907_v25, %v911_v38 }
 0x3f1   :  { %v869_v55 = vsel %vm176_vm2, %v4642_v50, %v4637_v47  ;;  %3658 = vmatpush1.bf16.msra.mxu0 %v3657_v46  ;;  %v3659_v57 = vpack.c.bf16 %v5296_v36, %v914_v52  ;;  %v3661_v12 = vpack.c.bf16 %v5289_v28, %v912_v54 }
 0x3f2   :  { %v941_v58 = vrot.slane %v869_v55, 4  ;;  %v868_v59 = vsel %vm176_vm2, %v4641_v51, %v4636_v49  ;;  %v4655_v60 = vpop.permute.xlu1 %4654  ;;  %v5433_v30 = vpop.permute.xlu0 %4644 }
 0x3f3   :  { %v936_v2 = vrot.slane %v868_v59, 4  ;;  %v4647_v5 = vunpack.i.h.bf16 %v5433_v30  ;;  %3660 = vmatprep.subr.bf16.mxu0 %v3659_v57  ;;  %v4646_v13 = vunpack.i.l.bf16 %v5433_v30  ;;  %v4657_v19 = vunpack.i.h.bf16 %v4655_v60 }
 0x3f4   :  { %v4656_v41 = vunpack.i.l.bf16 %v4655_v60 }
 0x3f5   :  { %v871_v14 = vsel %vm176_vm2, %v4647_v5, %v4642_v50  ;;  %3662 = vmatpush1.bf16.msra.mxu0 %v3661_v12  ;;  %v942_v15 = vsel %vm193_vm0, %v936_v2, %v941_v58  ;;  %v960_v16 = vsel %vm193_vm0, %v5299_v37, %v936_v2  ;;  %v870_v20 = vsel %vm176_vm2, %v4646_v13, %v4641_v51 }
 0x3f6   :  { %v939_v25 = vrot.slane %v871_v14, 4  ;;  %v5446_v27 = vpop.permute.xlu1 %4659  ;;  %v5448_v29 = vpop.permute.xlu0 %4649  ;;  %v3663_v32 = vpack.c.bf16 %v942_v15, %v960_v16  ;;  %v935_v33 = vrot.slane %v870_v20, 4 }
 0x3f7   :  { %v4662_v34 = vunpack.i.h.bf16 %v5446_v27  ;;  %v4661_v38 = vunpack.i.l.bf16 %v5446_v27  ;;  %v4652_v39 = vunpack.i.h.bf16 %v5448_v29  ;;  %v4651_v43 = vunpack.i.l.bf16 %v5448_v29 }
 0x3f8   :  { %3664 = vmatprep.subr.bf16.mxu0 %v3663_v32  ;;  %v940_v50 = vsel %vm193_vm0, %v935_v33, %v939_v25  ;;  %v959_v58 = vsel %vm193_vm0, %v5293_v35, %v935_v33 }
 0x3f9   :  { %v894_v46 = vsel %vm890_vm6, %v4657_v19, %v4652_v39  ;;  %v895_v51 = vsel %vm890_vm6, %v4661_v38, %v4656_v41  ;;  %v896_v52 = vsel %vm890_vm6, %v4662_v34, %v4657_v19  ;;  %v893_v54 = vsel %vm890_vm6, %v4656_v41, %v4651_v43 }
 0x3fa   :  { %v4665_v55 = vpop.permute.xlu1 %4664  ;;  %v835_v57 = vpop.permute.xlu0 %834  ;;  %v3667_v59 = vpack.c.bf16 %v894_v46, %v893_v54  ;;  %v3665_v15 = vpack.c.bf16 %v940_v50, %v959_v58  ;;  %v3670_v19 = vpack.c.bf16 %v896_v52, %v895_v51 }
 0x3fb   :  { %v4667_v60 = vunpack.i.h.bf16 %v4665_v55  ;;  %v4666_v30 = vunpack.i.l.bf16 %v4665_v55  ;;  %v842_v2 = vsel %vm151_vm1, %v835_v57, %v4616_v9  ;;  %v844_v12 = vsel %vm151_vm1, %v4607_v0, %v835_v57 }
 0x3fc   :  { %v910_v14 = vrot.slane %v842_v2, 4  ;;  %v909_v9 = vrot.slane %v844_v12, 4  ;;  %3666 = vmatpush1.bf16.msra.mxu0 %v3665_v15 }
 0x3fd   :  { %v819_v6 = vsel %vm817_vm5, %v4666_v30, %v4626_v24  ;;  %v820_v63 = vsel %vm817_vm5, %v4612_v3, %v4667_v60  ;;  %v821_v0 = vsel %vm817_vm5, %v4622_v10, %v4666_v30  ;;  %v818_v24 = vsel %vm817_vm5, %v4667_v60, %v4627_v23  ;;  %3669 = vmatprep.subr.msk.bf16.mxu0 %vm5482_vm8, %v3667_v59  ;;  %v792_v30 = vld [vmem:[#allocation7 + $0x8] sm:$0xff] }
 0x3fe   :  { %v4670_v20 = vpop.permute.xlu1 %4669  ;;  %v837_v25 = vpop.permute.xlu0 %836  ;;  %v958_v62 = vsel %vm193_vm0, %v819_v6, %v910_v14  ;;  %v957_v32 = vsel %vm193_vm0, %v821_v0, %v909_v9  ;;  %v793_v0 = vld [vmem:[#allocation7 + $0x10] sm:$0xff] }
 0x3ff   :  { %v4672_v3 = vunpack.i.h.bf16 %v4670_v20  ;;  %v4671_v7 = vunpack.i.l.bf16 %v4670_v20  ;;  %v843_v10 = vsel %vm151_vm1, %v837_v25, %v4632_v21  ;;  %v845_v18 = vsel %vm151_vm1, %v4631_v22, %v837_v25  ;;  %v794_v20 = vld [vmem:[#allocation7 + $0x18] sm:$0xff] }
 0x400   :  { %v917_v23 = vrot.slane %v843_v10, 4  ;;  %v3673_v33 = vpack.c.bf16 %v958_v62, %v818_v24  ;;  %v3675_v41 = vpack.c.bf16 %v957_v32, %v820_v63  ;;  %3672 = vmatpush1.bf16.msk.msra.mxu0 %vm5482_vm8, %v3670_v19  ;;  %v915_v55 = vrot.slane %v845_v18, 4 }
 0x401   :  { %v866_v46 = vsel %vm176_vm2, %v4636_v49, %v4671_v7  ;;  %v867_v50 = vsel %vm176_vm2, %v4637_v47, %v4672_v3  ;;  %v872_v21 = vsel %vm176_vm2, %v4671_v7, %v4646_v13  ;;  %v873_v17 = vsel %vm176_vm2, %v4672_v3, %v4647_v5  ;;  %v791_v49 = vld [vmem:[#allocation7] sm:$0xff] }
 0x402   :  { %v937_v22 = vrot.slane %v866_v46, 4  ;;  %v938_v51 = vrot.slane %v872_v21, 4  ;;  %v945_v52 = vrot.slane %v873_v17, 4  ;;  %4511 = vmatprep.subr.bf16.mxu1 %v3673_v33  ;;  %v4675_v54 = vpop.permute.xlu0 %4674  ;;  %v943_v42 = vrot.slane %v867_v50, 4  ;;  %3674 = vmatprep.subr.bf16.mxu0 %v3673_v33 }
 0x403   :  { %v4677_v47 = vunpack.i.h.bf16 %v4675_v54  ;;  %4515 = vmatpush1.bf16.msra.mxu1 %v3675_v41  ;;  %v918_v13 = vsel %vm193_vm0, %v910_v14, %v917_v23  ;;  %v4676_v57 = vunpack.i.l.bf16 %v4675_v54  ;;  %v916_v60 = vsel %vm193_vm0, %v909_v9, %v915_v55  ;;  %3575 = vmatmul.mubr.msk.f32.vlgmr.msra.gmra.mrb[10].mxu0 %vm988_vm9, %v791_v49 }
 0x404   :  { %v3677_v5 = vpack.c.bf16 %v5302_v40, %v918_v13  ;;  %v946_v58 = vsel %vm193_vm0, %v938_v51, %v945_v52  ;;  %v962_v59 = vsel %vm193_vm0, %v5312_v44, %v938_v51  ;;  %3676 = vmatpush1.bf16.msra.mxu0 %v3675_v41  ;;  %1086 = vmatprep.mubr.f32.mxu0 %v4937_v26 }
 0x405   :  { %v3679_v2 = vpack.c.bf16 %v5323_v48, %v916_v60  ;;  %v3681_v12 = vpack.c.bf16 %v946_v58, %v962_v59  ;;  %v944_v14 = vsel %vm193_vm0, %v937_v22, %v943_v42  ;;  %v961_v15 = vsel %vm193_vm0, %v5316_v45, %v937_v22 }
 0x406   :  { %3678 = vmatprep.subr.bf16.mxu0 %v3677_v5  ;;  %4512 = vmatprep.subr.bf16.mxu1 %v3677_v5  ;;  %v898_v6 = vsel %vm890_vm6, %v4677_v47, %v4662_v34  ;;  %v897_v63 = vsel %vm890_vm6, %v4676_v57, %v4661_v38  ;;  %v3683_v9 = vpack.c.bf16 %v944_v14, %v961_v15 }
 0x407   :  { %4516 = vmatpush1.bf16.msra.mxu1 %v3679_v2  ;;  %3576 = vmatmul.mubr.msk.f32.gmra.mrb[12].mxu0 %vm988_vm9, %v792_v30  ;;  %v891_v19 = vsel %vm890_vm6, %v4651_v43, %v4676_v57  ;;  %v892_v27 = vsel %vm890_vm6, %v4652_v39, %v4677_v47  ;;  %v3685_v34 = vpack.c.bf16 %v898_v6, %v897_v63 }
 0x408   :  { %4513 = vmatprep.subr.bf16.mxu1 %v3681_v12  ;;  %3680 = vmatpush1.bf16.msra.mxu0 %v3679_v2  ;;  %v3688_v38 = vpack.c.bf16 %v892_v27, %v891_v19 }
 0x409   :  { %1092 = vmatprep.mubr.f32.mxu0 %v4937_v26  ;;  %3682 = vmatprep.subr.bf16.mxu0 %v3681_v12 }
 0x40b   :  { %4517 = vmatpush1.bf16.msra.mxu1 %v3683_v9  ;;  %3577 = vmatmul.mubr.msk.f32.gmra.mrb[14].mxu0 %vm988_vm9, %v793_v0 }
 0x40c   :  { %4514 = vmatprep.subr.msk.bf16.mxu1 %vm5482_vm8, %v3685_v34  ;;  %3684 = vmatpush1.bf16.msra.mxu0 %v3683_v9 }
 0x40d   :  { %1098 = vmatprep.mubr.f32.mxu0 %v4937_v26  ;;  %3687 = vmatprep.subr.msk.bf16.mxu0 %vm5482_vm8, %v3685_v34 }
 0x40f   :  { %4518 = vmatpush1.bf16.msk.msra.mxu1 %vm5482_vm8, %v3688_v38  ;;  %3578 = vmatmul.mubr.msk.f32.gmra.mrb[16].mxu0 %vm988_vm9, %v794_v20  ;;  %v966_v43 = vpop.permute.xlu1 %965 }
 0x410   :  { %3690 = vmatpush1.bf16.msk.msra.mxu0 %vm5482_vm8, %v3688_v38  ;;  %1104 = vmatprep.mubr.f32.mxu0 %v4937_v26 }
 0x412   :  { %3586 = vmatmul.mubr.msk.f32.vlgmr.msra.gmra.mrb[10].mxu1 %vm988_vm9, %v795_v31 }
 0x413   :  { %1409 = vmatprep.mubr.f32.mxu1 %v4937_v26  ;;  %3579 = vmatmul.mubr.msk.f32.gmra.mrb[18].mxu0 %vm988_vm9, %v795_v31  ;;  %v971_v25 = vpop.permute.xlu0 %970  ;;  %v976_v23 = vpop.permute.xlu1 %975 }
 0x414   :  { %1175 = vmatprep.mubr.f32.mxu0 %v4937_v26 }
 0x417   :  { %3582 = vmatmul.mubr.msk.f32.vlgmr.msra.gmra.mrb[20].mxu0 %vm988_vm9, %v791_v49  ;;  %v986_v47 = vpop.permute.xlu1 %985 }
 0x418   :  { %1181 = vmatprep.mubr.f32.mxu0 %v4937_v26 }
 0x41b   :  { %3583 = vmatmul.mubr.msk.f32.gmra.mrb[22].mxu0 %vm988_vm9, %v792_v30  ;;  %v981_v30 = vpop.permute.xlu0 %980 }
 0x41c   :  { %1187 = vmatprep.mubr.f32.mxu0 %v4937_v26 }
 0x41f   :  { %3584 = vmatmul.mubr.msk.f32.gmra.mrb[24].mxu0 %vm988_vm9, %v793_v0 }
 0x420   :  { %1193 = vmatprep.mubr.f32.mxu0 %v4937_v26 }
 0x423   :  { %3585 = vmatmul.mubr.msk.f32.gmra.mrb[26].mxu0 %vm988_vm9, %v794_v20 }
 0x4d6   :  { %v1082_v29 = vpop.f32.mrb[10].mxu0 }
 0x4d7   :  { %v1084_v39 = vpop.f32.mrb[11].mxu0  ;;  %v1083_v62 = vadd.f32 %v1082_v29, %v966_v43 }
 0x4d8   :  { %v1085_v7 = vadd.f32 %v1084_v39, %v966_v43 }
 0x4da   :  { %v1088_v24 = vpop.f32.mrb[12].mxu0 }
 0x4db   :  { %v1089_v32 = vadd.f32 %v1088_v24, %v971_v25  ;;  %v1090_v3 = vpop.f32.mrb[13].mxu0 }
 0x4dc   :  { %v1091_v10 = vadd.f32 %v1090_v3, %v971_v25 }
 0x4dd   :  { %v3693_v18 = vpack.c.bf16 %v1089_v32, %v1083_v62  ;;  %v1206_v46 = vmul.f32 %v1089_v32, %v5228_v1 }
 0x4de   :  { %v3691_v33 = vpack.c.bf16 %v1091_v10, %v1085_v7  ;;  %v1094_v41 = vpop.f32.mrb[14].mxu0  ;;  %v1207_v17 = vmul.f32 %v1091_v10, %v5234_v8 }
 0x4df   :  { %v1095_v50 = vadd.f32 %v1094_v41, %v976_v23  ;;  %v1096_v21 = vpop.f32.mrb[15].mxu0  ;;  %v1218_v49 = vrot.slane %v1206_v46, 4 }
 0x4e0   :  { %v1097_v22 = vadd.f32 %v1096_v21, %v976_v23  ;;  %3692 = vmatprep.subr.bf16.mxu0 %v3691_v33  ;;  %v1221_v13 = vrot.slane %v1207_v17, 4 }
 0x4e1   :  { %v1210_v51 = vmul.f32 %v1095_v50, %v5228_v1  ;;  %3694 = vmatpush1.bf16.xpose.msra.mxu0 %v3693_v18 }
 0x4e2   :  { %v1211_v52 = vmul.f32 %v1097_v22, %v5234_v8  ;;  %v1100_v54 = vpop.f32.mrb[16].mxu0 }
 0x4e3   :  { %v1219_v42 = vrot.slane %v1210_v51, 4  ;;  %v1102_v55 = vpop.f32.mrb[17].mxu0  ;;  %v1101_v12 = vadd.f32 %v1100_v54, %v981_v30 }
 0x4e4   :  { %v1222_v57 = vrot.slane %v1211_v52, 4  ;;  %v1103_v15 = vadd.f32 %v1102_v55, %v981_v30 }
 0x4e5   :  { %v1201_v5 = vpop.f32.mrb[10].mxu1  ;;  %v1220_v60 = vsel %vm193_vm0, %v1218_v49, %v1219_v42 }
 0x4e6   :  { %v5585_v58 = vadd.f32 %v1201_v5, %v986_v47  ;;  %v1203_v59 = vpop.f32.mrb[11].mxu1  ;;  %v1106_v2 = vpop.f32.mrb[18].mxu0  ;;  %v1223_v1 = vsel %vm193_vm0, %v1221_v13, %v1222_v57  ;;  %v2547_v13 = vld [vmem:[#allocation8 + $0xc10] sm:$0xff]  ;;  %v2550_v5 = vld [vmem:[#allocation8 + $0xc28] sm:$0xff] }
 0x4e7   :  { %v1107_v14 = vadd.f32 %v1106_v2, %v986_v47  ;;  %v1108_v8 = vpop.f32.mrb[19].mxu0  ;;  %1292 = vmatprep.mubr.f32.mxu0 %v1223_v1  ;;  %v1204_v17 = vadd.f32 %v1203_v59, %v986_v47  ;;  %v2552_v59 = vld [vmem:[#allocation8 + $0xc38] sm:$0xff]  ;;  %v2551_v2 = vld [vmem:[#allocation8 + $0xc30] sm:$0xff] }
 0x4e8   :  { %v1109_v6 = vadd.f32 %v1108_v8, %v986_v47  ;;  %1293 = vmatmul.mubr.f32.vlgmr.msra.gmra.mrb[28].mxu0 %v1220_v60  ;;  %v2545_v47 = vld [vmem:[#allocation8 + $0xc00] sm:$0xff]  ;;  %v4099_v60 = vpack.c.bf16 %v2552_v59, %v2550_v5  ;;  %v2584_v5 = vld [vmem:[#allocation8 + $0xd38] sm:$0xff] }
 0x4e9   :  { %v3698_v63 = vpack.c.bf16 %v1107_v14, %v1101_v12  ;;  %1297 = vmatprep.mubr.f32.mxu0 %v1222_v57  ;;  %v4097_v57 = vpack.c.bf16 %v2547_v13, %v2545_v47  ;;  %v2554_v12 = vld [vmem:[#allocation8 + $0xc48] sm:$0xff]  ;;  %v2556_v14 = vld [vmem:[#allocation8 + $0xc58] sm:$0xff]  ;;  %v2577_v47 = vld [vmem:[#allocation8 + $0xd00] sm:$0xff] }
 0x4ea   :  { %v3695_v0 = vpack.c.bf16 %v1109_v6, %v1103_v15  ;;  %v1177_v9 = vpop.f32.mrb[20].mxu0  ;;  %v4103_v8 = vpack.c.bf16 %v2556_v14, %v2554_v12  ;;  %v2553_v15 = vld [vmem:[#allocation8 + $0xc40] sm:$0xff]  ;;  %v2555_v6 = vld [vmem:[#allocation8 + $0xc50] sm:$0xff] }
 0x4eb   :  { %v1179_v19 = vpop.f32.mrb[21].mxu0  ;;  %v1178_v34 = vadd.f32 %v1177_v9, %v966_v43  ;;  %v2560_v9 = vld [vmem:[#allocation8 + $0xc78] sm:$0xff]  ;;  %v2579_v13 = vld [vmem:[#allocation8 + $0xd10] sm:$0xff] }
 0x4ec   :  { %1298 = vmatmul.mubr.f32.gmra.mrb[30].mxu0 %v1219_v42  ;;  %3697 = vmatprep.subr.msk.bf16.mxu1 %vm5482_vm8, %v3695_v0  ;;  %v1180_v31 = vadd.f32 %v1179_v19, %v966_v43  ;;  %v2548_v42 = vld [vmem:[#allocation8 + $0xc18] sm:$0xff]  ;;  %v4105_v0 = vpack.c.bf16 %v2555_v6, %v2553_v15  ;;  %v4129_v59 = vpack.c.bf16 %v2579_v13, %v2577_v47 }
 0x4ed   :  { %3700 = vmatpush1.bf16.msk.msra.mxu1 %vm5482_vm8, %v3698_v63  ;;  %v2558_v63 = vld [vmem:[#allocation8 + $0xc68] sm:$0xff] }
 0x4ee   :  { %v1183_v27 = vpop.f32.mrb[22].mxu0  ;;  %v4107_v19 = vpack.c.bf16 %v2560_v9, %v2558_v63 }
 0x4ef   :  { %v1184_v38 = vadd.f32 %v1183_v27, %v971_v25  ;;  %v1185_v20 = vpop.f32.mrb[23].mxu0  ;;  %v2557_v27 = vld [vmem:[#allocation8 + $0xc60] sm:$0xff] }
 0x4f0   :  { %v1186_v29 = vadd.f32 %v1185_v20, %v971_v25  ;;  %v2564_v20 = vld [vmem:[#allocation8 + $0xc98] sm:$0xff] }
 0x4f1   :  { %v3703_v39 = vpack.c.bf16 %v1184_v38, %v1178_v34  ;;  %v1208_v32 = vmul.f32 %v1184_v38, %v5230_v4  ;;  %v2559_v34 = vld [vmem:[#allocation8 + $0xc70] sm:$0xff]  ;;  %v2562_v38 = vld [vmem:[#allocation8 + $0xc88] sm:$0xff] }
 0x4f2   :  { %v3701_v24 = vpack.c.bf16 %v1186_v29, %v1180_v31  ;;  %v1189_v62 = vpop.f32.mrb[24].mxu0  ;;  %v1209_v10 = vmul.f32 %v1186_v29, %v5236_v11  ;;  %v4109_v31 = vpack.c.bf16 %v2559_v34, %v2557_v27  ;;  %v4111_v29 = vpack.c.bf16 %v2564_v20, %v2562_v38 }
 0x4f3   :  { %v1190_v3 = vadd.f32 %v1189_v62, %v976_v23  ;;  %v1191_v7 = vpop.f32.mrb[25].mxu0  ;;  %v1430_v50 = vrot.slane %v1208_v32, 4  ;;  %v2566_v62 = vld [vmem:[#allocation8 + $0xca8] sm:$0xff]  ;;  %v2568_v32 = vld [vmem:[#allocation8 + $0xcb8] sm:$0xff] }
 0x4f4   :  { %v1192_v18 = vadd.f32 %v1191_v7, %v976_v23  ;;  %3702 = vmatprep.subr.bf16.mxu0 %v3701_v24  ;;  %v1433_v22 = vrot.slane %v1209_v10, 4  ;;  %v2563_v24 = vld [vmem:[#allocation8 + $0xc90] sm:$0xff]  ;;  %v4115_v7 = vpack.c.bf16 %v2568_v32, %v2566_v62  ;;  %v2565_v10 = vld [vmem:[#allocation8 + $0xca0] sm:$0xff] }
 0x4f5   :  { %v1212_v33 = vmul.f32 %v1190_v3, %v5230_v4  ;;  %3704 = vmatpush1.bf16.xpose.msra.mxu0 %v3703_v39  ;;  %v2561_v39 = vld [vmem:[#allocation8 + $0xc80] sm:$0xff] }
 0x4f6   :  { %v1213_v41 = vmul.f32 %v1192_v18, %v5236_v11  ;;  %v1195_v46 = vpop.f32.mrb[26].mxu0  ;;  %v2546_v11 = vld [vmem:[#allocation8 + $0xc08] sm:$0xff]  ;;  %v4113_v3 = vpack.c.bf16 %v2563_v24, %v2561_v39  ;;  %v2567_v18 = vld [vmem:[#allocation8 + $0xcb0] sm:$0xff] }
 0x4f7   :  { %v1431_v43 = vrot.slane %v1212_v33, 4  ;;  %v5597_v25 = vadd.f32 %v1195_v46, %v981_v30  ;;  %v1197_v21 = vpop.f32.mrb[27].mxu0  ;;  %v4095_v55 = vpack.c.bf16 %v2548_v42, %v2546_v11  ;;  %v2570_v33 = vld [vmem:[#allocation8 + $0xcc8] sm:$0xff]  ;;  %v4117_v46 = vpack.c.bf16 %v2567_v18, %v2565_v10  ;;  %v2580_v11 = vld [vmem:[#allocation8 + $0xd18] sm:$0xff] }
 0x4f8   :  { %v1434_v51 = vrot.slane %v1213_v41, 4  ;;  %v1198_v52 = vadd.f32 %v1197_v21, %v981_v30  ;;  %v2549_v30 = vld [vmem:[#allocation8 + $0xc20] sm:$0xff]  ;;  %v2572_v41 = vld [vmem:[#allocation8 + $0xcd8] sm:$0xff]  ;;  %v2571_v21 = vld [vmem:[#allocation8 + $0xcd0] sm:$0xff] }
 0x4f9   :  { %v3708_v54 = vpack.c.bf16 %v5585_v58, %v5597_v25  ;;  %v1432_v23 = vsel %vm193_vm0, %v1430_v50, %v1431_v43  ;;  %4096 = vmatprep.subr.bf16.mxu0 %v4095_v55  ;;  %v4101_v1 = vpack.c.bf16 %v2551_v2, %v2549_v30  ;;  %v4119_v50 = vpack.c.bf16 %v2572_v41, %v2570_v33 }
 0x4fa   :  { %v3705_v49 = vpack.c.bf16 %v1204_v17, %v1198_v52  ;;  %v1435_v4 = vsel %vm193_vm0, %v1433_v22, %v1434_v51  ;;  %v2574_v17 = vld [vmem:[#allocation8 + $0xce8] sm:$0xff]  ;;  %v2576_v22 = vld [vmem:[#allocation8 + $0xcf8] sm:$0xff] }
 0x4fb   :  { %1504 = vmatprep.mubr.f32.mxu0 %v1435_v4  ;;  %v4123_v52 = vpack.c.bf16 %v2576_v22, %v2574_v17  ;;  %v2578_v4 = vld [vmem:[#allocation8 + $0xd08] sm:$0xff] }
 0x4fc   :  { %1505 = vmatmul.mubr.f32.vlgmr.msra.gmra.mrb[32].mxu0 %v1432_v23  ;;  %3707 = vmatprep.subr.msk.bf16.mxu1 %vm5482_vm8, %v3705_v49  ;;  %v2573_v23 = vld [vmem:[#allocation8 + $0xce0] sm:$0xff]  ;;  %v2575_v49 = vld [vmem:[#allocation8 + $0xcf0] sm:$0xff]  ;;  %v4127_v55 = vpack.c.bf16 %v2580_v11, %v2578_v4 }
 0x4fd   :  { %1509 = vmatprep.mubr.f32.mxu0 %v1434_v51  ;;  %4098 = vmatpush1.bf16.msra.mxu0 %v4097_v57  ;;  %v4125_v42 = vpack.c.bf16 %v2575_v49, %v2573_v23  ;;  %v2582_v57 = vld [vmem:[#allocation8 + $0xd28] sm:$0xff] }
 0x4fe   :  { %4100 = vmatprep.subr.bf16.mxu0 %v4099_v60  ;;  %v4131_v60 = vpack.c.bf16 %v2584_v5, %v2582_v57 }
 0x500   :  { %1510 = vmatmul.mubr.f32.gmra.mrb[34].mxu0 %v1431_v43  ;;  %v2569_v43 = vld [vmem:[#allocation8 + $0xcc0] sm:$0xff] }
 0x501   :  { %4102 = vmatpush1.bf16.msra.mxu0 %v4101_v1  ;;  %v4121_v51 = vpack.c.bf16 %v2571_v21, %v2569_v43 }
 0x502   :  { %4104 = vmatprep.subr.bf16.mxu0 %v4103_v8 }
 0x505   :  { %4106 = vmatpush1.bf16.msra.mxu0 %v4105_v0 }
 0x506   :  { %4108 = vmatprep.subr.bf16.mxu0 %v4107_v19 }
 0x509   :  { %4110 = vmatpush1.bf16.msra.mxu0 %v4109_v31 }
 0x50a   :  { %4112 = vmatprep.subr.bf16.mxu0 %v4111_v29 }
 0x50d   :  { %4114 = vmatpush1.bf16.msra.mxu0 %v4113_v3 }
 0x50e   :  { %4116 = vmatprep.subr.bf16.mxu0 %v4115_v7 }
 0x511   :  { %4118 = vmatpush1.bf16.msra.mxu0 %v4117_v46 }
 0x512   :  { %4120 = vmatprep.subr.bf16.mxu0 %v4119_v50 }
 0x515   :  { %4122 = vmatpush1.bf16.msra.mxu0 %v4121_v51 }
 0x516   :  { %4124 = vmatprep.subr.bf16.mxu0 %v4123_v52 }
 0x519   :  { %4126 = vmatpush1.bf16.msra.mxu0 %v4125_v42 }
 0x51a   :  { %4128 = vmatprep.subr.bf16.mxu0 %v4127_v55 }
 0x51d   :  { %4130 = vmatpush1.bf16.msra.mxu0 %v4129_v59 }
 0x51e   :  { %4132 = vmatprep.subr.bf16.mxu0 %v4131_v60 }
 0x5bb   :  { %v1294_v30 = vpop.f32.mrb[28].mxu0 }
 0x5bc   :  { %v1296_v2 = vpop.f32.mrb[29].mxu0  ;;  %v1304_v12 = vsel %vm1303_vm10, %v1294_v30, -inf }
 0x5bf   :  { %v1299_v1 = vpop.f32.mrb[30].mxu0 }
 0x5c0   :  { %v1306_v14 = vsel %vm1305_vm11, %v1299_v1, -inf  ;;  %v1301_v8 = vpop.f32.mrb[31].mxu0 }
 0x5c1   :  { %v1307_v15 = vmax.f32 %v1304_v12, %v1306_v14  ;;  %v1660_v8 = vld [vmem:[#allocation8 + $0x8] sm:$0xff] }
 0x5c3   :  { %v1308_v6 = vrot.slane %v1307_v15, 4 }
 0x5c5   :  { %v1309_v63 = vmax.f32 %v1307_v15, %v1308_v6  ;;  %v1662_v15 = vld [vmem:[#allocation8 + $0x18] sm:$0xff] }
 0x5c7   :  { %v1310_v0 = vrot.slane %v1309_v63, 2 }
 0x5c9   :  { %v1311_v9 = vmax.f32 %v1309_v63, %v1310_v0 }
 0x5cb   :  { %v1312_v19 = vrot.slane %v1311_v9, 1 }
 0x5cd   :  { %v1313_v27 = vmax.f32 %v1311_v9, %v1312_v19  ;;  %v3711_v19 = vpack.c.bf16 %v1662_v15, %v1660_v8  ;;  %v1690_v8 = vld [vmem:[#allocation8 + $0xf8] sm:$0xff] }
 0x5cf   :  { %v1314_v34 = vsub.f32 %v1294_v30, %v1313_v27  ;;  %v1315_v38 = vsub.f32 %v1299_v1, %v1313_v27  ;;  %v1506_v20 = vpop.f32.mrb[32].mxu0 }
 0x5d0   :  { %v1508_v31 = vpop.f32.mrb[33].mxu0  ;;  %v1515_v62 = vsel %vm1303_vm10, %v1506_v20, -inf }
 0x5d1   :  { %v1316_v29 = vmul.f32 1.442695, %v1314_v34  ;;  %v1318_v39 = vmul.f32 1.442695, %v1315_v38  ;;  %v1661_v31 = vld [vmem:[#allocation8 + $0x10] sm:$0xff] }
 0x5d3   :  { %4750 = vpow2.f32 %v1316_v29  ;;  %v1511_v24 = vpop.f32.mrb[34].mxu0 }
 0x5d4   :  { %4752 = vpow2.f32 %v1318_v39  ;;  %v1516_v32 = vsel %vm1305_vm11, %v1511_v24, -inf  ;;  %v1513_v3 = vpop.f32.mrb[35].mxu0  ;;  %v1664_v39 = vld [vmem:[#allocation8 + $0x28] sm:$0xff] }
 0x5d5   :  { %v1517_v7 = vmax.f32 %v1515_v62, %v1516_v32  ;;  %v1665_v3 = vld [vmem:[#allocation8 + $0x30] sm:$0xff] }
 0x5d7   :  { %v1518_v10 = vrot.slane %v1517_v7, 4 }
 0x5d9   :  { %v1519_v18 = vmax.f32 %v1517_v7, %v1518_v10  ;;  %v1668_v7 = vld [vmem:[#allocation8 + $0x48] sm:$0xff]  ;;  %v1670_v10 = vld [vmem:[#allocation8 + $0x58] sm:$0xff] }
 0x5db   :  { %v1520_v33 = vrot.slane %v1519_v18, 2 }
 0x5dd   :  { %v4751_v41 = vpop.eup %4750  ;;  %v1521_v46 = vmax.f32 %v1519_v18, %v1520_v33  ;;  %v3719_v33 = vpack.c.bf16 %v1670_v10, %v1668_v7 }
 0x5de   :  { %v4753_v50 = vpop.eup %4752  ;;  %v1320_v43 = vsel %vm1303_vm10, %v4751_v41, 0.0 }
 0x5df   :  { %v1321_v21 = vsel %vm1305_vm11, %v4753_v50, 0.0  ;;  %v1522_v17 = vrot.slane %v1521_v46, 1 }
 0x5e0   :  { %v1322_v22 = vadd.f32 %v1321_v21, %v1320_v43  ;;  %v1674_v43 = vld [vmem:[#allocation8 + $0x78] sm:$0xff] }
 0x5e1   :  { %v1523_v51 = vmax.f32 %v1521_v46, %v1522_v17  ;;  %v1669_v46 = vld [vmem:[#allocation8 + $0x50] sm:$0xff] }
 0x5e2   :  { %v1323_v52 = vrot.slane %v1322_v22, 4 }
 0x5e3   :  { %v1524_v23 = vsub.f32 %v1506_v20, %v1523_v51  ;;  %v1525_v49 = vsub.f32 %v1511_v24, %v1523_v51  ;;  %v1659_v20 = vld [vmem:[#allocation8] sm:$0xff]  ;;  %v1666_v24 = vld [vmem:[#allocation8 + $0x38] sm:$0xff]  ;;  %v1673_v51 = vld [vmem:[#allocation8 + $0x70] sm:$0xff] }
 0x5e4   :  { %v1324_v4 = vadd.f32 %v1323_v52, %v1322_v22  ;;  %v3713_v32 = vpack.c.bf16 %v1661_v31, %v1659_v20  ;;  %v3715_v16 = vpack.c.bf16 %v1666_v24, %v1664_v39  ;;  %v1671_v22 = vld [vmem:[#allocation8 + $0x60] sm:$0xff]  ;;  %v1676_v52 = vld [vmem:[#allocation8 + $0x88] sm:$0xff]  ;;  %v1693_v20 = vld [vmem:[#allocation8 + $0x110] sm:$0xff] }
 0x5e5   :  { %v1526_v11 = vmul.f32 1.442695, %v1524_v23  ;;  %v1528_v42 = vmul.f32 1.442695, %v1525_v49  ;;  %v1678_v23 = vld [vmem:[#allocation8 + $0x98] sm:$0xff]  ;;  %v1696_v31 = vld [vmem:[#allocation8 + $0x128] sm:$0xff] }
 0x5e6   :  { %v1325_v55 = vrot.slane %v1324_v4, 2  ;;  %v3727_v49 = vpack.c.bf16 %v1678_v23, %v1676_v52 }
 0x5e7   :  { %4754 = vpow2.f32 %v1526_v11  ;;  %v1677_v11 = vld [vmem:[#allocation8 + $0x90] sm:$0xff] }
 0x5e8   :  { %v1326_v47 = vadd.f32 %v1325_v55, %v1324_v4  ;;  %4756 = vpow2.f32 %v1528_v42  ;;  %v1675_v4 = vld [vmem:[#allocation8 + $0x80] sm:$0xff]  ;;  %v1680_v42 = vld [vmem:[#allocation8 + $0xa8] sm:$0xff]  ;;  %v1682_v55 = vld [vmem:[#allocation8 + $0xb8] sm:$0xff] }
 0x5ea   :  { %v1327_v13 = vrot.slane %v1326_v47, 1 }
 0x5ec   :  { %v1328_v57 = vadd.f32 %v1327_v13, %v1326_v47  ;;  %v3729_v47 = vpack.c.bf16 %v1677_v11, %v1675_v4  ;;  %v3731_v13 = vpack.c.bf16 %v1682_v55, %v1680_v42  ;;  %v1703_v4 = vld [vmem:[#allocation8 + $0x160] sm:$0xff]  ;;  %v1705_v42 = vld [vmem:[#allocation8 + $0x170] sm:$0xff] }
 0x5ed   :  { %v2589_v55 = vld [vmem:[#allocation8 + $0xd60] sm:$0xff] }
 0x5ee   :  { %4758 = vrcp.f32 %v1328_v57  ;;  %v1679_v57 = vld [vmem:[#allocation8 + $0xa0] sm:$0xff] }
 0x5f1   :  { %v4755_v5 = vpop.eup %4754 }
 0x5f2   :  { %v4757_v59 = vpop.eup %4756  ;;  %v1530_v60 = vsel %vm1303_vm10, %v4755_v5, 0.0 }
 0x5f3   :  { %v1531_v30 = vsel %vm1305_vm11, %v4757_v59, 0.0 }
 0x5f4   :  { %v1532_v2 = vadd.f32 %v1531_v30, %v1530_v60  ;;  %v1686_v60 = vld [vmem:[#allocation8 + $0xd8] sm:$0xff] }
 0x5f6   :  { %v1533_v1 = vrot.slane %v1532_v2, 4 }
 0x5f8   :  { %v4759_v12 = vpop.eup %4758  ;;  %v1534_v14 = vadd.f32 %v1533_v1, %v1532_v2  ;;  %v1683_v1 = vld [vmem:[#allocation8 + $0xc0] sm:$0xff] }
 0x5f9   :  { %v1330_v6 = vmul.f32 0.28867513, %v4759_v12  ;;  %v1685_v12 = vld [vmem:[#allocation8 + $0xd0] sm:$0xff] }
 0x5fa   :  { %v1535_v63 = vrot.slane %v1534_v14, 2  ;;  %v3737_v15 = vpack.c.bf16 %v1685_v12, %v1683_v1  ;;  %v1707_v1 = vld [vmem:[#allocation8 + $0x180] sm:$0xff]  ;;  %v1709_v12 = vld [vmem:[#allocation8 + $0x190] sm:$0xff] }
 0x5fb   :  { %v1331_v0 = vmul.f32 %v4751_v41, %v1330_v6  ;;  %v1332_v9 = vmul.f32 %v4753_v50, %v1330_v6  ;;  %v1667_v41 = vld [vmem:[#allocation8 + $0x40] sm:$0xff]  ;;  %v1672_v50 = vld [vmem:[#allocation8 + $0x68] sm:$0xff] }
 0x5fc   :  { %v1536_v27 = vadd.f32 %v1535_v63, %v1534_v14  ;;  %v3721_v21 = vpack.c.bf16 %v1669_v46, %v1667_v41  ;;  %v3723_v17 = vpack.c.bf16 %v1674_v43, %v1672_v50  ;;  %v1688_v14 = vld [vmem:[#allocation8 + $0xe8] sm:$0xff]  ;;  %v1687_v63 = vld [vmem:[#allocation8 + $0xe0] sm:$0xff]  ;;  %v1701_v50 = vld [vmem:[#allocation8 + $0x150] sm:$0xff] }
 0x5fd   :  { %3589 = vmatmul.mubr.msk.f32.vlgmr.msra.gmra.mrb[12].mxu1 %vm1303_vm10, %v1331_v0  ;;  %v3739_v6 = vpack.c.bf16 %v1690_v8, %v1688_v14  ;;  %v1689_v0 = vld [vmem:[#allocation8 + $0xf0] sm:$0xff]  ;;  %v1699_v46 = vld [vmem:[#allocation8 + $0x140] sm:$0xff] }
 0x5fe   :  { %v1537_v34 = vrot.slane %v1536_v27, 1  ;;  %3710 = vmatpush1.bf16.msk.msra.mxu1 %vm5482_vm8, %v3708_v54  ;;  %1415 = vmatprep.mubr.f32.mxu1 %v4937_v26  ;;  %v1663_v54 = vld [vmem:[#allocation8 + $0x20] sm:$0xff] }
 0x5ff   :  { %3712 = vmatprep.subr.bf16.mxu1 %v3711_v19  ;;  %v3717_v18 = vpack.c.bf16 %v1665_v3, %v1663_v54  ;;  %v1694_v19 = vld [vmem:[#allocation8 + $0x118] sm:$0xff]  ;;  %v1700_v54 = vld [vmem:[#allocation8 + $0x148] sm:$0xff]  ;;  %v2585_v43 = vld [vmem:[#allocation8 + $0xd40] sm:$0xff] }
 0x600   :  { %v1538_v38 = vadd.f32 %v1537_v34, %v1536_v27  ;;  %v3741_v27 = vpack.c.bf16 %v1689_v0, %v1687_v63  ;;  %v1702_v3 = vld [vmem:[#allocation8 + $0x158] sm:$0xff]  ;;  %v2593_v8 = vld [vmem:[#allocation8 + $0xd80] sm:$0xff]  ;;  %v3761_v63 = vpack.c.bf16 %v1709_v12, %v1707_v1  ;;  %v5627_v12 = vld [vmem:[#allocation8 + $0x210] sm:$0xff] }
 0x601   :  { %3590 = vmatmul.mubr.msk.f32.gmra.mrb[14].mxu1 %vm1303_vm10, %v1332_v9  ;;  %v1692_v9 = vld [vmem:[#allocation8 + $0x108] sm:$0xff]  ;;  %v3751_v10 = vpack.c.bf16 %v1702_v3, %v1700_v54  ;;  %v1714_v0 = vld [vmem:[#allocation8 + $0x1b8] sm:$0xff]  ;;  %v5625_v1 = vld [vmem:[#allocation8 + $0x200] sm:$0xff] }
 0x602   :  { %4760 = vrcp.f32 %v1538_v38  ;;  %1619 = vmatprep.mubr.f32.mxu1 %v4937_v26  ;;  %v3743_v34 = vpack.c.bf16 %v1694_v19, %v1692_v9  ;;  %v1691_v38 = vld [vmem:[#allocation8 + $0x100] sm:$0xff]  ;;  %v2598_v9 = vld [vmem:[#allocation8 + $0xda8] sm:$0xff]  ;;  %v2600_v19 = vld [vmem:[#allocation8 + $0xdb8] sm:$0xff] }
 0x603   :  { %v3745_v39 = vpack.c.bf16 %v1693_v20, %v1691_v38  ;;  %v1711_v38 = vld [vmem:[#allocation8 + $0x1a0] sm:$0xff]  ;;  %v1713_v20 = vld [vmem:[#allocation8 + $0x1b0] sm:$0xff] }
 0x60c   :  { %v4761_v29 = vpop.eup %4760 }
 0x60d   :  { %v1540_v62 = vmul.f32 0.28867513, %v4761_v29  ;;  %v1698_v29 = vld [vmem:[#allocation8 + $0x138] sm:$0xff] }
 0x60e   :  { %v3747_v24 = vpack.c.bf16 %v1698_v29, %v1696_v31  ;;  %v2597_v31 = vld [vmem:[#allocation8 + $0xda0] sm:$0xff]  ;;  %v4147_v29 = vpack.c.bf16 %v2600_v19, %v2598_v9  ;;  %v5643_v19 = vld [vmem:[#allocation8 + $0x230] sm:$0xff] }
 0x60f   :  { %v1541_v58 = vmul.f32 %v4755_v5, %v1540_v62  ;;  %v1542_v25 = vmul.f32 %v4757_v59, %v1540_v62  ;;  %v1681_v5 = vld [vmem:[#allocation8 + $0xb0] sm:$0xff]  ;;  %v1684_v59 = vld [vmem:[#allocation8 + $0xc8] sm:$0xff]  ;;  %v1695_v62 = vld [vmem:[#allocation8 + $0x120] sm:$0xff] }
 0x610   :  { %v3733_v30 = vpack.c.bf16 %v1681_v5, %v1679_v57  ;;  %v3735_v2 = vpack.c.bf16 %v1686_v60, %v1684_v59  ;;  %v1708_v5 = vld [vmem:[#allocation8 + $0x188] sm:$0xff]  ;;  %v1710_v59 = vld [vmem:[#allocation8 + $0x198] sm:$0xff]  ;;  %v5641_v9 = vld [vmem:[#allocation8 + $0x220] sm:$0xff] }
 0x611   :  { %3593 = vmatmul.mubr.msk.f32.vlgmr.msra.gmra.mrb[16].mxu1 %vm1303_vm10, %v1541_v58  ;;  %v2581_v58 = vld [vmem:[#allocation8 + $0xd20] sm:$0xff]  ;;  %v2594_v60 = vld [vmem:[#allocation8 + $0xd88] sm:$0xff] }
 0x612   :  { %1625 = vmatprep.mubr.f32.mxu1 %v4937_v26  ;;  %3714 = vmatpush1.bf16.msra.mxu1 %v3713_v32  ;;  %v3725_v26 = vpack.c.bf16 %v1673_v51, %v1671_v22  ;;  %v1697_v32 = vld [vmem:[#allocation8 + $0x130] sm:$0xff]  ;;  %v1704_v22 = vld [vmem:[#allocation8 + $0x168] sm:$0xff]  ;;  %v1706_v51 = vld [vmem:[#allocation8 + $0x178] sm:$0xff] }
 0x613   :  { %3716 = vmatprep.subr.bf16.mxu1 %v3715_v16  ;;  %v2583_v16 = vld [vmem:[#allocation8 + $0xd30] sm:$0xff]  ;;  %v3755_v23 = vpack.c.bf16 %v1706_v51, %v1704_v22  ;;  %v2608_v22 = vld [vmem:[#allocation8 + $0xdf8] sm:$0xff] }
 0x614   :  { %v4133_v7 = vpack.c.bf16 %v2583_v16, %v2581_v58  ;;  %v2604_v58 = vld [vmem:[#allocation8 + $0xdd8] sm:$0xff] }
 0x615   :  { %3594 = vmatmul.mubr.msk.f32.gmra.mrb[18].mxu1 %vm1303_vm10, %v1542_v25  ;;  %v3749_v25 = vpack.c.bf16 %v1697_v32, %v1695_v62  ;;  %v1718_v62 = vld [vmem:[#allocation8 + $0x1d8] sm:$0xff]  ;;  %v2602_v32 = vld [vmem:[#allocation8 + $0xdc8] sm:$0xff] }
 0x616   :  { %3718 = vmatpush1.bf16.msra.mxu1 %v3717_v18  ;;  %v2586_v18 = vld [vmem:[#allocation8 + $0xd48] sm:$0xff]  ;;  %4134 = vmatpush1.bf16.msra.mxu0 %v4133_v7  ;;  %v4151_v3 = vpack.c.bf16 %v2604_v58, %v2602_v32  ;;  %v1715_v7 = vld [vmem:[#allocation8 + $0x1c0] sm:$0xff]  ;;  %v5666_v58 = vld [vmem:[#allocation8 + $0xe50] sm:$0xff] }
 0x617   :  { %3720 = vmatprep.subr.bf16.mxu1 %v3719_v33  ;;  %v2588_v33 = vld [vmem:[#allocation8 + $0xd58] sm:$0xff] }
 0x618   :  { %v4135_v41 = vpack.c.bf16 %v2588_v33, %v2586_v18  ;;  %v2601_v18 = vld [vmem:[#allocation8 + $0xdc0] sm:$0xff] }
 0x61a   :  { %3722 = vmatpush1.bf16.msra.mxu1 %v3721_v21  ;;  %4136 = vmatprep.subr.bf16.mxu0 %v4135_v41  ;;  %v3753_v21 = vpack.c.bf16 %v1701_v50, %v1699_v46  ;;  %v2603_v41 = vld [vmem:[#allocation8 + $0xdd0] sm:$0xff]  ;;  %v1720_v46 = vld [vmem:[#allocation8 + $0x1e8] sm:$0xff]  ;;  %v1722_v50 = vld [vmem:[#allocation8 + $0x1f8] sm:$0xff] }
 0x61b   :  { %3724 = vmatprep.subr.bf16.mxu1 %v3723_v17  ;;  %v2587_v17 = vld [vmem:[#allocation8 + $0xd50] sm:$0xff] }
 0x61c   :  { %v4137_v52 = vpack.c.bf16 %v2587_v17, %v2585_v43  ;;  %v4153_v43 = vpack.c.bf16 %v2603_v41, %v2601_v18  ;;  %v2606_v17 = vld [vmem:[#allocation8 + $0xde8] sm:$0xff]  ;;  %v5683_v18 = vld [vmem:[#allocation8 + $0xe78] sm:$0xff] }
 0x61d   :  { %v4155_v51 = vpack.c.bf16 %v2608_v22, %v2606_v17 }
 0x61e   :  { %3726 = vmatpush1.bf16.msra.mxu1 %v3725_v26  ;;  %v2590_v26 = vld [vmem:[#allocation8 + $0xd68] sm:$0xff]  ;;  %4138 = vmatpush1.bf16.msra.mxu0 %v4137_v52  ;;  %v1719_v52 = vld [vmem:[#allocation8 + $0x1e0] sm:$0xff] }
 0x61f   :  { %3728 = vmatprep.subr.bf16.mxu1 %v3727_v49  ;;  %v2592_v49 = vld [vmem:[#allocation8 + $0xd78] sm:$0xff] }
 0x620   :  { %v4139_v11 = vpack.c.bf16 %v2592_v49, %v2590_v26  ;;  %v2605_v26 = vld [vmem:[#allocation8 + $0xde0] sm:$0xff] }
 0x622   :  { %3730 = vmatpush1.bf16.msra.mxu1 %v3729_v47  ;;  %v2591_v47 = vld [vmem:[#allocation8 + $0xd70] sm:$0xff]  ;;  %4140 = vmatprep.subr.bf16.mxu0 %v4139_v11 }
 0x623   :  { %3732 = vmatprep.subr.bf16.mxu1 %v3731_v13  ;;  %v3757_v13 = vpack.c.bf16 %v1705_v42, %v1703_v4  ;;  %v4141_v57 = vpack.c.bf16 %v2591_v47, %v2589_v55  ;;  %v2607_v4 = vld [vmem:[#allocation8 + $0xdf0] sm:$0xff]  ;;  %v1806_v42 = vld [vmem:[#allocation8 + $0x208] sm:$0xff]  ;;  %v1808_v55 = vld [vmem:[#allocation8 + $0x218] sm:$0xff] }
 0x624   :  { %v4157_v11 = vpack.c.bf16 %v2607_v4, %v2605_v26  ;;  %v2694_v47 = vld [vmem:[#allocation8 + $0xe08] sm:$0xff] }
 0x625   :  { %4142 = vmatpush1.bf16.msra.mxu0 %v4141_v57  ;;  %v2696_v57 = vld [vmem:[#allocation8 + $0xe18] sm:$0xff] }
 0x626   :  { %3734 = vmatpush1.bf16.msra.mxu1 %v3733_v30  ;;  %v3759_v30 = vpack.c.bf16 %v1710_v59, %v1708_v5  ;;  %v4159_v5 = vpack.c.bf16 %v2696_v57, %v2694_v47 }
 0x627   :  { %3736 = vmatprep.subr.bf16.mxu1 %v3735_v2  ;;  %v2596_v2 = vld [vmem:[#allocation8 + $0xd98] sm:$0xff] }
 0x628   :  { %v4143_v14 = vpack.c.bf16 %v2596_v2, %v2594_v60 }
 0x62a   :  { %3738 = vmatpush1.bf16.msra.mxu1 %v3737_v15  ;;  %v2595_v15 = vld [vmem:[#allocation8 + $0xd90] sm:$0xff]  ;;  %4144 = vmatprep.subr.bf16.mxu0 %v4143_v14  ;;  %v5629_v14 = vld [vmem:[#allocation8 + $0xe00] sm:$0xff] }
 0x62b   :  { %3740 = vmatprep.subr.bf16.mxu1 %v3739_v6  ;;  %v1712_v6 = vld [vmem:[#allocation8 + $0x1a8] sm:$0xff] }
 0x62e   :  { %3742 = vmatpush1.bf16.msra.mxu1 %v3741_v27  ;;  %v4145_v27 = vpack.c.bf16 %v2595_v15, %v2593_v8  ;;  %v5631_v8 = vld [vmem:[#allocation8 + $0xe10] sm:$0xff]  ;;  %v5633_v15 = vld [vmem:[#allocation8 + $0x228] sm:$0xff] }
 0x62f   :  { %3744 = vmatprep.subr.bf16.mxu1 %v3743_v34  ;;  %v3763_v34 = vpack.c.bf16 %v1714_v0, %v1712_v6  ;;  %v5635_v6 = vld [vmem:[#allocation8 + $0x238] sm:$0xff] }
 0x630   :  { %4146 = vmatpush1.bf16.msra.mxu0 %v4145_v27  ;;  %v5639_v0 = vld [vmem:[#allocation8 + $0xe38] sm:$0xff]  ;;  %v5645_v27 = vld [vmem:[#allocation8 + $0xe20] sm:$0xff] }
 0x631   :  { %4148 = vmatprep.subr.bf16.mxu0 %v4147_v29  ;;  %v5655_v29 = vld [vmem:[#allocation8 + $0xe58] sm:$0xff] }
 0x632   :  { %3746 = vmatpush1.bf16.msra.mxu1 %v3745_v39  ;;  %v2599_v39 = vld [vmem:[#allocation8 + $0xdb0] sm:$0xff] }
 0x633   :  { %3748 = vmatprep.subr.bf16.mxu1 %v3747_v24  ;;  %v1716_v24 = vld [vmem:[#allocation8 + $0x1c8] sm:$0xff]  ;;  %v4149_v16 = vpack.c.bf16 %v2599_v39, %v2597_v31  ;;  %v5657_v39 = vld [vmem:[#allocation8 + $0x240] sm:$0xff] }
 0x634   :  { %v3767_v54 = vpack.c.bf16 %v1718_v62, %v1716_v24  ;;  %v5653_v31 = vld [vmem:[#allocation8 + $0xe48] sm:$0xff]  ;;  %v5659_v24 = vld [vmem:[#allocation8 + $0x250] sm:$0xff]  ;;  %v5661_v62 = vld [vmem:[#allocation8 + $0xe40] sm:$0xff] }
 0x635   :  { %4150 = vmatpush1.bf16.msra.mxu0 %v4149_v16  ;;  %v5670_v16 = vld [vmem:[#allocation8 + $0x278] sm:$0xff] }
 0x636   :  { %3750 = vmatpush1.bf16.msra.mxu1 %v3749_v25  ;;  %v3765_v25 = vpack.c.bf16 %v1713_v20, %v1711_v38  ;;  %4152 = vmatprep.subr.bf16.mxu0 %v4151_v3  ;;  %v5649_v38 = vld [vmem:[#allocation8 + $0x248] sm:$0xff]  ;;  %v5651_v20 = vld [vmem:[#allocation8 + $0x258] sm:$0xff]  ;;  %v3777_v3 = vpack.c.bf16 %v5627_v12, %v5625_v1 }
 0x637   :  { %3752 = vmatprep.subr.bf16.mxu1 %v3751_v10  ;;  %v1717_v10 = vld [vmem:[#allocation8 + $0x1d0] sm:$0xff] }
 0x638   :  { %v3769_v33 = vpack.c.bf16 %v1717_v10, %v1715_v7  ;;  %v4161_v7 = vpack.c.bf16 %v5631_v8, %v5629_v14  ;;  %v5681_v10 = vld [vmem:[#allocation8 + $0xe68] sm:$0xff] }
 0x639   :  { %4154 = vmatpush1.bf16.msra.mxu0 %v4153_v43  ;;  %v3785_v43 = vpack.c.bf16 %v5659_v24, %v5657_v39 }
 0x63a   :  { %3754 = vmatpush1.bf16.msra.mxu1 %v3753_v21  ;;  %v3771_v21 = vpack.c.bf16 %v1722_v50, %v1720_v46  ;;  %4156 = vmatprep.subr.bf16.mxu0 %v4155_v51  ;;  %v3783_v46 = vpack.c.bf16 %v5651_v20, %v5649_v38  ;;  %v4167_v50 = vpack.c.bf16 %v5655_v29, %v5653_v31 }
 0x63b   :  { %3756 = vmatprep.subr.bf16.mxu1 %v3755_v23  ;;  %v1721_v23 = vld [vmem:[#allocation8 + $0x1f0] sm:$0xff] }
 0x63c   :  { %v3773_v49 = vpack.c.bf16 %v1721_v23, %v1719_v52  ;;  %v4171_v52 = vpack.c.bf16 %v5683_v18, %v5681_v10 }
 0x63d   :  { %4158 = vmatpush1.bf16.msra.mxu0 %v4157_v11 }
 0x63e   :  { %3758 = vmatpush1.bf16.msra.mxu1 %v3757_v13  ;;  %v3775_v13 = vpack.c.bf16 %v1808_v55, %v1806_v42  ;;  %4160 = vmatprep.subr.bf16.mxu0 %v4159_v5 }
 0x63f   :  { %3760 = vmatprep.subr.bf16.mxu1 %v3759_v30 }
 0x642   :  { %3762 = vmatpush1.bf16.msra.mxu1 %v3761_v63  ;;  %v5637_v63 = vld [vmem:[#allocation8 + $0xe28] sm:$0xff] }
 0x643   :  { %3764 = vmatprep.subr.bf16.mxu1 %v3763_v34  ;;  %v5647_v34 = vld [vmem:[#allocation8 + $0xe30] sm:$0xff] }
 0x644   :  { %v4165_v41 = vpack.c.bf16 %v5647_v34, %v5645_v27 }
 0x646   :  { %3766 = vmatpush1.bf16.msra.mxu1 %v3765_v25  ;;  %v5668_v25 = vld [vmem:[#allocation8 + $0x268] sm:$0xff] }
 0x647   :  { %3768 = vmatprep.subr.bf16.mxu1 %v3767_v54  ;;  %v3787_v17 = vpack.c.bf16 %v5670_v16, %v5668_v25  ;;  %v1825_v16 = vld [vmem:[#allocation8 + $0x2a0] sm:$0xff] }
 0x64a   :  { %3770 = vmatpush1.bf16.msra.mxu1 %v3769_v33  ;;  %v4163_v33 = vpack.c.bf16 %v5639_v0, %v5637_v63  ;;  %v2705_v0 = vld [vmem:[#allocation8 + $0xe60] sm:$0xff] }
 0x64b   :  { %3772 = vmatprep.subr.bf16.mxu1 %v3771_v21  ;;  %v4169_v21 = vpack.c.bf16 %v5666_v58, %v5661_v62  ;;  %v2709_v62 = vld [vmem:[#allocation8 + $0xe80] sm:$0xff]  ;;  %v2711_v58 = vld [vmem:[#allocation8 + $0xe90] sm:$0xff] }
 0x64c   :  { %v4177_v25 = vpack.c.bf16 %v2711_v58, %v2709_v62  ;;  %v1837_v62 = vld [vmem:[#allocation8 + $0x300] sm:$0xff]  ;;  %v1839_v58 = vld [vmem:[#allocation8 + $0x310] sm:$0xff] }
 0x64e   :  { %3774 = vmatpush1.bf16.msra.mxu1 %v3773_v49 }
 0x64f   :  { %3776 = vmatprep.subr.bf16.mxu1 %v3775_v13 }
 0x6d0   :  { %v1411_v59 = vpop.f32.mrb[12].mxu1 }
 0x6d1   :  { %v1413_v60 = vpop.f32.mrb[13].mxu1  ;;  %v5664_v32 = vadd.f32 %v1411_v59, %v5289_v28  ;;  %v3779_v28 = vpack.c.bf16 %v5635_v6, %v5633_v15 }
 0x6d2   :  { %v5673_v54 = vadd.f32 %v1413_v60, %v5296_v36  ;;  %v3781_v36 = vpack.c.bf16 %v5643_v19, %v5641_v9  ;;  %v1822_v9 = vld [vmem:[#allocation8 + $0x288] sm:$0xff] }
 0x6d3   :  { %v2534_v51 = vrot.slane %v5664_v32, 6  ;;  %v1798_v23 = vrot.slane %v5664_v32, 1  ;;  %v2682_v26 = vrot.slane %v5664_v32, 7  ;;  %v2238_v63 = vrot.slane %v5664_v32, 4 }
 0x6d4   :  { %v1417_v30 = vpop.f32.mrb[14].mxu1  ;;  %v2535_v11 = vrot.slane %v5673_v54, 6  ;;  %v1799_v42 = vrot.slane %v5673_v54, 1  ;;  %v2683_v55 = vrot.slane %v5673_v54, 7  ;;  %v1943_v5 = vrot.slane %v5673_v54, 2 }
 0x6d5   :  { %v1419_v2 = vpop.f32.mrb[15].mxu1  ;;  %v5713_v47 = vadd.f32 %v1417_v30, %v5293_v35  ;;  %v2386_v20 = vrot.slane %v5664_v32, 5 }
 0x6d6   :  { %v5716_v13 = vadd.f32 %v1419_v2, %v5299_v37 }
 0x6d8   :  { %v3123_v6 = vrot.slane %v5716_v13, 2 }
 0x6e4   :  { %v1621_v22 = vpop.f32.mrb[16].mxu1 }
 0x6e5   :  { %v5707_v49 = vadd.f32 %v1621_v22, %v5323_v48  ;;  %v1623_v4 = vpop.f32.mrb[17].mxu1 }
 0x6e6   :  { %v5719_v57 = vadd.f32 %v1623_v4, %v5302_v40 }
 0x6e7   :  { %v1652_v48 = vrot.slane %v5707_v49, 7  ;;  %v2538_v59 = vrot.slane %v5707_v49, 5  ;;  %v5726_v60 = vsel %vm1656_vm12, %v1798_v23, %v5707_v49  ;;  %v2686_v1 = vrot.slane %v5707_v49, 6 }
 0x6e8   :  { %v1627_v35 = vpop.f32.mrb[18].mxu1  ;;  %v1653_v30 = vrot.slane %v5719_v57, 7  ;;  %v2539_v37 = vrot.slane %v5719_v57, 5  ;;  %v1803_v40 = vsel %vm1656_vm12, %v1799_v42, %v5719_v57  ;;  %v2687_v2 = vrot.slane %v5719_v57, 6 }
 0x6e9   :  { %v5735_v12 = vadd.f32 %v1627_v35, %v5316_v45  ;;  %v1629_v14 = vpop.f32.mrb[19].mxu1  ;;  %v1657_v8 = vsel %vm1656_vm12, %v5664_v32, %v1652_v48  ;;  %v2542_v22 = vsel %vm1656_vm12, %v2534_v51, %v2538_v59  ;;  %v5741_v23 = vsel %vm1656_vm12, %v2682_v26, %v2686_v1  ;;  %v5756_v59 = vld [vmem:[#allocation8 + $0x270] sm:$0xff] }
 0x6ea   :  { %v5744_v4 = vadd.f32 %v1629_v14, %v5312_v44  ;;  %v1658_v42 = vsel %vm1656_vm12, %v5673_v54, %v1653_v30  ;;  %v2543_v61 = vsel %vm1656_vm12, %v2535_v11, %v2539_v37  ;;  %v2691_v45 = vsel %vm1656_vm12, %v2683_v55, %v2687_v2  ;;  %v5754_v44 = vld [vmem:[#allocation8 + $0x260] sm:$0xff] }
 0x6eb   :  { %1787 = vmatprep.mubr.f32.mxu1 %v1658_v42  ;;  %2673 = vmatprep.mubr.f32.mxu0 %v2543_v61  ;;  %v1947_v35 = vrot.slane %v5719_v57, 1  ;;  %v1942_v48 = vrot.slane %v5664_v32, 2  ;;  %v2091_v51 = vrot.slane %v5673_v54, 3  ;;  %v2979_v26 = vrot.slane %v5716_v13, 1 }
 0x6ec   :  { %1788 = vmatmul.mubr.f32.vlgmr.msra.gmra.mrb[20].mxu1 %v1657_v8  ;;  %2674 = vmatmul.mubr.f32.vlgmr.msra.gmra.mrb[36].mxu0 %v2542_v22  ;;  %v2833_v11 = vrot.slane %v5744_v4, 7  ;;  %v1946_v55 = vrot.slane %v5707_v49, 1  ;;  %v2832_v61 = vrot.slane %v5735_v12, 7  ;;  %v2090_v1 = vrot.slane %v5664_v32, 3  ;;  %v1821_v32 = vld [vmem:[#allocation8 + $0x280] sm:$0xff] }
 0x6ed   :  { %3778 = vmatpush1.bf16.msra.mxu1 %v3777_v3  ;;  %4162 = vmatpush1.bf16.msra.mxu0 %v4161_v7  ;;  %v5763_v30 = vsel %vm1656_vm12, %v1943_v5, %v1947_v35  ;;  %v2095_v37 = vrot.slane %v5719_v57, 2  ;;  %v5768_v2 = vsel %vm1656_vm12, %v2979_v26, %v5744_v4  ;;  %v2978_v14 = vrot.slane %v5713_v47, 1 }
 0x6ee   :  { %1933 = vmatprep.mubr.f32.mxu1 %v1803_v40  ;;  %2821 = vmatprep.mubr.f32.mxu0 %v2691_v45  ;;  %v5773_v8 = vsel %vm1656_vm12, %v5716_v13, %v2833_v11  ;;  %v5776_v3 = vsel %vm1656_vm12, %v1942_v48, %v1946_v55  ;;  %v5780_v7 = vsel %vm1656_vm12, %v5713_v47, %v2832_v61  ;;  %v2094_v5 = vrot.slane %v5707_v49, 2  ;;  %v2714_v55 = vld [vmem:[#allocation8 + $0xea8] sm:$0xff]  ;;  %v2716_v61 = vld [vmem:[#allocation8 + $0xeb8] sm:$0xff] }
 0x6ef   :  { %3780 = vmatprep.subr.bf16.mxu1 %v3779_v28  ;;  %4164 = vmatprep.subr.bf16.mxu0 %v4163_v33  ;;  %v3789_v40 = vpack.c.bf16 %v5756_v59, %v5754_v44  ;;  %v5792_v22 = vsel %vm1656_vm12, %v2091_v51, %v2095_v37  ;;  %v2239_v42 = vrot.slane %v5673_v54, 4  ;;  %v2243_v45 = vrot.slane %v5719_v57, 3  ;;  %v2707_v28 = vld [vmem:[#allocation8 + $0xe70] sm:$0xff]  ;;  %v2710_v44 = vld [vmem:[#allocation8 + $0xe88] sm:$0xff] }
 0x6f0   :  { %v5797_v35 = vsel %vm1656_vm12, %v2090_v1, %v2094_v5  ;;  %v5801_v15 = vsel %vm1656_vm12, %v2978_v14, %v5735_v12  ;;  %v3127_v48 = vrot.slane %v5744_v4, 1  ;;  %v3122_v51 = vrot.slane %v5713_v47, 2  ;;  %v2715_v37 = vld [vmem:[#allocation8 + $0xeb0] sm:$0xff]  ;;  %v1830_v14 = vld [vmem:[#allocation8 + $0x2c8] sm:$0xff]  ;;  %v1832_v5 = vld [vmem:[#allocation8 + $0x2d8] sm:$0xff] }
 0x6f1   :  { %3782 = vmatpush1.bf16.msra.mxu1 %v3781_v36  ;;  %4166 = vmatpush1.bf16.msra.mxu0 %v4165_v41  ;;  %v5812_v33 = vsel %vm1656_vm12, %v2239_v42, %v2243_v45  ;;  %v2387_v26 = vrot.slane %v5673_v54, 5  ;;  %v2242_v19 = vrot.slane %v5707_v49, 3  ;;  %v3126_v27 = vrot.slane %v5735_v12, 1  ;;  %v1824_v41 = vld [vmem:[#allocation8 + $0x298] sm:$0xff]  ;;  %v2718_v42 = vld [vmem:[#allocation8 + $0xec8] sm:$0xff] }
 0x6f2   :  { %3784 = vmatprep.subr.bf16.mxu1 %v3783_v46  ;;  %4168 = vmatprep.subr.bf16.mxu0 %v4167_v50  ;;  %v2391_v34 = vrot.slane %v5719_v57, 4  ;;  %v3271_v36 = vrot.slane %v5716_v13, 3  ;;  %v2712_v54 = vld [vmem:[#allocation8 + $0xe98] sm:$0xff]  ;;  %v5828_v59 = vsel %vm1656_vm12, %v3123_v6, %v3127_v48  ;;  %v3275_v38 = vrot.slane %v5744_v4, 2  ;;  %v1823_v57 = vld [vmem:[#allocation8 + $0x290] sm:$0xff] }
 0x6f3   :  { %v2390_v31 = vrot.slane %v5707_v49, 4  ;;  %v4173_v29 = vpack.c.bf16 %v2707_v28, %v2705_v0  ;;  %v5834_v46 = vsel %vm1656_vm12, %v2238_v63, %v2242_v19  ;;  %v5837_v50 = vsel %vm1656_vm12, %v3122_v51, %v3126_v27  ;;  %v2720_v45 = vld [vmem:[#allocation8 + $0xed8] sm:$0xff]  ;;  %v1831_v0 = vld [vmem:[#allocation8 + $0x2d0] sm:$0xff]  ;;  %v2717_v51 = vld [vmem:[#allocation8 + $0xec0] sm:$0xff] }
 0x6f4   :  { %v3270_v13 = vrot.slane %v5713_v47, 3  ;;  %v5847_v49 = vsel %vm1656_vm12, %v2387_v26, %v2391_v34  ;;  %v5850_v4 = vsel %vm1656_vm12, %v3271_v36, %v3275_v38  ;;  %v3274_v47 = vrot.slane %v5735_v12, 2  ;;  %v2719_v26 = vld [vmem:[#allocation8 + $0xed0] sm:$0xff]  ;;  %v1836_v19 = vld [vmem:[#allocation8 + $0x2f8] sm:$0xff]  ;;  %v2722_v27 = vld [vmem:[#allocation8 + $0xee8] sm:$0xff] }
 0x6f5   :  { %3786 = vmatpush1.bf16.msra.mxu1 %v3785_v43  ;;  %4170 = vmatpush1.bf16.msra.mxu0 %v4169_v21  ;;  %v5853_v11 = vsel %vm1656_vm12, %v2386_v20, %v2390_v31  ;;  %v3791_v39 = vpack.c.bf16 %v1824_v41, %v1822_v9  ;;  %v4175_v24 = vpack.c.bf16 %v2712_v54, %v2710_v44  ;;  %v1826_v43 = vld [vmem:[#allocation8 + $0x2a8] sm:$0xff]  ;;  %v1828_v21 = vld [vmem:[#allocation8 + $0x2b8] sm:$0xff]  ;;  %v1833_v44 = vld [vmem:[#allocation8 + $0x2e0] sm:$0xff] }
 0x6f6   :  { %3788 = vmatprep.subr.bf16.mxu1 %v3787_v17  ;;  %4172 = vmatprep.subr.bf16.mxu0 %v4171_v52  ;;  %v5863_v1 = vsel %vm1656_vm12, %v3270_v13, %v3274_v47  ;;  %v3793_v12 = vpack.c.bf16 %v1823_v57, %v1821_v32  ;;  %v1827_v17 = vld [vmem:[#allocation8 + $0x2b0] sm:$0xff]  ;;  %v3795_v10 = vpack.c.bf16 %v1828_v21, %v1826_v43  ;;  %v2713_v52 = vld [vmem:[#allocation8 + $0xea0] sm:$0xff]  ;;  %v1834_v9 = vld [vmem:[#allocation8 + $0x2e8] sm:$0xff] }
 0x6f7   :  { %v4179_v18 = vpack.c.bf16 %v2716_v61, %v2714_v55  ;;  %v3797_v6 = vpack.c.bf16 %v1827_v17, %v1825_v16  ;;  %v4181_v63 = vpack.c.bf16 %v2715_v37, %v2713_v52  ;;  %v3799_v28 = vpack.c.bf16 %v1832_v5, %v1830_v14  ;;  %v2724_v34 = vld [vmem:[#allocation8 + $0xef8] sm:$0xff]  ;;  %v1835_v54 = vld [vmem:[#allocation8 + $0x2f0] sm:$0xff]  ;;  %v2721_v31 = vld [vmem:[#allocation8 + $0xee0] sm:$0xff] }
 0x6f8   :  { %v4183_v48 = vpack.c.bf16 %v2720_v45, %v2718_v42  ;;  %v4185_v41 = vpack.c.bf16 %v2719_v26, %v2717_v51  ;;  %v3803_v38 = vpack.c.bf16 %v1836_v19, %v1834_v9  ;;  %v4187_v20 = vpack.c.bf16 %v2724_v34, %v2722_v27  ;;  %v1838_v13 = vld [vmem:[#allocation8 + $0x308] sm:$0xff]  ;;  %v1840_v32 = vld [vmem:[#allocation8 + $0x318] sm:$0xff]  ;;  %v2725_v55 = vld [vmem:[#allocation8 + $0xf00] sm:$0xff] }
 0x6f9   :  { %3790 = vmatpush1.bf16.msra.mxu1 %v3789_v40  ;;  %4174 = vmatpush1.bf16.msra.mxu0 %v4173_v29  ;;  %v1829_v40 = vld [vmem:[#allocation8 + $0x2c0] sm:$0xff]  ;;  %v2723_v29 = vld [vmem:[#allocation8 + $0xef0] sm:$0xff]  ;;  %v2726_v57 = vld [vmem:[#allocation8 + $0xf08] sm:$0xff]  ;;  %v3807_v43 = vpack.c.bf16 %v1840_v32, %v1838_v13 }
 0x6fa   :  { %3792 = vmatprep.subr.bf16.mxu1 %v3791_v39  ;;  %4176 = vmatprep.subr.bf16.mxu0 %v4175_v24  ;;  %v3801_v36 = vpack.c.bf16 %v1831_v0, %v1829_v40  ;;  %v2728_v47 = vld [vmem:[#allocation8 + $0xf18] sm:$0xff]  ;;  %v3805_v39 = vpack.c.bf16 %v1835_v54, %v1833_v44  ;;  %v4189_v24 = vpack.c.bf16 %v2723_v29, %v2721_v31  ;;  %v2727_v61 = vld [vmem:[#allocation8 + $0xf10] sm:$0xff]  ;;  %v2730_v16 = vld [vmem:[#allocation8 + $0xf28] sm:$0xff] }
 0x6fb   :  { %v4191_v21 = vpack.c.bf16 %v2728_v47, %v2726_v57  ;;  %v2732_v17 = vld [vmem:[#allocation8 + $0xf38] sm:$0xff]  ;;  %v1841_v52 = vld [vmem:[#allocation8 + $0x320] sm:$0xff]  ;;  %v1843_v37 = vld [vmem:[#allocation8 + $0x330] sm:$0xff] }
 0x6fc   :  { %v4195_v5 = vpack.c.bf16 %v2732_v17, %v2730_v16  ;;  %v2729_v42 = vld [vmem:[#allocation8 + $0xf20] sm:$0xff]  ;;  %v2731_v45 = vld [vmem:[#allocation8 + $0xf30] sm:$0xff]  ;;  %v2734_v40 = vld [vmem:[#allocation8 + $0xf48] sm:$0xff] }
 0x6fd   :  { %3794 = vmatpush1.bf16.msra.mxu1 %v3793_v12  ;;  %4178 = vmatpush1.bf16.msra.mxu0 %v4177_v25  ;;  %v1842_v12 = vld [vmem:[#allocation8 + $0x328] sm:$0xff]  ;;  %v1844_v25 = vld [vmem:[#allocation8 + $0x338] sm:$0xff]  ;;  %v1845_v51 = vld [vmem:[#allocation8 + $0x340] sm:$0xff] }
 0x6fe   :  { %3796 = vmatprep.subr.bf16.mxu1 %v3795_v10  ;;  %4180 = vmatprep.subr.bf16.mxu0 %v4179_v18  ;;  %v3809_v10 = vpack.c.bf16 %v1839_v58, %v1837_v62  ;;  %v4193_v18 = vpack.c.bf16 %v2727_v61, %v2725_v55  ;;  %v3811_v14 = vpack.c.bf16 %v1844_v25, %v1842_v12  ;;  %v2736_v0 = vld [vmem:[#allocation8 + $0xf58] sm:$0xff]  ;;  %v1847_v26 = vld [vmem:[#allocation8 + $0x350] sm:$0xff]  ;;  %v2733_v27 = vld [vmem:[#allocation8 + $0xf40] sm:$0xff] }
 0x6ff   :  { %v4199_v19 = vpack.c.bf16 %v2736_v0, %v2734_v40  ;;  %v2735_v34 = vld [vmem:[#allocation8 + $0xf50] sm:$0xff]  ;;  %v2738_v44 = vld [vmem:[#allocation8 + $0xf68] sm:$0xff]  ;;  %v2740_v54 = vld [vmem:[#allocation8 + $0xf78] sm:$0xff] }
 0x700   :  { %v1849_v31 = vld [vmem:[#allocation8 + $0x360] sm:$0xff]  ;;  %v1851_v29 = vld [vmem:[#allocation8 + $0x370] sm:$0xff]  ;;  %v4203_v32 = vpack.c.bf16 %v2740_v54, %v2738_v44  ;;  %v2742_v62 = vld [vmem:[#allocation8 + $0xf88] sm:$0xff] }
 0x701   :  { %3798 = vmatpush1.bf16.msra.mxu1 %v3797_v6  ;;  %4182 = vmatpush1.bf16.msra.mxu0 %v4181_v63  ;;  %v1846_v6 = vld [vmem:[#allocation8 + $0x348] sm:$0xff]  ;;  %v1848_v63 = vld [vmem:[#allocation8 + $0x358] sm:$0xff]  ;;  %v2737_v57 = vld [vmem:[#allocation8 + $0xf60] sm:$0xff] }
 0x702   :  { %3800 = vmatprep.subr.bf16.mxu1 %v3799_v28  ;;  %4184 = vmatprep.subr.bf16.mxu0 %v4183_v48  ;;  %v3813_v28 = vpack.c.bf16 %v1843_v37, %v1841_v52  ;;  %v4197_v48 = vpack.c.bf16 %v2731_v45, %v2729_v42  ;;  %v3815_v9 = vpack.c.bf16 %v1848_v63, %v1846_v6  ;;  %v2739_v47 = vld [vmem:[#allocation8 + $0xf70] sm:$0xff]  ;;  %v2744_v58 = vld [vmem:[#allocation8 + $0xf98] sm:$0xff]  ;;  %v1853_v55 = vld [vmem:[#allocation8 + $0x380] sm:$0xff] }
 0x703   :  { %v1855_v61 = vld [vmem:[#allocation8 + $0x390] sm:$0xff]  ;;  %v4207_v25 = vpack.c.bf16 %v2744_v58, %v2742_v62  ;;  %v2741_v16 = vld [vmem:[#allocation8 + $0xf80] sm:$0xff]  ;;  %v2746_v52 = vld [vmem:[#allocation8 + $0xfa8] sm:$0xff] }
 0x704   :  { %v2743_v17 = vld [vmem:[#allocation8 + $0xf90] sm:$0xff]  ;;  %v2748_v37 = vld [vmem:[#allocation8 + $0xfb8] sm:$0xff]  ;;  %v1857_v42 = vld [vmem:[#allocation8 + $0x3a0] sm:$0xff] }
 0x705   :  { %3802 = vmatpush1.bf16.msra.mxu1 %v3801_v36  ;;  %4186 = vmatpush1.bf16.msra.mxu0 %v4185_v41  ;;  %v1850_v36 = vld [vmem:[#allocation8 + $0x368] sm:$0xff]  ;;  %v1852_v41 = vld [vmem:[#allocation8 + $0x378] sm:$0xff]  ;;  %v1859_v45 = vld [vmem:[#allocation8 + $0x3b0] sm:$0xff]  ;;  %v4211_v63 = vpack.c.bf16 %v2748_v37, %v2746_v52 }
 0x706   :  { %3804 = vmatprep.subr.bf16.mxu1 %v3803_v38  ;;  %4188 = vmatprep.subr.bf16.mxu0 %v4187_v20  ;;  %v3817_v38 = vpack.c.bf16 %v1847_v26, %v1845_v51  ;;  %v4201_v20 = vpack.c.bf16 %v2735_v34, %v2733_v27  ;;  %v3819_v13 = vpack.c.bf16 %v1852_v41, %v1850_v36  ;;  %v2745_v40 = vld [vmem:[#allocation8 + $0xfa0] sm:$0xff]  ;;  %v2747_v0 = vld [vmem:[#allocation8 + $0xfb0] sm:$0xff]  ;;  %v2750_v51 = vld [vmem:[#allocation8 + $0xfc8] sm:$0xff] }
 0x707   :  { %v2752_v26 = vld [vmem:[#allocation8 + $0xfd8] sm:$0xff]  ;;  %v1861_v27 = vld [vmem:[#allocation8 + $0x3c0] sm:$0xff]  ;;  %v1863_v34 = vld [vmem:[#allocation8 + $0x3d0] sm:$0xff] }
 0x708   :  { %v4215_v41 = vpack.c.bf16 %v2752_v26, %v2750_v51  ;;  %v2749_v44 = vld [vmem:[#allocation8 + $0xfc0] sm:$0xff]  ;;  %v2751_v54 = vld [vmem:[#allocation8 + $0xfd0] sm:$0xff] }
 0x709   :  { %3806 = vmatpush1.bf16.msra.mxu1 %v3805_v39  ;;  %4190 = vmatpush1.bf16.msra.mxu0 %v4189_v24  ;;  %v1854_v39 = vld [vmem:[#allocation8 + $0x388] sm:$0xff]  ;;  %v1856_v24 = vld [vmem:[#allocation8 + $0x398] sm:$0xff]  ;;  %v2753_v62 = vld [vmem:[#allocation8 + $0xfe0] sm:$0xff] }
 0x70a   :  { %3808 = vmatprep.subr.bf16.mxu1 %v3807_v43  ;;  %4192 = vmatprep.subr.bf16.mxu0 %v4191_v21  ;;  %v3821_v43 = vpack.c.bf16 %v1851_v29, %v1849_v31  ;;  %v4205_v21 = vpack.c.bf16 %v2739_v47, %v2737_v57  ;;  %v3823_v12 = vpack.c.bf16 %v1856_v24, %v1854_v39  ;;  %v2754_v31 = vld [vmem:[#allocation8 + $0xfe8] sm:$0xff]  ;;  %v2756_v29 = vld [vmem:[#allocation8 + $0xff8] sm:$0xff]  ;;  %v1865_v57 = vld [vmem:[#allocation8 + $0x3e0] sm:$0xff] }
 0x70b   :  { %v1867_v47 = vld [vmem:[#allocation8 + $0x3f0] sm:$0xff]  ;;  %v4219_v24 = vpack.c.bf16 %v2756_v29, %v2754_v31  ;;  %v2839_v52 = vld [vmem:[#allocation8 + $0x1000] sm:$0xff]  ;;  %v1966_v29 = vld [vmem:[#allocation8 + $0x468] sm:$0xff] }
 0x70c   :  { %v2755_v58 = vld [vmem:[#allocation8 + $0xff0] sm:$0xff] }
 0x70d   :  { %3810 = vmatpush1.bf16.msra.mxu1 %v3809_v10  ;;  %4194 = vmatpush1.bf16.msra.mxu0 %v4193_v18  ;;  %v1858_v10 = vld [vmem:[#allocation8 + $0x3a8] sm:$0xff]  ;;  %v1860_v18 = vld [vmem:[#allocation8 + $0x3b8] sm:$0xff]  ;;  %v2841_v37 = vld [vmem:[#allocation8 + $0x1010] sm:$0xff] }
 0x70e   :  { %3812 = vmatprep.subr.bf16.mxu1 %v3811_v14  ;;  %4196 = vmatprep.subr.bf16.mxu0 %v4195_v5  ;;  %v3825_v14 = vpack.c.bf16 %v1855_v61, %v1853_v55  ;;  %v4209_v5 = vpack.c.bf16 %v2743_v17, %v2741_v16  ;;  %v3827_v6 = vpack.c.bf16 %v1860_v18, %v1858_v10  ;;  %v2840_v55 = vld [vmem:[#allocation8 + $0x1008] sm:$0xff]  ;;  %v2842_v61 = vld [vmem:[#allocation8 + $0x1018] sm:$0xff]  ;;  %v1953_v10 = vld [vmem:[#allocation8 + $0x400] sm:$0xff] }
 0x70f   :  { %v4223_v17 = vpack.c.bf16 %v2842_v61, %v2840_v55  ;;  %v1955_v18 = vld [vmem:[#allocation8 + $0x410] sm:$0xff]  ;;  %v2856_v55 = vld [vmem:[#allocation8 + $0x1088] sm:$0xff]  ;;  %v2858_v61 = vld [vmem:[#allocation8 + $0x1098] sm:$0xff] }
 0x710   :  { %v2845_v26 = vld [vmem:[#allocation8 + $0x1030] sm:$0xff] }
 0x711   :  { %3814 = vmatpush1.bf16.msra.mxu1 %v3813_v28  ;;  %4198 = vmatpush1.bf16.msra.mxu0 %v4197_v48  ;;  %v1862_v28 = vld [vmem:[#allocation8 + $0x3c8] sm:$0xff]  ;;  %v1864_v48 = vld [vmem:[#allocation8 + $0x3d8] sm:$0xff] }
 0x712   :  { %3816 = vmatprep.subr.bf16.mxu1 %v3815_v9  ;;  %4200 = vmatprep.subr.bf16.mxu0 %v4199_v19  ;;  %v3829_v9 = vpack.c.bf16 %v1859_v45, %v1857_v42  ;;  %v4213_v19 = vpack.c.bf16 %v2747_v0, %v2745_v40  ;;  %v3831_v36 = vpack.c.bf16 %v1864_v48, %v1862_v28  ;;  %v2844_v42 = vld [vmem:[#allocation8 + $0x1028] sm:$0xff]  ;;  %v2846_v45 = vld [vmem:[#allocation8 + $0x1038] sm:$0xff]  ;;  %v1957_v40 = vld [vmem:[#allocation8 + $0x420] sm:$0xff] }
 0x713   :  { %v1959_v0 = vld [vmem:[#allocation8 + $0x430] sm:$0xff]  ;;  %v2843_v28 = vld [vmem:[#allocation8 + $0x1020] sm:$0xff]  ;;  %v4227_v51 = vpack.c.bf16 %v2846_v45, %v2844_v42  ;;  %v2860_v42 = vld [vmem:[#allocation8 + $0x10a8] sm:$0xff] }
 0x714   :  { %v2862_v45 = vld [vmem:[#allocation8 + $0x10b8] sm:$0xff] }
 0x715   :  { %3818 = vmatpush1.bf16.msra.mxu1 %v3817_v38  ;;  %4202 = vmatpush1.bf16.msra.mxu0 %v4201_v20  ;;  %v1866_v38 = vld [vmem:[#allocation8 + $0x3e8] sm:$0xff]  ;;  %v1868_v20 = vld [vmem:[#allocation8 + $0x3f8] sm:$0xff] }
 0x716   :  { %3820 = vmatprep.subr.bf16.mxu1 %v3819_v13  ;;  %4204 = vmatprep.subr.bf16.mxu0 %v4203_v32  ;;  %v3833_v13 = vpack.c.bf16 %v1863_v34, %v1861_v27  ;;  %v4217_v32 = vpack.c.bf16 %v2751_v54, %v2749_v44  ;;  %v3835_v39 = vpack.c.bf16 %v1868_v20, %v1866_v38  ;;  %v2848_v27 = vld [vmem:[#allocation8 + $0x1048] sm:$0xff]  ;;  %v2850_v34 = vld [vmem:[#allocation8 + $0x1058] sm:$0xff]  ;;  %v1961_v54 = vld [vmem:[#allocation8 + $0x440] sm:$0xff] }
 0x717   :  { %v1963_v38 = vld [vmem:[#allocation8 + $0x450] sm:$0xff]  ;;  %v2847_v20 = vld [vmem:[#allocation8 + $0x1040] sm:$0xff]  ;;  %v4231_v31 = vpack.c.bf16 %v2850_v34, %v2848_v27  ;;  %v2864_v27 = vld [vmem:[#allocation8 + $0x10c8] sm:$0xff] }
 0x718   :  { %v2866_v34 = vld [vmem:[#allocation8 + $0x10d8] sm:$0xff] }
 0x719   :  { %3822 = vmatpush1.bf16.msra.mxu1 %v3821_v43  ;;  %4206 = vmatpush1.bf16.msra.mxu0 %v4205_v21  ;;  %v1954_v43 = vld [vmem:[#allocation8 + $0x408] sm:$0xff]  ;;  %v1956_v21 = vld [vmem:[#allocation8 + $0x418] sm:$0xff] }
 0x71a   :  { %3824 = vmatprep.subr.bf16.mxu1 %v3823_v12  ;;  %4208 = vmatprep.subr.bf16.mxu0 %v4207_v25  ;;  %v3837_v12 = vpack.c.bf16 %v1867_v47, %v1865_v57  ;;  %v4221_v25 = vpack.c.bf16 %v2755_v58, %v2753_v62  ;;  %v3839_v16 = vpack.c.bf16 %v1956_v21, %v1954_v43  ;;  %v2853_v58 = vld [vmem:[#allocation8 + $0x1070] sm:$0xff]  ;;  %v1970_v43 = vld [vmem:[#allocation8 + $0x488] sm:$0xff]  ;;  %v1972_v21 = vld [vmem:[#allocation8 + $0x498] sm:$0xff] }
 0x71b   :  { %v3849_v57 = vpack.c.bf16 %v1963_v38, %v1961_v54  ;;  %v1977_v54 = vld [vmem:[#allocation8 + $0x4c0] sm:$0xff]  ;;  %v1979_v38 = vld [vmem:[#allocation8 + $0x4d0] sm:$0xff] }
 0x71d   :  { %3826 = vmatpush1.bf16.msra.mxu1 %v3825_v14  ;;  %4210 = vmatpush1.bf16.msra.mxu0 %v4209_v5  ;;  %v1958_v14 = vld [vmem:[#allocation8 + $0x428] sm:$0xff]  ;;  %v1960_v5 = vld [vmem:[#allocation8 + $0x438] sm:$0xff] }
 0x71e   :  { %3828 = vmatprep.subr.bf16.mxu1 %v3827_v6  ;;  %4212 = vmatprep.subr.bf16.mxu0 %v4211_v63  ;;  %v3841_v6 = vpack.c.bf16 %v1955_v18, %v1953_v10  ;;  %v4225_v63 = vpack.c.bf16 %v2841_v37, %v2839_v52  ;;  %v3843_v48 = vpack.c.bf16 %v1960_v5, %v1958_v14  ;;  %v1971_v10 = vld [vmem:[#allocation8 + $0x490] sm:$0xff]  ;;  %v2855_v18 = vld [vmem:[#allocation8 + $0x1080] sm:$0xff]  ;;  %v1974_v14 = vld [vmem:[#allocation8 + $0x4a8] sm:$0xff] }
 0x71f   :  { %v4239_v52 = vpack.c.bf16 %v2858_v61, %v2856_v55  ;;  %v2857_v37 = vld [vmem:[#allocation8 + $0x1090] sm:$0xff]  ;;  %v1976_v5 = vld [vmem:[#allocation8 + $0x4b8] sm:$0xff]  ;;  %v2872_v55 = vld [vmem:[#allocation8 + $0x1108] sm:$0xff] }
 0x720   :  { %v2874_v61 = vld [vmem:[#allocation8 + $0x1118] sm:$0xff] }
 0x721   :  { %3830 = vmatpush1.bf16.msra.mxu1 %v3829_v9  ;;  %4214 = vmatpush1.bf16.msra.mxu0 %v4213_v19  ;;  %v1962_v9 = vld [vmem:[#allocation8 + $0x448] sm:$0xff]  ;;  %v1964_v19 = vld [vmem:[#allocation8 + $0x458] sm:$0xff] }
 0x722   :  { %3832 = vmatprep.subr.bf16.mxu1 %v3831_v36  ;;  %4216 = vmatprep.subr.bf16.mxu0 %v4215_v41  ;;  %v3845_v36 = vpack.c.bf16 %v1959_v0, %v1957_v40  ;;  %v4229_v41 = vpack.c.bf16 %v2845_v26, %v2843_v28  ;;  %v3847_v44 = vpack.c.bf16 %v1964_v19, %v1962_v9  ;;  %v1973_v0 = vld [vmem:[#allocation8 + $0x4a0] sm:$0xff]  ;;  %v1975_v28 = vld [vmem:[#allocation8 + $0x4b0] sm:$0xff]  ;;  %v1978_v9 = vld [vmem:[#allocation8 + $0x4c8] sm:$0xff] }
 0x723   :  { %v3859_v40 = vpack.c.bf16 %v1976_v5, %v1974_v14  ;;  %v2861_v26 = vld [vmem:[#allocation8 + $0x10b0] sm:$0xff]  ;;  %v1980_v19 = vld [vmem:[#allocation8 + $0x4d8] sm:$0xff]  ;;  %v1990_v14 = vld [vmem:[#allocation8 + $0x528] sm:$0xff] }
 0x724   :  { %v1992_v5 = vld [vmem:[#allocation8 + $0x538] sm:$0xff] }
 0x725   :  { %3834 = vmatpush1.bf16.msra.mxu1 %v3833_v13  ;;  %4218 = vmatpush1.bf16.msra.mxu0 %v4217_v32  ;;  %v2852_v13 = vld [vmem:[#allocation8 + $0x1068] sm:$0xff]  ;;  %v2854_v32 = vld [vmem:[#allocation8 + $0x1078] sm:$0xff] }
 0x726   :  { %3836 = vmatprep.subr.bf16.mxu1 %v3835_v39  ;;  %4220 = vmatprep.subr.bf16.mxu0 %v4219_v24  ;;  %v1967_v39 = vld [vmem:[#allocation8 + $0x470] sm:$0xff]  ;;  %v2851_v24 = vld [vmem:[#allocation8 + $0x1060] sm:$0xff]  ;;  %v4235_v62 = vpack.c.bf16 %v2854_v32, %v2852_v13  ;;  %v2868_v13 = vld [vmem:[#allocation8 + $0x10e8] sm:$0xff] }
 0x727   :  { %v2870_v32 = vld [vmem:[#allocation8 + $0x10f8] sm:$0xff] }
 0x729   :  { %3838 = vmatpush1.bf16.msra.mxu1 %v3837_v12  ;;  %4222 = vmatpush1.bf16.msra.mxu0 %v4221_v25  ;;  %v4237_v25 = vpack.c.bf16 %v2853_v58, %v2851_v24  ;;  %v2867_v24 = vld [vmem:[#allocation8 + $0x10e0] sm:$0xff]  ;;  %v2869_v58 = vld [vmem:[#allocation8 + $0x10f0] sm:$0xff] }
 0x72a   :  { %3840 = vmatprep.subr.bf16.mxu1 %v3839_v16  ;;  %4224 = vmatprep.subr.bf16.mxu0 %v4223_v17  ;;  %v3855_v16 = vpack.c.bf16 %v1972_v21, %v1970_v43  ;;  %v1969_v17 = vld [vmem:[#allocation8 + $0x480] sm:$0xff]  ;;  %v1986_v43 = vld [vmem:[#allocation8 + $0x508] sm:$0xff]  ;;  %v1988_v21 = vld [vmem:[#allocation8 + $0x518] sm:$0xff] }
 0x72c   :  { %1934 = vmatmul.mubr.f32.vlgmr.msra.gmra.mrb[20].mxu1 %v5726_v60  ;;  %2822 = vmatmul.mubr.f32.vlgmr.msra.gmra.mrb[36].mxu0 %v5741_v23  ;;  %v2849_v60 = vld [vmem:[#allocation8 + $0x1050] sm:$0xff]  ;;  %v1968_v23 = vld [vmem:[#allocation8 + $0x478] sm:$0xff] }
 0x72d   :  { %3842 = vmatpush1.bf16.msra.mxu1 %v3841_v6  ;;  %2081 = vmatprep.mubr.f32.mxu1 %v5763_v30  ;;  %v4233_v30 = vpack.c.bf16 %v2849_v60, %v2847_v20  ;;  %v3851_v47 = vpack.c.bf16 %v1968_v23, %v1966_v29  ;;  %v3857_v6 = vpack.c.bf16 %v1971_v10, %v1969_v17  ;;  %v2863_v20 = vld [vmem:[#allocation8 + $0x10c0] sm:$0xff]  ;;  %v2865_v60 = vld [vmem:[#allocation8 + $0x10d0] sm:$0xff]  ;;  %v1982_v29 = vld [vmem:[#allocation8 + $0x4e8] sm:$0xff] }
 0x72e   :  { %4226 = vmatpush1.bf16.msra.mxu0 %v4225_v63  ;;  %2967 = vmatprep.mubr.f32.mxu0 %v5773_v8  ;;  %v1965_v8 = vld [vmem:[#allocation8 + $0x460] sm:$0xff]  ;;  %v4241_v63 = vpack.c.bf16 %v2857_v37, %v2855_v18  ;;  %v1984_v23 = vld [vmem:[#allocation8 + $0x4f8] sm:$0xff]  ;;  %v1987_v10 = vld [vmem:[#allocation8 + $0x510] sm:$0xff] }
 0x72f   :  { %3844 = vmatprep.subr.bf16.mxu1 %v3843_v48  ;;  %4228 = vmatprep.subr.bf16.mxu0 %v4227_v51  ;;  %v3853_v12 = vpack.c.bf16 %v1967_v39, %v1965_v8  ;;  %v2859_v48 = vld [vmem:[#allocation8 + $0x10a0] sm:$0xff]  ;;  %v4243_v51 = vpack.c.bf16 %v2862_v45, %v2860_v42  ;;  %v1983_v39 = vld [vmem:[#allocation8 + $0x4f0] sm:$0xff]  ;;  %v2876_v42 = vld [vmem:[#allocation8 + $0x1128] sm:$0xff] }
 0x730   :  { %v1981_v8 = vld [vmem:[#allocation8 + $0x4e0] sm:$0xff]  ;;  %v2873_v37 = vld [vmem:[#allocation8 + $0x1110] sm:$0xff]  ;;  %v2878_v45 = vld [vmem:[#allocation8 + $0x1138] sm:$0xff] }
 0x731   :  { %3846 = vmatpush1.bf16.msra.mxu1 %v3845_v36  ;;  %v3861_v36 = vpack.c.bf16 %v1975_v28, %v1973_v0  ;;  %v1985_v17 = vld [vmem:[#allocation8 + $0x500] sm:$0xff]  ;;  %v1991_v28 = vld [vmem:[#allocation8 + $0x530] sm:$0xff] }
 0x732   :  { %4230 = vmatpush1.bf16.msra.mxu0 %v4229_v41  ;;  %3848 = vmatprep.subr.bf16.mxu1 %v3847_v44  ;;  %v4245_v41 = vpack.c.bf16 %v2861_v26, %v2859_v48  ;;  %v3863_v44 = vpack.c.bf16 %v1980_v19, %v1978_v9  ;;  %v2871_v18 = vld [vmem:[#allocation8 + $0x1100] sm:$0xff]  ;;  %v2877_v26 = vld [vmem:[#allocation8 + $0x1130] sm:$0xff]  ;;  %v1994_v9 = vld [vmem:[#allocation8 + $0x548] sm:$0xff] }
 0x733   :  { %4232 = vmatprep.subr.bf16.mxu0 %v4231_v31  ;;  %v4247_v31 = vpack.c.bf16 %v2866_v34, %v2864_v27  ;;  %v1989_v0 = vld [vmem:[#allocation8 + $0x520] sm:$0xff]  ;;  %v1996_v19 = vld [vmem:[#allocation8 + $0x558] sm:$0xff]  ;;  %v2880_v27 = vld [vmem:[#allocation8 + $0x1148] sm:$0xff] }
 0x734   :  { %v2875_v48 = vld [vmem:[#allocation8 + $0x1120] sm:$0xff]  ;;  %v2882_v34 = vld [vmem:[#allocation8 + $0x1158] sm:$0xff] }
 0x735   :  { %3850 = vmatpush1.bf16.msra.mxu1 %v3849_v57  ;;  %v3865_v57 = vpack.c.bf16 %v1979_v38, %v1977_v54  ;;  %v1993_v54 = vld [vmem:[#allocation8 + $0x540] sm:$0xff]  ;;  %v1995_v38 = vld [vmem:[#allocation8 + $0x550] sm:$0xff] }
 0x736   :  { %4234 = vmatpush1.bf16.msra.mxu0 %v4233_v30  ;;  %3852 = vmatprep.subr.bf16.mxu1 %v3851_v47  ;;  %v4249_v30 = vpack.c.bf16 %v2865_v60, %v2863_v20  ;;  %v3867_v47 = vpack.c.bf16 %v1984_v23, %v1982_v29  ;;  %v2879_v20 = vld [vmem:[#allocation8 + $0x1140] sm:$0xff]  ;;  %v2881_v60 = vld [vmem:[#allocation8 + $0x1150] sm:$0xff]  ;;  %v1998_v29 = vld [vmem:[#allocation8 + $0x568] sm:$0xff] }
 0x737   :  { %4236 = vmatprep.subr.bf16.mxu0 %v4235_v62  ;;  %v4251_v62 = vpack.c.bf16 %v2870_v32, %v2868_v13  ;;  %v2000_v23 = vld [vmem:[#allocation8 + $0x578] sm:$0xff]  ;;  %v2884_v13 = vld [vmem:[#allocation8 + $0x1168] sm:$0xff] }
 0x738   :  { %v2886_v32 = vld [vmem:[#allocation8 + $0x1178] sm:$0xff] }
 0x739   :  { %3854 = vmatpush1.bf16.msra.mxu1 %v3853_v12  ;;  %v3869_v12 = vpack.c.bf16 %v1983_v39, %v1981_v8  ;;  %v1997_v8 = vld [vmem:[#allocation8 + $0x560] sm:$0xff]  ;;  %v1999_v39 = vld [vmem:[#allocation8 + $0x570] sm:$0xff] }
 0x73a   :  { %4238 = vmatpush1.bf16.msra.mxu0 %v4237_v25  ;;  %3856 = vmatprep.subr.bf16.mxu1 %v3855_v16  ;;  %v4253_v25 = vpack.c.bf16 %v2869_v58, %v2867_v24  ;;  %v3871_v16 = vpack.c.bf16 %v1988_v21, %v1986_v43  ;;  %v2883_v24 = vld [vmem:[#allocation8 + $0x1160] sm:$0xff]  ;;  %v2885_v58 = vld [vmem:[#allocation8 + $0x1170] sm:$0xff]  ;;  %v2002_v43 = vld [vmem:[#allocation8 + $0x588] sm:$0xff] }
 0x73b   :  { %4240 = vmatprep.subr.bf16.mxu0 %v4239_v52  ;;  %v4255_v52 = vpack.c.bf16 %v2874_v61, %v2872_v55  ;;  %v2004_v21 = vld [vmem:[#allocation8 + $0x598] sm:$0xff]  ;;  %v2888_v55 = vld [vmem:[#allocation8 + $0x1188] sm:$0xff] }
 0x73c   :  { %v2890_v61 = vld [vmem:[#allocation8 + $0x1198] sm:$0xff] }
 0x73d   :  { %3858 = vmatpush1.bf16.msra.mxu1 %v3857_v6  ;;  %v3873_v6 = vpack.c.bf16 %v1987_v10, %v1985_v17  ;;  %v2001_v17 = vld [vmem:[#allocation8 + $0x580] sm:$0xff]  ;;  %v2003_v10 = vld [vmem:[#allocation8 + $0x590] sm:$0xff] }
 0x73e   :  { %4242 = vmatpush1.bf16.msra.mxu0 %v4241_v63  ;;  %3860 = vmatprep.subr.bf16.mxu1 %v3859_v40  ;;  %v4257_v63 = vpack.c.bf16 %v2873_v37, %v2871_v18  ;;  %v3875_v40 = vpack.c.bf16 %v1992_v5, %v1990_v14  ;;  %v2887_v18 = vld [vmem:[#allocation8 + $0x1180] sm:$0xff]  ;;  %v2889_v37 = vld [vmem:[#allocation8 + $0x1190] sm:$0xff]  ;;  %v2006_v14 = vld [vmem:[#allocation8 + $0x5a8] sm:$0xff] }
 0x73f   :  { %4244 = vmatprep.subr.bf16.mxu0 %v4243_v51  ;;  %v4259_v51 = vpack.c.bf16 %v2878_v45, %v2876_v42  ;;  %v2008_v5 = vld [vmem:[#allocation8 + $0x5b8] sm:$0xff]  ;;  %v2892_v42 = vld [vmem:[#allocation8 + $0x11a8] sm:$0xff] }
 0x740   :  { %v2894_v45 = vld [vmem:[#allocation8 + $0x11b8] sm:$0xff] }
 0x741   :  { %3862 = vmatpush1.bf16.msra.mxu1 %v3861_v36  ;;  %v3877_v36 = vpack.c.bf16 %v1991_v28, %v1989_v0  ;;  %v2005_v0 = vld [vmem:[#allocation8 + $0x5a0] sm:$0xff]  ;;  %v2007_v28 = vld [vmem:[#allocation8 + $0x5b0] sm:$0xff] }
 0x742   :  { %4246 = vmatpush1.bf16.msra.mxu0 %v4245_v41  ;;  %3864 = vmatprep.subr.bf16.mxu1 %v3863_v44  ;;  %v4261_v41 = vpack.c.bf16 %v2877_v26, %v2875_v48  ;;  %v3879_v44 = vpack.c.bf16 %v1996_v19, %v1994_v9  ;;  %v2891_v48 = vld [vmem:[#allocation8 + $0x11a0] sm:$0xff]  ;;  %v2893_v26 = vld [vmem:[#allocation8 + $0x11b0] sm:$0xff]  ;;  %v2010_v9 = vld [vmem:[#allocation8 + $0x5c8] sm:$0xff] }
 0x743   :  { %4248 = vmatprep.subr.bf16.mxu0 %v4247_v31  ;;  %v4263_v31 = vpack.c.bf16 %v2882_v34, %v2880_v27  ;;  %v2012_v19 = vld [vmem:[#allocation8 + $0x5d8] sm:$0xff]  ;;  %v2896_v27 = vld [vmem:[#allocation8 + $0x11c8] sm:$0xff] }
 0x744   :  { %v2898_v34 = vld [vmem:[#allocation8 + $0x11d8] sm:$0xff] }
 0x745   :  { %3866 = vmatpush1.bf16.msra.mxu1 %v3865_v57  ;;  %v3881_v57 = vpack.c.bf16 %v1995_v38, %v1993_v54  ;;  %v2009_v54 = vld [vmem:[#allocation8 + $0x5c0] sm:$0xff]  ;;  %v2011_v38 = vld [vmem:[#allocation8 + $0x5d0] sm:$0xff] }
 0x746   :  { %4250 = vmatpush1.bf16.msra.mxu0 %v4249_v30  ;;  %3868 = vmatprep.subr.bf16.mxu1 %v3867_v47  ;;  %v4265_v30 = vpack.c.bf16 %v2881_v60, %v2879_v20  ;;  %v3883_v47 = vpack.c.bf16 %v2000_v23, %v1998_v29  ;;  %v2895_v20 = vld [vmem:[#allocation8 + $0x11c0] sm:$0xff]  ;;  %v2897_v60 = vld [vmem:[#allocation8 + $0x11d0] sm:$0xff]  ;;  %v2014_v29 = vld [vmem:[#allocation8 + $0x5e8] sm:$0xff] }
 0x747   :  { %4252 = vmatprep.subr.bf16.mxu0 %v4251_v62  ;;  %v4267_v62 = vpack.c.bf16 %v2886_v32, %v2884_v13  ;;  %v2016_v23 = vld [vmem:[#allocation8 + $0x5f8] sm:$0xff]  ;;  %v2900_v13 = vld [vmem:[#allocation8 + $0x11e8] sm:$0xff] }
 0x748   :  { %v2902_v32 = vld [vmem:[#allocation8 + $0x11f8] sm:$0xff] }
 0x749   :  { %3870 = vmatpush1.bf16.msra.mxu1 %v3869_v12  ;;  %v3885_v12 = vpack.c.bf16 %v1999_v39, %v1997_v8  ;;  %v2013_v8 = vld [vmem:[#allocation8 + $0x5e0] sm:$0xff]  ;;  %v2015_v39 = vld [vmem:[#allocation8 + $0x5f0] sm:$0xff] }
 0x74a   :  { %4254 = vmatpush1.bf16.msra.mxu0 %v4253_v25  ;;  %3872 = vmatprep.subr.bf16.mxu1 %v3871_v16  ;;  %v4269_v25 = vpack.c.bf16 %v2885_v58, %v2883_v24  ;;  %v3887_v16 = vpack.c.bf16 %v2004_v21, %v2002_v43  ;;  %v2899_v24 = vld [vmem:[#allocation8 + $0x11e0] sm:$0xff]  ;;  %v2901_v58 = vld [vmem:[#allocation8 + $0x11f0] sm:$0xff]  ;;  %v2102_v43 = vld [vmem:[#allocation8 + $0x608] sm:$0xff] }
 0x74b   :  { %4256 = vmatprep.subr.bf16.mxu0 %v4255_v52  ;;  %v4271_v52 = vpack.c.bf16 %v2890_v61, %v2888_v55  ;;  %v2104_v21 = vld [vmem:[#allocation8 + $0x618] sm:$0xff]  ;;  %v2986_v55 = vld [vmem:[#allocation8 + $0x1208] sm:$0xff] }
 0x74c   :  { %v2988_v61 = vld [vmem:[#allocation8 + $0x1218] sm:$0xff] }
 0x74d   :  { %3874 = vmatpush1.bf16.msra.mxu1 %v3873_v6  ;;  %v3889_v6 = vpack.c.bf16 %v2003_v10, %v2001_v17  ;;  %v2101_v17 = vld [vmem:[#allocation8 + $0x600] sm:$0xff]  ;;  %v2103_v10 = vld [vmem:[#allocation8 + $0x610] sm:$0xff] }
 0x74e   :  { %4258 = vmatpush1.bf16.msra.mxu0 %v4257_v63  ;;  %3876 = vmatprep.subr.bf16.mxu1 %v3875_v40  ;;  %v4273_v63 = vpack.c.bf16 %v2889_v37, %v2887_v18  ;;  %v3891_v40 = vpack.c.bf16 %v2008_v5, %v2006_v14  ;;  %v4287_v18 = vpack.c.bf16 %v2988_v61, %v2986_v55  ;;  %v2987_v37 = vld [vmem:[#allocation8 + $0x1210] sm:$0xff]  ;;  %v2106_v14 = vld [vmem:[#allocation8 + $0x628] sm:$0xff]  ;;  %v2108_v5 = vld [vmem:[#allocation8 + $0x638] sm:$0xff] }
 0x74f   :  { %4260 = vmatprep.subr.bf16.mxu0 %v4259_v51  ;;  %v4275_v51 = vpack.c.bf16 %v2894_v45, %v2892_v42  ;;  %v3905_v42 = vpack.c.bf16 %v2103_v10, %v2101_v17  ;;  %v2990_v45 = vld [vmem:[#allocation8 + $0x1228] sm:$0xff]  ;;  %v2117_v61 = vld [vmem:[#allocation8 + $0x680] sm:$0xff]  ;;  %v3003_v17 = vld [vmem:[#allocation8 + $0x1290] sm:$0xff] }
 0x750   :  { %v2122_v10 = vld [vmem:[#allocation8 + $0x6a8] sm:$0xff] }
 0x751   :  { %3878 = vmatpush1.bf16.msra.mxu1 %v3877_v36  ;;  %v3893_v36 = vpack.c.bf16 %v2007_v28, %v2005_v0  ;;  %v2107_v0 = vld [vmem:[#allocation8 + $0x630] sm:$0xff]  ;;  %v2989_v28 = vld [vmem:[#allocation8 + $0x1220] sm:$0xff] }
 0x752   :  { %4262 = vmatpush1.bf16.msra.mxu0 %v4261_v41  ;;  %3880 = vmatprep.subr.bf16.mxu1 %v3879_v44  ;;  %v4277_v41 = vpack.c.bf16 %v2893_v26, %v2891_v48  ;;  %v3895_v44 = vpack.c.bf16 %v2012_v19, %v2010_v9  ;;  %v3907_v48 = vpack.c.bf16 %v2108_v5, %v2106_v14  ;;  %v2110_v26 = vld [vmem:[#allocation8 + $0x648] sm:$0xff]  ;;  %v2112_v9 = vld [vmem:[#allocation8 + $0x658] sm:$0xff] }
 0x753   :  { %4264 = vmatprep.subr.bf16.mxu0 %v4263_v31  ;;  %v4279_v31 = vpack.c.bf16 %v2898_v34, %v2896_v27  ;;  %v2994_v27 = vld [vmem:[#allocation8 + $0x1248] sm:$0xff]  ;;  %v2996_v34 = vld [vmem:[#allocation8 + $0x1258] sm:$0xff] }
 0x755   :  { %3882 = vmatpush1.bf16.msra.mxu1 %v3881_v57  ;;  %v3897_v57 = vpack.c.bf16 %v2011_v38, %v2009_v54  ;;  %v2109_v54 = vld [vmem:[#allocation8 + $0x640] sm:$0xff]  ;;  %v2111_v38 = vld [vmem:[#allocation8 + $0x650] sm:$0xff] }
 0x756   :  { %4266 = vmatpush1.bf16.msra.mxu0 %v4265_v30  ;;  %3884 = vmatprep.subr.bf16.mxu1 %v3883_v47  ;;  %v4281_v30 = vpack.c.bf16 %v2897_v60, %v2895_v20  ;;  %v3899_v47 = vpack.c.bf16 %v2016_v23, %v2014_v29  ;;  %v2993_v20 = vld [vmem:[#allocation8 + $0x1240] sm:$0xff]  ;;  %v2114_v60 = vld [vmem:[#allocation8 + $0x668] sm:$0xff]  ;;  %v2116_v29 = vld [vmem:[#allocation8 + $0x678] sm:$0xff] }
 0x757   :  { %4268 = vmatprep.subr.bf16.mxu0 %v4267_v62  ;;  %v4283_v62 = vpack.c.bf16 %v2902_v32, %v2900_v13  ;;  %v2998_v23 = vld [vmem:[#allocation8 + $0x1268] sm:$0xff]  ;;  %v3913_v13 = vpack.c.bf16 %v2111_v38, %v2109_v54  ;;  %v3915_v32 = vpack.c.bf16 %v2116_v29, %v2114_v60  ;;  %v3011_v54 = vld [vmem:[#allocation8 + $0x12d0] sm:$0xff] }
 0x758   :  { %v2130_v38 = vld [vmem:[#allocation8 + $0x6e8] sm:$0xff] }
 0x759   :  { %3886 = vmatpush1.bf16.msra.mxu1 %v3885_v12  ;;  %v3901_v12 = vpack.c.bf16 %v2015_v39, %v2013_v8  ;;  %v2118_v39 = vld [vmem:[#allocation8 + $0x688] sm:$0xff] }
 0x75a   :  { %4270 = vmatpush1.bf16.msra.mxu0 %v4269_v25  ;;  %3888 = vmatprep.subr.bf16.mxu1 %v3887_v16  ;;  %v4285_v25 = vpack.c.bf16 %v2901_v58, %v2899_v24  ;;  %v3903_v16 = vpack.c.bf16 %v2104_v21, %v2102_v43  ;;  %v2120_v24 = vld [vmem:[#allocation8 + $0x698] sm:$0xff] }
 0x75b   :  { %4272 = vmatprep.subr.bf16.mxu0 %v4271_v52  ;;  %v2985_v52 = vld [vmem:[#allocation8 + $0x1200] sm:$0xff]  ;;  %v3004_v58 = vld [vmem:[#allocation8 + $0x1298] sm:$0xff]  ;;  %v3919_v55 = vpack.c.bf16 %v2120_v24, %v2118_v39 }
 0x75d   :  { %3890 = vmatpush1.bf16.msra.mxu1 %v3889_v6  ;;  %v2992_v6 = vld [vmem:[#allocation8 + $0x1238] sm:$0xff] }
 0x75e   :  { %4274 = vmatpush1.bf16.msra.mxu0 %v4273_v63  ;;  %3892 = vmatprep.subr.bf16.mxu1 %v3891_v40  ;;  %v4289_v63 = vpack.c.bf16 %v2987_v37, %v2985_v52  ;;  %v2105_v40 = vld [vmem:[#allocation8 + $0x620] sm:$0xff]  ;;  %v4291_v19 = vpack.c.bf16 %v2992_v6, %v2990_v45  ;;  %v3006_v52 = vld [vmem:[#allocation8 + $0x12a8] sm:$0xff]  ;;  %v3008_v37 = vld [vmem:[#allocation8 + $0x12b8] sm:$0xff] }
 0x75f   :  { %4276 = vmatprep.subr.bf16.mxu0 %v4275_v51  ;;  %v2991_v51 = vld [vmem:[#allocation8 + $0x1230] sm:$0xff]  ;;  %v2121_v45 = vld [vmem:[#allocation8 + $0x6a0] sm:$0xff] }
 0x760   :  { %v2123_v6 = vld [vmem:[#allocation8 + $0x6b0] sm:$0xff] }
 0x761   :  { %3894 = vmatpush1.bf16.msra.mxu1 %v3893_v36  ;;  %v3909_v36 = vpack.c.bf16 %v2107_v0, %v2105_v40  ;;  %v4307_v40 = vpack.c.bf16 %v3008_v37, %v3006_v52  ;;  %v3007_v0 = vld [vmem:[#allocation8 + $0x12b0] sm:$0xff]  ;;  %v2137_v37 = vld [vmem:[#allocation8 + $0x720] sm:$0xff] }
 0x762   :  { %4278 = vmatpush1.bf16.msra.mxu0 %v4277_v41  ;;  %3896 = vmatprep.subr.bf16.mxu1 %v3895_v44  ;;  %v4293_v41 = vpack.c.bf16 %v2991_v51, %v2989_v28  ;;  %v3911_v44 = vpack.c.bf16 %v2112_v9, %v2110_v26  ;;  %v2126_v28 = vld [vmem:[#allocation8 + $0x6c8] sm:$0xff]  ;;  %v3012_v26 = vld [vmem:[#allocation8 + $0x12d8] sm:$0xff]  ;;  %v3925_v9 = vpack.c.bf16 %v2123_v6, %v2121_v45  ;;  %v3023_v45 = vld [vmem:[#allocation8 + $0x1330] sm:$0xff] }
 0x763   :  { %4280 = vmatprep.subr.bf16.mxu0 %v4279_v31  ;;  %v4295_v31 = vpack.c.bf16 %v2996_v34, %v2994_v27  ;;  %v3010_v51 = vld [vmem:[#allocation8 + $0x12c8] sm:$0xff]  ;;  %v2125_v34 = vld [vmem:[#allocation8 + $0x6c0] sm:$0xff] }
 0x764   :  { %v2142_v6 = vld [vmem:[#allocation8 + $0x748] sm:$0xff] }
 0x765   :  { %3898 = vmatpush1.bf16.msra.mxu1 %v3897_v57  ;;  %v2113_v57 = vld [vmem:[#allocation8 + $0x660] sm:$0xff] }
 0x766   :  { %4282 = vmatpush1.bf16.msra.mxu0 %v4281_v30  ;;  %3900 = vmatprep.subr.bf16.mxu1 %v3899_v47  ;;  %v2115_v30 = vld [vmem:[#allocation8 + $0x670] sm:$0xff]  ;;  %v2997_v47 = vld [vmem:[#allocation8 + $0x1260] sm:$0xff] }
 0x767   :  { %4284 = vmatprep.subr.bf16.mxu0 %v4283_v62  ;;  %v3002_v62 = vld [vmem:[#allocation8 + $0x1288] sm:$0xff]  ;;  %v3917_v43 = vpack.c.bf16 %v2115_v30, %v2113_v57  ;;  %v3015_v57 = vld [vmem:[#allocation8 + $0x12f0] sm:$0xff] }
 0x768   :  { %v2134_v30 = vld [vmem:[#allocation8 + $0x708] sm:$0xff] }
 0x769   :  { %3902 = vmatpush1.bf16.msra.mxu1 %v3901_v12  ;;  %v2119_v12 = vld [vmem:[#allocation8 + $0x690] sm:$0xff] }
 0x76a   :  { %4286 = vmatpush1.bf16.msra.mxu0 %v4285_v25  ;;  %3904 = vmatprep.subr.bf16.mxu1 %v3903_v16  ;;  %v3001_v25 = vld [vmem:[#allocation8 + $0x1280] sm:$0xff]  ;;  %v4303_v16 = vpack.c.bf16 %v3004_v58, %v3002_v62  ;;  %v3921_v14 = vpack.c.bf16 %v2119_v12, %v2117_v61  ;;  %v3019_v61 = vld [vmem:[#allocation8 + $0x1310] sm:$0xff]  ;;  %v2138_v12 = vld [vmem:[#allocation8 + $0x728] sm:$0xff] }
 0x76b   :  { %4288 = vmatprep.subr.bf16.mxu0 %v4287_v18  ;;  %v2124_v18 = vld [vmem:[#allocation8 + $0x6b8] sm:$0xff]  ;;  %v4305_v5 = vpack.c.bf16 %v3003_v17, %v3001_v25  ;;  %v2133_v58 = vld [vmem:[#allocation8 + $0x700] sm:$0xff] }
 0x76c   :  { %2082 = vmatmul.mubr.f32.vlgmr.msra.gmra.mrb[20].mxu1 %v5776_v3  ;;  %v2995_v3 = vld [vmem:[#allocation8 + $0x1250] sm:$0xff]  ;;  %v2140_v25 = vld [vmem:[#allocation8 + $0x738] sm:$0xff] }
 0x76d   :  { %2968 = vmatmul.mubr.f32.vlgmr.msra.gmra.mrb[36].mxu0 %v5780_v7  ;;  %3906 = vmatpush1.bf16.msra.mxu1 %v3905_v42  ;;  %v3000_v7 = vld [vmem:[#allocation8 + $0x1278] sm:$0xff]  ;;  %v3923_v42 = vpack.c.bf16 %v2124_v18, %v2122_v10  ;;  %v3939_v52 = vpack.c.bf16 %v2140_v25, %v2138_v12 }
 0x76e   :  { %2229 = vmatprep.mubr.f32.mxu1 %v5792_v22  ;;  %4290 = vmatpush1.bf16.msra.mxu0 %v4289_v63  ;;  %v4297_v22 = vpack.c.bf16 %v2995_v3, %v2993_v20  ;;  %v4299_v8 = vpack.c.bf16 %v3000_v7, %v2998_v23  ;;  %v3005_v63 = vld [vmem:[#allocation8 + $0x12a0] sm:$0xff]  ;;  %v2132_v20 = vld [vmem:[#allocation8 + $0x6f8] sm:$0xff] }
 0x76f   :  { %3113 = vmatprep.mubr.f32.mxu0 %v5768_v2  ;;  %3908 = vmatprep.subr.bf16.mxu1 %v3907_v48  ;;  %v2999_v2 = vld [vmem:[#allocation8 + $0x1270] sm:$0xff]  ;;  %v2128_v48 = vld [vmem:[#allocation8 + $0x6d8] sm:$0xff]  ;;  %v3931_v23 = vpack.c.bf16 %v2132_v20, %v2130_v38  ;;  %v2129_v7 = vld [vmem:[#allocation8 + $0x6e0] sm:$0xff] }
 0x770   :  { %4292 = vmatprep.subr.bf16.mxu0 %v4291_v19  ;;  %v4301_v21 = vpack.c.bf16 %v2999_v2, %v2997_v47  ;;  %v4309_v19 = vpack.c.bf16 %v3007_v0, %v3005_v63  ;;  %v3927_v27 = vpack.c.bf16 %v2128_v48, %v2126_v28  ;;  %v3016_v3 = vld [vmem:[#allocation8 + $0x12f8] sm:$0xff] }
 0x771   :  { %3910 = vmatpush1.bf16.msra.mxu1 %v3909_v36  ;;  %v2127_v36 = vld [vmem:[#allocation8 + $0x6d0] sm:$0xff]  ;;  %v2136_v47 = vld [vmem:[#allocation8 + $0x718] sm:$0xff] }
 0x772   :  { %4294 = vmatpush1.bf16.msra.mxu0 %v4293_v41  ;;  %3912 = vmatprep.subr.bf16.mxu1 %v3911_v44  ;;  %v3009_v41 = vld [vmem:[#allocation8 + $0x12c0] sm:$0xff]  ;;  %v4311_v44 = vpack.c.bf16 %v3012_v26, %v3010_v51  ;;  %v3929_v60 = vpack.c.bf16 %v2127_v36, %v2125_v34  ;;  %v3020_v2 = vld [vmem:[#allocation8 + $0x1318] sm:$0xff]  ;;  %v3935_v62 = vpack.c.bf16 %v2136_v47, %v2134_v30  ;;  %v3027_v34 = vld [vmem:[#allocation8 + $0x1350] sm:$0xff] }
 0x773   :  { %4296 = vmatprep.subr.bf16.mxu0 %v4295_v31  ;;  %v3014_v31 = vld [vmem:[#allocation8 + $0x12e8] sm:$0xff]  ;;  %v4313_v29 = vpack.c.bf16 %v3011_v54, %v3009_v41  ;;  %v3024_v17 = vld [vmem:[#allocation8 + $0x1338] sm:$0xff]  ;;  %v2141_v26 = vld [vmem:[#allocation8 + $0x740] sm:$0xff] }
 0x774   :  { %v2144_v63 = vld [vmem:[#allocation8 + $0x758] sm:$0xff]  ;;  %v2146_v36 = vld [vmem:[#allocation8 + $0x768] sm:$0xff] }
 0x775   :  { %3914 = vmatpush1.bf16.msra.mxu1 %v3913_v13  ;;  %v2131_v13 = vld [vmem:[#allocation8 + $0x6f0] sm:$0xff]  ;;  %v3028_v0 = vld [vmem:[#allocation8 + $0x1358] sm:$0xff]  ;;  %v3943_v51 = vpack.c.bf16 %v2144_v63, %v2142_v6 }
 0x776   :  { %4298 = vmatpush1.bf16.msra.mxu0 %v4297_v22  ;;  %3916 = vmatprep.subr.bf16.mxu1 %v3915_v32  ;;  %v3013_v22 = vld [vmem:[#allocation8 + $0x12e0] sm:$0xff]  ;;  %v4315_v32 = vpack.c.bf16 %v3016_v3, %v3014_v31  ;;  %v3933_v39 = vpack.c.bf16 %v2131_v13, %v2129_v7  ;;  %v2148_v41 = vld [vmem:[#allocation8 + $0x778] sm:$0xff]  ;;  %v3031_v7 = vld [vmem:[#allocation8 + $0x1370] sm:$0xff] }
 0x777   :  { %4300 = vmatprep.subr.bf16.mxu0 %v4299_v8  ;;  %v3018_v8 = vld [vmem:[#allocation8 + $0x1308] sm:$0xff]  ;;  %v4317_v24 = vpack.c.bf16 %v3015_v57, %v3013_v22  ;;  %v3032_v54 = vld [vmem:[#allocation8 + $0x1378] sm:$0xff]  ;;  %v3947_v31 = vpack.c.bf16 %v2148_v41, %v2146_v36  ;;  %v2145_v3 = vld [vmem:[#allocation8 + $0x760] sm:$0xff] }
 0x778   :  { %v2150_v13 = vld [vmem:[#allocation8 + $0x788] sm:$0xff]  ;;  %v2152_v22 = vld [vmem:[#allocation8 + $0x798] sm:$0xff] }
 0x779   :  { %3918 = vmatpush1.bf16.msra.mxu1 %v3917_v43  ;;  %v2135_v43 = vld [vmem:[#allocation8 + $0x710] sm:$0xff]  ;;  %v3036_v57 = vld [vmem:[#allocation8 + $0x1398] sm:$0xff] }
 0x77a   :  { %4302 = vmatpush1.bf16.msra.mxu0 %v4301_v21  ;;  %3920 = vmatprep.subr.bf16.mxu1 %v3919_v55  ;;  %v3017_v21 = vld [vmem:[#allocation8 + $0x1300] sm:$0xff]  ;;  %v4319_v55 = vpack.c.bf16 %v3020_v2, %v3018_v8  ;;  %v3937_v10 = vpack.c.bf16 %v2135_v43, %v2133_v58  ;;  %v3951_v8 = vpack.c.bf16 %v2152_v22, %v2150_v13  ;;  %v3035_v58 = vld [vmem:[#allocation8 + $0x1390] sm:$0xff]  ;;  %v2154_v43 = vld [vmem:[#allocation8 + $0x7a8] sm:$0xff] }
 0x77b   :  { %4304 = vmatprep.subr.bf16.mxu0 %v4303_v16  ;;  %v3022_v16 = vld [vmem:[#allocation8 + $0x1328] sm:$0xff]  ;;  %v4321_v18 = vpack.c.bf16 %v3019_v61, %v3017_v21  ;;  %v2149_v2 = vld [vmem:[#allocation8 + $0x780] sm:$0xff]  ;;  %v2156_v21 = vld [vmem:[#allocation8 + $0x7b8] sm:$0xff] }
 0x77c   :  { %v3040_v61 = vld [vmem:[#allocation8 + $0x13b8] sm:$0xff] }
 0x77d   :  { %3922 = vmatpush1.bf16.msra.mxu1 %v3921_v14  ;;  %v2139_v14 = vld [vmem:[#allocation8 + $0x730] sm:$0xff] }
 0x77e   :  { %4306 = vmatpush1.bf16.msra.mxu0 %v4305_v5  ;;  %3924 = vmatprep.subr.bf16.mxu1 %v3923_v42  ;;  %v3021_v5 = vld [vmem:[#allocation8 + $0x1320] sm:$0xff]  ;;  %v4323_v42 = vpack.c.bf16 %v3024_v17, %v3022_v16  ;;  %v3941_v28 = vpack.c.bf16 %v2139_v14, %v2137_v37  ;;  %v3955_v16 = vpack.c.bf16 %v2156_v21, %v2154_v43  ;;  %v3039_v37 = vld [vmem:[#allocation8 + $0x13b0] sm:$0xff]  ;;  %v2158_v14 = vld [vmem:[#allocation8 + $0x7c8] sm:$0xff] }
 0x77f   :  { %4308 = vmatprep.subr.bf16.mxu0 %v4307_v40  ;;  %v3026_v40 = vld [vmem:[#allocation8 + $0x1348] sm:$0xff]  ;;  %v4325_v48 = vpack.c.bf16 %v3023_v45, %v3021_v5  ;;  %v2153_v17 = vld [vmem:[#allocation8 + $0x7a0] sm:$0xff]  ;;  %v2160_v5 = vld [vmem:[#allocation8 + $0x7d8] sm:$0xff] }
 0x780   :  { %v3044_v45 = vld [vmem:[#allocation8 + $0x13d8] sm:$0xff] }
 0x781   :  { %3926 = vmatpush1.bf16.msra.mxu1 %v3925_v9  ;;  %v2143_v9 = vld [vmem:[#allocation8 + $0x750] sm:$0xff]  ;;  %v3140_v43 = vld [vmem:[#allocation8 + $0x1438] sm:$0xff] }
 0x782   :  { %4310 = vmatpush1.bf16.msra.mxu0 %v4309_v19  ;;  %3928 = vmatprep.subr.bf16.mxu1 %v3927_v27  ;;  %v3025_v19 = vld [vmem:[#allocation8 + $0x1340] sm:$0xff]  ;;  %v4327_v27 = vpack.c.bf16 %v3028_v0, %v3026_v40  ;;  %v3945_v38 = vpack.c.bf16 %v2143_v9, %v2141_v26  ;;  %v3959_v40 = vpack.c.bf16 %v2160_v5, %v2158_v14  ;;  %v3043_v26 = vld [vmem:[#allocation8 + $0x13d0] sm:$0xff]  ;;  %v2162_v9 = vld [vmem:[#allocation8 + $0x7e8] sm:$0xff] }
 0x783   :  { %4312 = vmatprep.subr.bf16.mxu0 %v4311_v44  ;;  %v3030_v44 = vld [vmem:[#allocation8 + $0x1368] sm:$0xff]  ;;  %v4329_v20 = vpack.c.bf16 %v3027_v34, %v3025_v19  ;;  %v2157_v0 = vld [vmem:[#allocation8 + $0x7c0] sm:$0xff]  ;;  %v2164_v19 = vld [vmem:[#allocation8 + $0x7f8] sm:$0xff] }
 0x784   :  { %v3048_v34 = vld [vmem:[#allocation8 + $0x13f8] sm:$0xff] }
 0x785   :  { %3930 = vmatpush1.bf16.msra.mxu1 %v3929_v60  ;;  %v2147_v60 = vld [vmem:[#allocation8 + $0x770] sm:$0xff] }
 0x786   :  { %4314 = vmatpush1.bf16.msra.mxu0 %v4313_v29  ;;  %3932 = vmatprep.subr.bf16.mxu1 %v3931_v23  ;;  %v3029_v29 = vld [vmem:[#allocation8 + $0x1360] sm:$0xff]  ;;  %v4331_v23 = vpack.c.bf16 %v3032_v54, %v3030_v44  ;;  %v3949_v30 = vpack.c.bf16 %v2147_v60, %v2145_v3  ;;  %v3963_v44 = vpack.c.bf16 %v2164_v19, %v2162_v9  ;;  %v3047_v3 = vld [vmem:[#allocation8 + $0x13f0] sm:$0xff]  ;;  %v2250_v60 = vld [vmem:[#allocation8 + $0x808] sm:$0xff] }
 0x787   :  { %4316 = vmatprep.subr.bf16.mxu0 %v4315_v32  ;;  %v3034_v32 = vld [vmem:[#allocation8 + $0x1388] sm:$0xff]  ;;  %v4333_v47 = vpack.c.bf16 %v3031_v7, %v3029_v29  ;;  %v2161_v54 = vld [vmem:[#allocation8 + $0x7e0] sm:$0xff]  ;;  %v2252_v29 = vld [vmem:[#allocation8 + $0x818] sm:$0xff] }
 0x788   :  { %v3136_v7 = vld [vmem:[#allocation8 + $0x1418] sm:$0xff]  ;;  %v2261_v9 = vld [vmem:[#allocation8 + $0x860] sm:$0xff]  ;;  %v2263_v19 = vld [vmem:[#allocation8 + $0x870] sm:$0xff] }
 0x789   :  { %3934 = vmatpush1.bf16.msra.mxu1 %v3933_v39  ;;  %v2151_v39 = vld [vmem:[#allocation8 + $0x790] sm:$0xff] }
 0x78a   :  { %4318 = vmatpush1.bf16.msra.mxu0 %v4317_v24  ;;  %3936 = vmatprep.subr.bf16.mxu1 %v3935_v62  ;;  %v3033_v24 = vld [vmem:[#allocation8 + $0x1380] sm:$0xff]  ;;  %v4335_v62 = vpack.c.bf16 %v3036_v57, %v3034_v32  ;;  %v3953_v12 = vpack.c.bf16 %v2151_v39, %v2149_v2  ;;  %v3967_v32 = vpack.c.bf16 %v2252_v29, %v2250_v60  ;;  %v3135_v2 = vld [vmem:[#allocation8 + $0x1410] sm:$0xff]  ;;  %v2254_v39 = vld [vmem:[#allocation8 + $0x828] sm:$0xff] }
 0x78b   :  { %4320 = vmatprep.subr.bf16.mxu0 %v4319_v55  ;;  %v3038_v55 = vld [vmem:[#allocation8 + $0x13a8] sm:$0xff]  ;;  %v4337_v25 = vpack.c.bf16 %v3035_v58, %v3033_v24  ;;  %v2249_v57 = vld [vmem:[#allocation8 + $0x800] sm:$0xff]  ;;  %v2256_v24 = vld [vmem:[#allocation8 + $0x838] sm:$0xff] }
 0x78c   :  { %v3138_v58 = vld [vmem:[#allocation8 + $0x1428] sm:$0xff]  ;;  %v2267_v60 = vld [vmem:[#allocation8 + $0x890] sm:$0xff]  ;;  %v3149_v29 = vld [vmem:[#allocation8 + $0x1480] sm:$0xff] }
 0x78d   :  { %3938 = vmatpush1.bf16.msra.mxu1 %v3937_v10  ;;  %v2155_v10 = vld [vmem:[#allocation8 + $0x7b0] sm:$0xff] }
 0x78e   :  { %4322 = vmatpush1.bf16.msra.mxu0 %v4321_v18  ;;  %3940 = vmatprep.subr.bf16.mxu1 %v3939_v52  ;;  %v3037_v18 = vld [vmem:[#allocation8 + $0x13a0] sm:$0xff]  ;;  %v4339_v52 = vpack.c.bf16 %v3040_v61, %v3038_v55  ;;  %v3957_v6 = vpack.c.bf16 %v2155_v10, %v2153_v17  ;;  %v2255_v61 = vld [vmem:[#allocation8 + $0x830] sm:$0xff]  ;;  %v2258_v17 = vld [vmem:[#allocation8 + $0x848] sm:$0xff] }
 0x78f   :  { %4324 = vmatprep.subr.bf16.mxu0 %v4323_v42  ;;  %v3042_v42 = vld [vmem:[#allocation8 + $0x13c8] sm:$0xff]  ;;  %v4341_v63 = vpack.c.bf16 %v3039_v37, %v3037_v18  ;;  %v2253_v55 = vld [vmem:[#allocation8 + $0x820] sm:$0xff]  ;;  %v2260_v10 = vld [vmem:[#allocation8 + $0x858] sm:$0xff]  ;;  %v4355_v18 = vpack.c.bf16 %v3140_v43, %v3138_v58 }
 0x790   :  { %v3144_v37 = vld [vmem:[#allocation8 + $0x1458] sm:$0xff]  ;;  %v3973_v14 = vpack.c.bf16 %v2255_v61, %v2253_v55  ;;  %v3155_v58 = vld [vmem:[#allocation8 + $0x14b0] sm:$0xff]  ;;  %v2274_v43 = vld [vmem:[#allocation8 + $0x8c8] sm:$0xff] }
 0x791   :  { %3942 = vmatpush1.bf16.msra.mxu1 %v3941_v28  ;;  %v2159_v28 = vld [vmem:[#allocation8 + $0x7d0] sm:$0xff]  ;;  %v3158_v55 = vld [vmem:[#allocation8 + $0x14c8] sm:$0xff]  ;;  %v3160_v61 = vld [vmem:[#allocation8 + $0x14d8] sm:$0xff] }
 0x792   :  { %4326 = vmatpush1.bf16.msra.mxu0 %v4325_v48  ;;  %3944 = vmatprep.subr.bf16.mxu1 %v3943_v51  ;;  %v3041_v48 = vld [vmem:[#allocation8 + $0x13c0] sm:$0xff]  ;;  %v4343_v51 = vpack.c.bf16 %v3044_v45, %v3042_v42  ;;  %v3961_v36 = vpack.c.bf16 %v2159_v28, %v2157_v0  ;;  %v3975_v42 = vpack.c.bf16 %v2260_v10, %v2258_v17  ;;  %v2262_v0 = vld [vmem:[#allocation8 + $0x868] sm:$0xff]  ;;  %v2264_v28 = vld [vmem:[#allocation8 + $0x878] sm:$0xff] }
 0x793   :  { %4328 = vmatprep.subr.bf16.mxu0 %v4327_v27  ;;  %v3046_v27 = vld [vmem:[#allocation8 + $0x13e8] sm:$0xff]  ;;  %v4345_v41 = vpack.c.bf16 %v3043_v26, %v3041_v48  ;;  %v2257_v45 = vld [vmem:[#allocation8 + $0x840] sm:$0xff]  ;;  %v3979_v26 = vpack.c.bf16 %v2264_v28, %v2262_v0  ;;  %v2275_v10 = vld [vmem:[#allocation8 + $0x8d0] sm:$0xff] }
 0x794   :  { %v3146_v48 = vld [vmem:[#allocation8 + $0x1468] sm:$0xff]  ;;  %v2273_v17 = vld [vmem:[#allocation8 + $0x8c0] sm:$0xff]  ;;  %v2279_v0 = vld [vmem:[#allocation8 + $0x8f0] sm:$0xff] }
 0x795   :  { %3946 = vmatpush1.bf16.msra.mxu1 %v3945_v38  ;;  %v2163_v38 = vld [vmem:[#allocation8 + $0x7f0] sm:$0xff]  ;;  %v3161_v28 = vld [vmem:[#allocation8 + $0x14e0] sm:$0xff] }
 0x796   :  { %4330 = vmatpush1.bf16.msra.mxu0 %v4329_v20  ;;  %3948 = vmatprep.subr.bf16.mxu1 %v3947_v31  ;;  %v3045_v20 = vld [vmem:[#allocation8 + $0x13e0] sm:$0xff]  ;;  %v4347_v31 = vpack.c.bf16 %v3048_v34, %v3046_v27  ;;  %v3965_v13 = vpack.c.bf16 %v2163_v38, %v2161_v54  ;;  %v3152_v54 = vld [vmem:[#allocation8 + $0x1498] sm:$0xff]  ;;  %v3981_v38 = vpack.c.bf16 %v2263_v19, %v2261_v9 }
 0x797   :  { %4332 = vmatprep.subr.bf16.mxu0 %v4331_v23  ;;  %v3134_v23 = vld [vmem:[#allocation8 + $0x1408] sm:$0xff]  ;;  %v4349_v22 = vpack.c.bf16 %v3047_v3, %v3045_v20  ;;  %v3145_v27 = vld [vmem:[#allocation8 + $0x1460] sm:$0xff]  ;;  %v3168_v9 = vld [vmem:[#allocation8 + $0x1518] sm:$0xff] }
 0x798   :  { %v2265_v3 = vld [vmem:[#allocation8 + $0x880] sm:$0xff] }
 0x799   :  { %3950 = vmatpush1.bf16.msra.mxu1 %v3949_v30  ;;  %v2251_v30 = vld [vmem:[#allocation8 + $0x810] sm:$0xff] }
 0x79a   :  { %4334 = vmatpush1.bf16.msra.mxu0 %v4333_v47  ;;  %3952 = vmatprep.subr.bf16.mxu1 %v3951_v8  ;;  %v4351_v47 = vpack.c.bf16 %v3136_v7, %v3134_v23  ;;  %v3133_v8 = vld [vmem:[#allocation8 + $0x1400] sm:$0xff]  ;;  %v3151_v7 = vld [vmem:[#allocation8 + $0x1490] sm:$0xff] }
 0x79b   :  { %4336 = vmatprep.subr.bf16.mxu0 %v4335_v62  ;;  %v3969_v62 = vpack.c.bf16 %v2251_v30, %v2249_v57  ;;  %v4353_v21 = vpack.c.bf16 %v3135_v2, %v3133_v8  ;;  %v3156_v57 = vld [vmem:[#allocation8 + $0x14b8] sm:$0xff]  ;;  %v3985_v30 = vpack.c.bf16 %v2267_v60, %v2265_v3  ;;  %v2269_v2 = vld [vmem:[#allocation8 + $0x8a0] sm:$0xff] }
 0x79c   :  { %v3172_v3 = vld [vmem:[#allocation8 + $0x1538] sm:$0xff] }
 0x79d   :  { %3954 = vmatpush1.bf16.msra.mxu1 %v3953_v12  ;;  %v3137_v12 = vld [vmem:[#allocation8 + $0x1420] sm:$0xff] }
 0x79e   :  { %4338 = vmatpush1.bf16.msra.mxu0 %v4337_v25  ;;  %3956 = vmatprep.subr.bf16.mxu1 %v3955_v16  ;;  %v3971_v25 = vpack.c.bf16 %v2256_v24, %v2254_v39  ;;  %v3139_v16 = vld [vmem:[#allocation8 + $0x1430] sm:$0xff]  ;;  %v3153_v24 = vld [vmem:[#allocation8 + $0x14a0] sm:$0xff] }
 0x79f   :  { %4340 = vmatprep.subr.bf16.mxu0 %v4339_v52  ;;  %v3142_v52 = vld [vmem:[#allocation8 + $0x1448] sm:$0xff]  ;;  %v4357_v5 = vpack.c.bf16 %v3139_v16, %v3137_v12  ;;  %v2271_v39 = vld [vmem:[#allocation8 + $0x8b0] sm:$0xff] }
 0x7a0   :  { %v3989_v12 = vpack.c.bf16 %v2271_v39, %v2269_v2  ;;  %v3176_v2 = vld [vmem:[#allocation8 + $0x1558] sm:$0xff] }
 0x7a1   :  { %3958 = vmatpush1.bf16.msra.mxu1 %v3957_v6  ;;  %v2259_v6 = vld [vmem:[#allocation8 + $0x850] sm:$0xff] }
 0x7a2   :  { %4342 = vmatpush1.bf16.msra.mxu0 %v4341_v63  ;;  %3960 = vmatprep.subr.bf16.mxu1 %v3959_v40  ;;  %v3141_v63 = vld [vmem:[#allocation8 + $0x1440] sm:$0xff]  ;;  %v4359_v40 = vpack.c.bf16 %v3144_v37, %v3142_v52  ;;  %v4375_v52 = vpack.c.bf16 %v3160_v61, %v3158_v55  ;;  %v3159_v37 = vld [vmem:[#allocation8 + $0x14d0] sm:$0xff] }
 0x7a3   :  { %4344 = vmatprep.subr.bf16.mxu0 %v4343_v51  ;;  %v3977_v51 = vpack.c.bf16 %v2259_v6, %v2257_v45  ;;  %v3164_v45 = vld [vmem:[#allocation8 + $0x14f8] sm:$0xff]  ;;  %v3993_v6 = vpack.c.bf16 %v2275_v10, %v2273_v17  ;;  %v3175_v61 = vld [vmem:[#allocation8 + $0x1550] sm:$0xff] }
 0x7a4   :  { %v3180_v17 = vld [vmem:[#allocation8 + $0x1578] sm:$0xff] }
 0x7a5   :  { %3962 = vmatpush1.bf16.msra.mxu1 %v3961_v36  ;;  %v2266_v36 = vld [vmem:[#allocation8 + $0x888] sm:$0xff] }
 0x7a6   :  { %4346 = vmatpush1.bf16.msra.mxu0 %v4345_v41  ;;  %3964 = vmatprep.subr.bf16.mxu1 %v3963_v44  ;;  %v2268_v41 = vld [vmem:[#allocation8 + $0x898] sm:$0xff]  ;;  %v3150_v44 = vld [vmem:[#allocation8 + $0x1488] sm:$0xff] }
 0x7a7   :  { %4348 = vmatprep.subr.bf16.mxu0 %v4347_v31  ;;  %v3983_v31 = vpack.c.bf16 %v2268_v41, %v2266_v36  ;;  %v4367_v23 = vpack.c.bf16 %v3152_v54, %v3150_v44  ;;  %v2283_v36 = vld [vmem:[#allocation8 + $0x910] sm:$0xff]  ;;  %v3165_v41 = vld [vmem:[#allocation8 + $0x1500] sm:$0xff] }
 0x7a8   :  { %v3167_v54 = vld [vmem:[#allocation8 + $0x1510] sm:$0xff] }
 0x7a9   :  { %3966 = vmatpush1.bf16.msra.mxu1 %v3965_v13  ;;  %v2270_v13 = vld [vmem:[#allocation8 + $0x8a8] sm:$0xff] }
 0x7aa   :  { %4350 = vmatpush1.bf16.msra.mxu0 %v4349_v22  ;;  %3968 = vmatprep.subr.bf16.mxu1 %v3967_v32  ;;  %v2272_v22 = vld [vmem:[#allocation8 + $0x8b8] sm:$0xff]  ;;  %v3154_v32 = vld [vmem:[#allocation8 + $0x14a8] sm:$0xff] }
 0x7ab   :  { %4352 = vmatprep.subr.bf16.mxu0 %v4351_v47  ;;  %v4369_v47 = vpack.c.bf16 %v3151_v7, %v3149_v29  ;;  %v3987_v8 = vpack.c.bf16 %v2272_v22, %v2270_v13  ;;  %v4385_v29 = vpack.c.bf16 %v3167_v54, %v3165_v41  ;;  %v2285_v7 = vld [vmem:[#allocation8 + $0x920] sm:$0xff]  ;;  %v2287_v13 = vld [vmem:[#allocation8 + $0x930] sm:$0xff] }
 0x7ac   :  { %2230 = vmatmul.mubr.f32.vlgmr.msra.gmra.mrb[20].mxu1 %v5797_v35  ;;  %v3143_v35 = vld [vmem:[#allocation8 + $0x1450] sm:$0xff]  ;;  %v3169_v22 = vld [vmem:[#allocation8 + $0x1520] sm:$0xff]  ;;  %v4005_v39 = vpack.c.bf16 %v2287_v13, %v2285_v7  ;;  %v3192_v7 = vld [vmem:[#allocation8 + $0x15d8] sm:$0xff] }
 0x7ad   :  { %3114 = vmatmul.mubr.f32.vlgmr.msra.gmra.mrb[36].mxu0 %v5801_v15  ;;  %3970 = vmatpush1.bf16.msra.mxu1 %v3969_v62  ;;  %v3148_v15 = vld [vmem:[#allocation8 + $0x1478] sm:$0xff]  ;;  %v4371_v62 = vpack.c.bf16 %v3156_v57, %v3154_v32  ;;  %v3171_v57 = vld [vmem:[#allocation8 + $0x1530] sm:$0xff]  ;;  %v2301_v54 = vld [vmem:[#allocation8 + $0x9a0] sm:$0xff] }
 0x7ae   :  { %2377 = vmatprep.mubr.f32.mxu1 %v5812_v33  ;;  %4354 = vmatpush1.bf16.msra.mxu0 %v4353_v21  ;;  %v4361_v33 = vpack.c.bf16 %v3143_v35, %v3141_v63  ;;  %v4363_v34 = vpack.c.bf16 %v3148_v15, %v3146_v48  ;;  %v2276_v21 = vld [vmem:[#allocation8 + $0x8d8] sm:$0xff]  ;;  %v2277_v35 = vld [vmem:[#allocation8 + $0x8e0] sm:$0xff]  ;;  %v3163_v15 = vld [vmem:[#allocation8 + $0x14f0] sm:$0xff] }
 0x7af   :  { %3261 = vmatprep.mubr.f32.mxu0 %v5828_v59  ;;  %3972 = vmatprep.subr.bf16.mxu1 %v3971_v25  ;;  %v3147_v59 = vld [vmem:[#allocation8 + $0x1470] sm:$0xff]  ;;  %v4373_v25 = vpack.c.bf16 %v3155_v58, %v3153_v24  ;;  %v3991_v16 = vpack.c.bf16 %v2276_v21, %v2274_v43  ;;  %v3997_v19 = vpack.c.bf16 %v2279_v0, %v2277_v35  ;;  %v2289_v58 = vld [vmem:[#allocation8 + $0x940] sm:$0xff]  ;;  %v3184_v35 = vld [vmem:[#allocation8 + $0x1598] sm:$0xff] }
 0x7b0   :  { %4356 = vmatprep.subr.bf16.mxu0 %v4355_v18  ;;  %v4365_v20 = vpack.c.bf16 %v3147_v59, %v3145_v27  ;;  %v3157_v18 = vld [vmem:[#allocation8 + $0x14c0] sm:$0xff]  ;;  %v4381_v27 = vpack.c.bf16 %v3163_v15, %v3161_v28  ;;  %v4389_v24 = vpack.c.bf16 %v3171_v57, %v3169_v22  ;;  %v2291_v43 = vld [vmem:[#allocation8 + $0x950] sm:$0xff] }
 0x7b1   :  { %3974 = vmatpush1.bf16.msra.mxu1 %v3973_v14  ;;  %v2278_v14 = vld [vmem:[#allocation8 + $0x8e8] sm:$0xff]  ;;  %v4377_v63 = vpack.c.bf16 %v3159_v37, %v3157_v18  ;;  %v2281_v59 = vld [vmem:[#allocation8 + $0x900] sm:$0xff]  ;;  %v4009_v10 = vpack.c.bf16 %v2291_v43, %v2289_v58  ;;  %v3196_v58 = vld [vmem:[#allocation8 + $0x15f8] sm:$0xff] }
 0x7b2   :  { %4358 = vmatpush1.bf16.msra.mxu0 %v4357_v5  ;;  %3976 = vmatprep.subr.bf16.mxu1 %v3975_v42  ;;  %v2280_v5 = vld [vmem:[#allocation8 + $0x8f8] sm:$0xff]  ;;  %v3162_v42 = vld [vmem:[#allocation8 + $0x14e8] sm:$0xff]  ;;  %v4001_v60 = vpack.c.bf16 %v2283_v36, %v2281_v59  ;;  %v3173_v21 = vld [vmem:[#allocation8 + $0x1540] sm:$0xff] }
 0x7b3   :  { %4360 = vmatprep.subr.bf16.mxu0 %v4359_v40  ;;  %v3995_v40 = vpack.c.bf16 %v2280_v5, %v2278_v14  ;;  %v4379_v48 = vpack.c.bf16 %v3164_v45, %v3162_v42  ;;  %v4393_v18 = vpack.c.bf16 %v3175_v61, %v3173_v21  ;;  %v2293_v37 = vld [vmem:[#allocation8 + $0x960] sm:$0xff]  ;;  %v2295_v14 = vld [vmem:[#allocation8 + $0x970] sm:$0xff]  ;;  %v3188_v59 = vld [vmem:[#allocation8 + $0x15b8] sm:$0xff] }
 0x7b4   :  { %v3177_v5 = vld [vmem:[#allocation8 + $0x1560] sm:$0xff]  ;;  %v3179_v45 = vld [vmem:[#allocation8 + $0x1570] sm:$0xff]  ;;  %v4013_v0 = vpack.c.bf16 %v2295_v14, %v2293_v37  ;;  %v3284_v37 = vld [vmem:[#allocation8 + $0x1618] sm:$0xff] }
 0x7b5   :  { %3978 = vmatpush1.bf16.msra.mxu1 %v3977_v51  ;;  %v2282_v51 = vld [vmem:[#allocation8 + $0x908] sm:$0xff]  ;;  %v4397_v28 = vpack.c.bf16 %v3179_v45, %v3177_v5  ;;  %v2297_v15 = vld [vmem:[#allocation8 + $0x980] sm:$0xff] }
 0x7b6   :  { %4362 = vmatpush1.bf16.msra.mxu0 %v4361_v33  ;;  %3980 = vmatprep.subr.bf16.mxu1 %v3979_v26  ;;  %v2284_v33 = vld [vmem:[#allocation8 + $0x918] sm:$0xff]  ;;  %v3166_v26 = vld [vmem:[#allocation8 + $0x1508] sm:$0xff]  ;;  %v2305_v57 = vld [vmem:[#allocation8 + $0x9c0] sm:$0xff] }
 0x7b7   :  { %4364 = vmatprep.subr.bf16.mxu0 %v4363_v34  ;;  %v3999_v34 = vpack.c.bf16 %v2284_v33, %v2282_v51  ;;  %v4383_v44 = vpack.c.bf16 %v3168_v9, %v3166_v26  ;;  %v2299_v51 = vld [vmem:[#allocation8 + $0x990] sm:$0xff]  ;;  %v3181_v33 = vld [vmem:[#allocation8 + $0x1580] sm:$0xff] }
 0x7b8   :  { %v3183_v9 = vld [vmem:[#allocation8 + $0x1590] sm:$0xff]  ;;  %v4017_v36 = vpack.c.bf16 %v2299_v51, %v2297_v15  ;;  %v2309_v61 = vld [vmem:[#allocation8 + $0x9e0] sm:$0xff]  ;;  %v3286_v15 = vld [vmem:[#allocation8 + $0x1628] sm:$0xff] }
 0x7b9   :  { %3982 = vmatpush1.bf16.msra.mxu1 %v3981_v38  ;;  %v2286_v38 = vld [vmem:[#allocation8 + $0x928] sm:$0xff]  ;;  %v4401_v41 = vpack.c.bf16 %v3183_v9, %v3181_v33  ;;  %v2397_v45 = vld [vmem:[#allocation8 + $0xa00] sm:$0xff]  ;;  %v3288_v51 = vld [vmem:[#allocation8 + $0x1638] sm:$0xff] }
 0x7ba   :  { %4366 = vmatpush1.bf16.msra.mxu0 %v4365_v20  ;;  %3984 = vmatprep.subr.bf16.mxu1 %v3983_v31  ;;  %v2288_v20 = vld [vmem:[#allocation8 + $0x938] sm:$0xff]  ;;  %v3170_v31 = vld [vmem:[#allocation8 + $0x1528] sm:$0xff]  ;;  %v2403_v9 = vld [vmem:[#allocation8 + $0xa30] sm:$0xff] }
 0x7bb   :  { %4368 = vmatprep.subr.bf16.mxu0 %v4367_v23  ;;  %v4003_v23 = vpack.c.bf16 %v2288_v20, %v2286_v38  ;;  %v4387_v32 = vpack.c.bf16 %v3172_v3, %v3170_v31  ;;  %v2303_v38 = vld [vmem:[#allocation8 + $0x9b0] sm:$0xff]  ;;  %v3185_v20 = vld [vmem:[#allocation8 + $0x15a0] sm:$0xff] }
 0x7bc   :  { %v3187_v3 = vld [vmem:[#allocation8 + $0x15b0] sm:$0xff]  ;;  %v4021_v13 = vpack.c.bf16 %v2303_v38, %v2301_v54  ;;  %v3292_v54 = vld [vmem:[#allocation8 + $0x1658] sm:$0xff] }
 0x7bd   :  { %3986 = vmatpush1.bf16.msra.mxu1 %v3985_v30  ;;  %v2290_v30 = vld [vmem:[#allocation8 + $0x948] sm:$0xff]  ;;  %v4405_v22 = vpack.c.bf16 %v3187_v3, %v3185_v20  ;;  %v2405_v3 = vld [vmem:[#allocation8 + $0xa40] sm:$0xff] }
 0x7be   :  { %4370 = vmatpush1.bf16.msra.mxu0 %v4369_v47  ;;  %3988 = vmatprep.subr.bf16.mxu1 %v3987_v8  ;;  %v2292_v47 = vld [vmem:[#allocation8 + $0x958] sm:$0xff]  ;;  %v3174_v8 = vld [vmem:[#allocation8 + $0x1548] sm:$0xff] }
 0x7bf   :  { %4372 = vmatprep.subr.bf16.mxu0 %v4371_v62  ;;  %v4007_v62 = vpack.c.bf16 %v2292_v47, %v2290_v30  ;;  %v4391_v55 = vpack.c.bf16 %v3176_v2, %v3174_v8  ;;  %v2307_v30 = vld [vmem:[#allocation8 + $0x9d0] sm:$0xff]  ;;  %v3189_v47 = vld [vmem:[#allocation8 + $0x15c0] sm:$0xff] }
 0x7c0   :  { %v3191_v2 = vld [vmem:[#allocation8 + $0x15d0] sm:$0xff]  ;;  %v4025_v43 = vpack.c.bf16 %v2307_v30, %v2305_v57  ;;  %v2409_v30 = vld [vmem:[#allocation8 + $0xa60] sm:$0xff] }
 0x7c1   :  { %3990 = vmatpush1.bf16.msra.mxu1 %v3989_v12  ;;  %v2294_v12 = vld [vmem:[#allocation8 + $0x968] sm:$0xff]  ;;  %v4409_v21 = vpack.c.bf16 %v3191_v2, %v3189_v47  ;;  %v2411_v47 = vld [vmem:[#allocation8 + $0xa70] sm:$0xff] }
 0x7c2   :  { %4374 = vmatpush1.bf16.msra.mxu0 %v4373_v25  ;;  %3992 = vmatprep.subr.bf16.mxu1 %v3991_v16  ;;  %v2296_v25 = vld [vmem:[#allocation8 + $0x978] sm:$0xff]  ;;  %v3178_v16 = vld [vmem:[#allocation8 + $0x1568] sm:$0xff] }
 0x7c3   :  { %4376 = vmatprep.subr.bf16.mxu0 %v4375_v52  ;;  %v4011_v52 = vpack.c.bf16 %v2296_v25, %v2294_v12  ;;  %v4395_v42 = vpack.c.bf16 %v3180_v17, %v3178_v16  ;;  %v2311_v12 = vld [vmem:[#allocation8 + $0x9f0] sm:$0xff]  ;;  %v3193_v25 = vld [vmem:[#allocation8 + $0x15e0] sm:$0xff] }
 0x7c4   :  { %v3195_v17 = vld [vmem:[#allocation8 + $0x15f0] sm:$0xff]  ;;  %v4029_v14 = vpack.c.bf16 %v2311_v12, %v2309_v61  ;;  %v2413_v61 = vld [vmem:[#allocation8 + $0xa80] sm:$0xff] }
 0x7c5   :  { %3994 = vmatpush1.bf16.msra.mxu1 %v3993_v6  ;;  %v2298_v6 = vld [vmem:[#allocation8 + $0x988] sm:$0xff]  ;;  %v4413_v5 = vpack.c.bf16 %v3195_v17, %v3193_v25  ;;  %v2415_v12 = vld [vmem:[#allocation8 + $0xa90] sm:$0xff]  ;;  %v3297_v25 = vld [vmem:[#allocation8 + $0x1680] sm:$0xff] }
 0x7c6   :  { %4378 = vmatpush1.bf16.msra.mxu0 %v4377_v63  ;;  %3996 = vmatprep.subr.bf16.mxu1 %v3995_v40  ;;  %v2300_v63 = vld [vmem:[#allocation8 + $0x998] sm:$0xff]  ;;  %v3182_v40 = vld [vmem:[#allocation8 + $0x1588] sm:$0xff]  ;;  %v3299_v17 = vld [vmem:[#allocation8 + $0x1690] sm:$0xff] }
 0x7c7   :  { %4380 = vmatprep.subr.bf16.mxu0 %v4379_v48  ;;  %v4015_v48 = vpack.c.bf16 %v2300_v63, %v2298_v6  ;;  %v4399_v26 = vpack.c.bf16 %v3184_v35, %v3182_v40  ;;  %v2399_v6 = vld [vmem:[#allocation8 + $0xa10] sm:$0xff]  ;;  %v3281_v40 = vld [vmem:[#allocation8 + $0x1600] sm:$0xff] }
 0x7c8   :  { %v3283_v35 = vld [vmem:[#allocation8 + $0x1610] sm:$0xff] }
 0x7c9   :  { %3998 = vmatpush1.bf16.msra.mxu1 %v3997_v19  ;;  %v2302_v19 = vld [vmem:[#allocation8 + $0x9a8] sm:$0xff]  ;;  %v4417_v33 = vpack.c.bf16 %v3283_v35, %v3281_v40  ;;  %v3303_v35 = vld [vmem:[#allocation8 + $0x16b0] sm:$0xff] }
 0x7ca   :  { %4382 = vmatpush1.bf16.msra.mxu0 %v4381_v27  ;;  %4000 = vmatprep.subr.bf16.mxu1 %v3999_v34  ;;  %v2304_v27 = vld [vmem:[#allocation8 + $0x9b8] sm:$0xff]  ;;  %v3186_v34 = vld [vmem:[#allocation8 + $0x15a8] sm:$0xff] }
 0x7cb   :  { %4384 = vmatprep.subr.bf16.mxu0 %v4383_v44  ;;  %v4019_v44 = vpack.c.bf16 %v2304_v27, %v2302_v19  ;;  %v4403_v31 = vpack.c.bf16 %v3188_v59, %v3186_v34  ;;  %v3285_v19 = vld [vmem:[#allocation8 + $0x1620] sm:$0xff]  ;;  %v3287_v34 = vld [vmem:[#allocation8 + $0x1630] sm:$0xff]  ;;  %v2406_v59 = vld [vmem:[#allocation8 + $0xa48] sm:$0xff] }
 0x7cc   :  { %v4421_v20 = vpack.c.bf16 %v3287_v34, %v3285_v19  ;;  %v2423_v19 = vld [vmem:[#allocation8 + $0xad0] sm:$0xff] }
 0x7cd   :  { %4002 = vmatpush1.bf16.msra.mxu1 %v4001_v60  ;;  %v2306_v60 = vld [vmem:[#allocation8 + $0x9c8] sm:$0xff] }
 0x7ce   :  { %4386 = vmatpush1.bf16.msra.mxu0 %v4385_v29  ;;  %4004 = vmatprep.subr.bf16.mxu1 %v4003_v23  ;;  %v2308_v29 = vld [vmem:[#allocation8 + $0x9d8] sm:$0xff]  ;;  %v3190_v23 = vld [vmem:[#allocation8 + $0x15c8] sm:$0xff] }
 0x7cf   :  { %4388 = vmatprep.subr.bf16.mxu0 %v4387_v32  ;;  %v4023_v32 = vpack.c.bf16 %v2308_v29, %v2306_v60  ;;  %v4407_v8 = vpack.c.bf16 %v3192_v7, %v3190_v23  ;;  %v2407_v60 = vld [vmem:[#allocation8 + $0xa50] sm:$0xff]  ;;  %v3289_v29 = vld [vmem:[#allocation8 + $0x1640] sm:$0xff]  ;;  %v2410_v7 = vld [vmem:[#allocation8 + $0xa68] sm:$0xff] }
 0x7d1   :  { %4006 = vmatpush1.bf16.msra.mxu1 %v4005_v39  ;;  %v2310_v39 = vld [vmem:[#allocation8 + $0x9e8] sm:$0xff] }
 0x7d2   :  { %4390 = vmatpush1.bf16.msra.mxu0 %v4389_v24  ;;  %4008 = vmatprep.subr.bf16.mxu1 %v4007_v62  ;;  %v2312_v24 = vld [vmem:[#allocation8 + $0x9f8] sm:$0xff]  ;;  %v3194_v62 = vld [vmem:[#allocation8 + $0x15e8] sm:$0xff] }
 0x7d3   :  { %4392 = vmatprep.subr.bf16.mxu0 %v4391_v55  ;;  %v4027_v55 = vpack.c.bf16 %v2312_v24, %v2310_v39  ;;  %v4411_v16 = vpack.c.bf16 %v3196_v58, %v3194_v62  ;;  %v2414_v39 = vld [vmem:[#allocation8 + $0xa88] sm:$0xff]  ;;  %v2416_v24 = vld [vmem:[#allocation8 + $0xa98] sm:$0xff] }
 0x7d4   :  { %v3298_v62 = vld [vmem:[#allocation8 + $0x1688] sm:$0xff]  ;;  %v3300_v58 = vld [vmem:[#allocation8 + $0x1698] sm:$0xff] }
 0x7d5   :  { %4010 = vmatpush1.bf16.msra.mxu1 %v4009_v10  ;;  %v2398_v10 = vld [vmem:[#allocation8 + $0xa08] sm:$0xff] }
 0x7d6   :  { %4394 = vmatpush1.bf16.msra.mxu0 %v4393_v18  ;;  %4012 = vmatprep.subr.bf16.mxu1 %v4011_v52  ;;  %v2400_v18 = vld [vmem:[#allocation8 + $0xa18] sm:$0xff]  ;;  %v3282_v52 = vld [vmem:[#allocation8 + $0x1608] sm:$0xff] }
 0x7d7   :  { %4396 = vmatprep.subr.bf16.mxu0 %v4395_v42  ;;  %v4031_v42 = vpack.c.bf16 %v2400_v18, %v2398_v10  ;;  %v4415_v63 = vpack.c.bf16 %v3284_v37, %v3282_v52  ;;  %v2418_v10 = vld [vmem:[#allocation8 + $0xaa8] sm:$0xff]  ;;  %v2420_v18 = vld [vmem:[#allocation8 + $0xab8] sm:$0xff] }
 0x7d8   :  { %v3302_v52 = vld [vmem:[#allocation8 + $0x16a8] sm:$0xff]  ;;  %v3304_v37 = vld [vmem:[#allocation8 + $0x16b8] sm:$0xff] }
 0x7d9   :  { %4014 = vmatpush1.bf16.msra.mxu1 %v4013_v0  ;;  %v2402_v0 = vld [vmem:[#allocation8 + $0xa28] sm:$0xff]  ;;  %v4435_v40 = vpack.c.bf16 %v3304_v37, %v3302_v52  ;;  %v3324_v37 = vld [vmem:[#allocation8 + $0x1758] sm:$0xff] }
 0x7da   :  { %4398 = vmatpush1.bf16.msra.mxu0 %v4397_v28  ;;  %4016 = vmatprep.subr.bf16.mxu1 %v4015_v48  ;;  %v2404_v28 = vld [vmem:[#allocation8 + $0xa38] sm:$0xff]  ;;  %v4033_v48 = vpack.c.bf16 %v2399_v6, %v2397_v45  ;;  %v2417_v45 = vld [vmem:[#allocation8 + $0xaa0] sm:$0xff]  ;;  %v2419_v6 = vld [vmem:[#allocation8 + $0xab0] sm:$0xff] }
 0x7db   :  { %4400 = vmatprep.subr.bf16.mxu0 %v4399_v26  ;;  %v2401_v26 = vld [vmem:[#allocation8 + $0xa20] sm:$0xff]  ;;  %v4035_v27 = vpack.c.bf16 %v2404_v28, %v2402_v0  ;;  %v2422_v0 = vld [vmem:[#allocation8 + $0xac8] sm:$0xff]  ;;  %v2424_v28 = vld [vmem:[#allocation8 + $0xad8] sm:$0xff] }
 0x7dc   :  { %v4037_v38 = vpack.c.bf16 %v2403_v9, %v2401_v26  ;;  %v4055_v26 = vpack.c.bf16 %v2424_v28, %v2422_v0  ;;  %v2421_v9 = vld [vmem:[#allocation8 + $0xac0] sm:$0xff]  ;;  %v3322_v52 = vld [vmem:[#allocation8 + $0x1748] sm:$0xff]  ;;  %v2444_v28 = vld [vmem:[#allocation8 + $0xb78] sm:$0xff] }
 0x7dd   :  { %4018 = vmatpush1.bf16.msra.mxu1 %v4017_v36  ;;  %v2408_v36 = vld [vmem:[#allocation8 + $0xa58] sm:$0xff]  ;;  %v2442_v0 = vld [vmem:[#allocation8 + $0xb68] sm:$0xff] }
 0x7de   :  { %4402 = vmatpush1.bf16.msra.mxu0 %v4401_v41  ;;  %4020 = vmatprep.subr.bf16.mxu1 %v4019_v44  ;;  %v4419_v41 = vpack.c.bf16 %v3288_v51, %v3286_v15  ;;  %v3290_v44 = vld [vmem:[#allocation8 + $0x1648] sm:$0xff]  ;;  %v3308_v15 = vld [vmem:[#allocation8 + $0x16d8] sm:$0xff]  ;;  %v4053_v51 = vpack.c.bf16 %v2419_v6, %v2417_v45  ;;  %v2437_v45 = vld [vmem:[#allocation8 + $0xb40] sm:$0xff] }
 0x7df   :  { %4404 = vmatprep.subr.bf16.mxu0 %v4403_v31  ;;  %v4039_v31 = vpack.c.bf16 %v2408_v36, %v2406_v59  ;;  %v4423_v23 = vpack.c.bf16 %v3292_v54, %v3290_v44  ;;  %v3307_v59 = vld [vmem:[#allocation8 + $0x16d0] sm:$0xff]  ;;  %v2426_v36 = vld [vmem:[#allocation8 + $0xae8] sm:$0xff]  ;;  %v3312_v54 = vld [vmem:[#allocation8 + $0x16f8] sm:$0xff] }
 0x7e0   :  { %v3310_v44 = vld [vmem:[#allocation8 + $0x16e8] sm:$0xff]  ;;  %v2439_v6 = vld [vmem:[#allocation8 + $0xb50] sm:$0xff] }
 0x7e1   :  { %4022 = vmatpush1.bf16.msra.mxu1 %v4021_v13  ;;  %v2412_v13 = vld [vmem:[#allocation8 + $0xa78] sm:$0xff] }
 0x7e2   :  { %4406 = vmatpush1.bf16.msra.mxu0 %v4405_v22  ;;  %4024 = vmatprep.subr.bf16.mxu1 %v4023_v32  ;;  %v3294_v22 = vld [vmem:[#allocation8 + $0x1668] sm:$0xff]  ;;  %v4041_v32 = vpack.c.bf16 %v2407_v60, %v2405_v3  ;;  %v4043_v57 = vpack.c.bf16 %v2412_v13, %v2410_v7  ;;  %v2425_v3 = vld [vmem:[#allocation8 + $0xae0] sm:$0xff]  ;;  %v2427_v60 = vld [vmem:[#allocation8 + $0xaf0] sm:$0xff] }
 0x7e3   :  { %4408 = vmatprep.subr.bf16.mxu0 %v4407_v8  ;;  %v3293_v8 = vld [vmem:[#allocation8 + $0x1660] sm:$0xff]  ;;  %v2430_v7 = vld [vmem:[#allocation8 + $0xb08] sm:$0xff]  ;;  %v2432_v13 = vld [vmem:[#allocation8 + $0xb18] sm:$0xff] }
 0x7e5   :  { %4026 = vmatpush1.bf16.msra.mxu1 %v4025_v43  ;;  %v4045_v43 = vpack.c.bf16 %v2411_v47, %v2409_v30  ;;  %v2429_v30 = vld [vmem:[#allocation8 + $0xb00] sm:$0xff]  ;;  %v2431_v47 = vld [vmem:[#allocation8 + $0xb10] sm:$0xff] }
 0x7e6   :  { %4410 = vmatpush1.bf16.msra.mxu0 %v4409_v21  ;;  %4028 = vmatprep.subr.bf16.mxu1 %v4027_v55  ;;  %v4047_v55 = vpack.c.bf16 %v2416_v24, %v2414_v39  ;;  %v2434_v39 = vld [vmem:[#allocation8 + $0xb28] sm:$0xff]  ;;  %v2436_v24 = vld [vmem:[#allocation8 + $0xb38] sm:$0xff] }
 0x7e7   :  { %4412 = vmatprep.subr.bf16.mxu0 %v4411_v16  ;;  %v4431_v16 = vpack.c.bf16 %v3300_v58, %v3298_v62  ;;  %v3318_v62 = vld [vmem:[#allocation8 + $0x1728] sm:$0xff]  ;;  %v3320_v58 = vld [vmem:[#allocation8 + $0x1738] sm:$0xff] }
 0x7e9   :  { %4030 = vmatpush1.bf16.msra.mxu1 %v4029_v14  ;;  %v4049_v14 = vpack.c.bf16 %v2415_v12, %v2413_v61  ;;  %v2433_v61 = vld [vmem:[#allocation8 + $0xb20] sm:$0xff]  ;;  %v2435_v12 = vld [vmem:[#allocation8 + $0xb30] sm:$0xff] }
 0x7ea   :  { %4414 = vmatpush1.bf16.msra.mxu0 %v4413_v5  ;;  %4032 = vmatprep.subr.bf16.mxu1 %v4031_v42  ;;  %v4433_v5 = vpack.c.bf16 %v3299_v17, %v3297_v25  ;;  %v4051_v42 = vpack.c.bf16 %v2420_v18, %v2418_v10  ;;  %v3317_v25 = vld [vmem:[#allocation8 + $0x1720] sm:$0xff]  ;;  %v3319_v17 = vld [vmem:[#allocation8 + $0x1730] sm:$0xff]  ;;  %v2438_v10 = vld [vmem:[#allocation8 + $0xb48] sm:$0xff] }
 0x7eb   :  { %4416 = vmatprep.subr.bf16.mxu0 %v4415_v63  ;;  %v3301_v63 = vld [vmem:[#allocation8 + $0x16a0] sm:$0xff]  ;;  %v2440_v18 = vld [vmem:[#allocation8 + $0xb58] sm:$0xff] }
 0x7ec   :  { %2378 = vmatmul.mubr.f32.vlgmr.msra.gmra.mrb[20].mxu1 %v5834_v46  ;;  %v3291_v46 = vld [vmem:[#allocation8 + $0x1650] sm:$0xff] }
 0x7ed   :  { %3262 = vmatmul.mubr.f32.vlgmr.msra.gmra.mrb[36].mxu0 %v5837_v50  ;;  %4034 = vmatpush1.bf16.msra.mxu1 %v4033_v48  ;;  %v3296_v50 = vld [vmem:[#allocation8 + $0x1678] sm:$0xff]  ;;  %v3306_v48 = vld [vmem:[#allocation8 + $0x16c8] sm:$0xff] }
 0x7ee   :  { %2525 = vmatprep.mubr.f32.mxu1 %v5847_v49  ;;  %4418 = vmatpush1.bf16.msra.mxu0 %v4417_v33  ;;  %v4425_v49 = vpack.c.bf16 %v3291_v46, %v3289_v29  ;;  %v4427_v2 = vpack.c.bf16 %v3296_v50, %v3294_v22  ;;  %v4437_v33 = vpack.c.bf16 %v3303_v35, %v3301_v63  ;;  %v3309_v29 = vld [vmem:[#allocation8 + $0x16e0] sm:$0xff]  ;;  %v3311_v46 = vld [vmem:[#allocation8 + $0x16f0] sm:$0xff]  ;;  %v3314_v22 = vld [vmem:[#allocation8 + $0x1708] sm:$0xff] }
 0x7ef   :  { %3409 = vmatprep.mubr.f32.mxu0 %v5850_v4  ;;  %4036 = vmatprep.subr.bf16.mxu1 %v4035_v27  ;;  %v3295_v4 = vld [vmem:[#allocation8 + $0x1670] sm:$0xff]  ;;  %v3305_v27 = vld [vmem:[#allocation8 + $0x16c0] sm:$0xff]  ;;  %v4439_v34 = vpack.c.bf16 %v3308_v15, %v3306_v48  ;;  %v3316_v50 = vld [vmem:[#allocation8 + $0x1718] sm:$0xff] }
 0x7f0   :  { %4420 = vmatprep.subr.bf16.mxu0 %v4419_v41  ;;  %v4429_v21 = vpack.c.bf16 %v3295_v4, %v3293_v8  ;;  %v2428_v41 = vld [vmem:[#allocation8 + $0xaf8] sm:$0xff]  ;;  %v3313_v8 = vld [vmem:[#allocation8 + $0x1700] sm:$0xff]  ;;  %v3315_v4 = vld [vmem:[#allocation8 + $0x1710] sm:$0xff] }
 0x7f1   :  { %4038 = vmatpush1.bf16.msra.mxu1 %v4037_v38  ;;  %v4057_v38 = vpack.c.bf16 %v2423_v19, %v2421_v9  ;;  %v3321_v63 = vld [vmem:[#allocation8 + $0x1740] sm:$0xff]  ;;  %v3323_v35 = vld [vmem:[#allocation8 + $0x1750] sm:$0xff]  ;;  %v3326_v48 = vld [vmem:[#allocation8 + $0x1768] sm:$0xff] }
 0x7f2   :  { %4422 = vmatpush1.bf16.msra.mxu0 %v4421_v20  ;;  %4040 = vmatprep.subr.bf16.mxu1 %v4039_v31  ;;  %v4441_v20 = vpack.c.bf16 %v3307_v59, %v3305_v27  ;;  %v4059_v31 = vpack.c.bf16 %v2428_v41, %v2426_v36  ;;  %v3328_v15 = vld [vmem:[#allocation8 + $0x1778] sm:$0xff]  ;;  %v2441_v9 = vld [vmem:[#allocation8 + $0xb60] sm:$0xff]  ;;  %v2443_v19 = vld [vmem:[#allocation8 + $0xb70] sm:$0xff] }
 0x7f3   :  { %4424 = vmatprep.subr.bf16.mxu0 %v4423_v23  ;;  %v4443_v23 = vpack.c.bf16 %v3312_v54, %v3310_v44  ;;  %v3325_v27 = vld [vmem:[#allocation8 + $0x1760] sm:$0xff]  ;;  %v3327_v59 = vld [vmem:[#allocation8 + $0x1770] sm:$0xff]  ;;  %v2446_v36 = vld [vmem:[#allocation8 + $0xb88] sm:$0xff] }
 0x7f4   :  { %v2448_v41 = vld [vmem:[#allocation8 + $0xb98] sm:$0xff]  ;;  %v3330_v44 = vld [vmem:[#allocation8 + $0x1788] sm:$0xff] }
 0x7f5   :  { %4042 = vmatpush1.bf16.msra.mxu1 %v4041_v32  ;;  %v4061_v32 = vpack.c.bf16 %v2427_v60, %v2425_v3  ;;  %v3332_v54 = vld [vmem:[#allocation8 + $0x1798] sm:$0xff]  ;;  %v2445_v3 = vld [vmem:[#allocation8 + $0xb80] sm:$0xff]  ;;  %v2447_v60 = vld [vmem:[#allocation8 + $0xb90] sm:$0xff] }
 0x7f6   :  { %4426 = vmatpush1.bf16.msra.mxu0 %v4425_v49  ;;  %4044 = vmatprep.subr.bf16.mxu1 %v4043_v57  ;;  %v4445_v49 = vpack.c.bf16 %v3311_v46, %v3309_v29  ;;  %v4063_v57 = vpack.c.bf16 %v2432_v13, %v2430_v7  ;;  %v3329_v29 = vld [vmem:[#allocation8 + $0x1780] sm:$0xff]  ;;  %v3331_v46 = vld [vmem:[#allocation8 + $0x1790] sm:$0xff]  ;;  %v2450_v7 = vld [vmem:[#allocation8 + $0xba8] sm:$0xff] }
 0x7f7   :  { %4428 = vmatprep.subr.bf16.mxu0 %v4427_v2  ;;  %v4447_v2 = vpack.c.bf16 %v3316_v50, %v3314_v22  ;;  %v2452_v13 = vld [vmem:[#allocation8 + $0xbb8] sm:$0xff]  ;;  %v3334_v22 = vld [vmem:[#allocation8 + $0x17a8] sm:$0xff] }
 0x7f8   :  { %v3336_v50 = vld [vmem:[#allocation8 + $0x17b8] sm:$0xff] }
 0x7f9   :  { %4046 = vmatpush1.bf16.msra.mxu1 %v4045_v43  ;;  %v4065_v43 = vpack.c.bf16 %v2431_v47, %v2429_v30  ;;  %v2449_v30 = vld [vmem:[#allocation8 + $0xba0] sm:$0xff]  ;;  %v2451_v47 = vld [vmem:[#allocation8 + $0xbb0] sm:$0xff] }
 0x7fa   :  { %4430 = vmatpush1.bf16.msra.mxu0 %v4429_v21  ;;  %4048 = vmatprep.subr.bf16.mxu1 %v4047_v55  ;;  %v4449_v21 = vpack.c.bf16 %v3315_v4, %v3313_v8  ;;  %v4067_v55 = vpack.c.bf16 %v2436_v24, %v2434_v39  ;;  %v3333_v8 = vld [vmem:[#allocation8 + $0x17a0] sm:$0xff]  ;;  %v3335_v4 = vld [vmem:[#allocation8 + $0x17b0] sm:$0xff]  ;;  %v2454_v39 = vld [vmem:[#allocation8 + $0xbc8] sm:$0xff] }
 0x7fb   :  { %4432 = vmatprep.subr.bf16.mxu0 %v4431_v16  ;;  %v4451_v16 = vpack.c.bf16 %v3320_v58, %v3318_v62  ;;  %v2456_v24 = vld [vmem:[#allocation8 + $0xbd8] sm:$0xff]  ;;  %v3338_v62 = vld [vmem:[#allocation8 + $0x17c8] sm:$0xff] }
 0x7fc   :  { %v3340_v58 = vld [vmem:[#allocation8 + $0x17d8] sm:$0xff] }
 0x7fd   :  { %4050 = vmatpush1.bf16.msra.mxu1 %v4049_v14  ;;  %v4069_v14 = vpack.c.bf16 %v2435_v12, %v2433_v61  ;;  %v2453_v61 = vld [vmem:[#allocation8 + $0xbc0] sm:$0xff]  ;;  %v2455_v12 = vld [vmem:[#allocation8 + $0xbd0] sm:$0xff] }
 0x7fe   :  { %4434 = vmatpush1.bf16.msra.mxu0 %v4433_v5  ;;  %4052 = vmatprep.subr.bf16.mxu1 %v4051_v42  ;;  %v4453_v5 = vpack.c.bf16 %v3319_v17, %v3317_v25  ;;  %v4071_v42 = vpack.c.bf16 %v2440_v18, %v2438_v10  ;;  %v3337_v25 = vld [vmem:[#allocation8 + $0x17c0] sm:$0xff]  ;;  %v3339_v17 = vld [vmem:[#allocation8 + $0x17d0] sm:$0xff]  ;;  %v2458_v10 = vld [vmem:[#allocation8 + $0xbe8] sm:$0xff] }
 0x7ff   :  { %4436 = vmatprep.subr.bf16.mxu0 %v4435_v40  ;;  %v4455_v40 = vpack.c.bf16 %v3324_v37, %v3322_v52  ;;  %v2460_v18 = vld [vmem:[#allocation8 + $0xbf8] sm:$0xff]  ;;  %v3342_v52 = vld [vmem:[#allocation8 + $0x17e8] sm:$0xff] }
 0x800   :  { %v3344_v37 = vld [vmem:[#allocation8 + $0x17f8] sm:$0xff] }
 0x801   :  { %4054 = vmatpush1.bf16.msra.mxu1 %v4053_v51  ;;  %v4073_v51 = vpack.c.bf16 %v2439_v6, %v2437_v45  ;;  %v2457_v45 = vld [vmem:[#allocation8 + $0xbe0] sm:$0xff]  ;;  %v2459_v6 = vld [vmem:[#allocation8 + $0xbf0] sm:$0xff] }
 0x802   :  { %4438 = vmatpush1.bf16.msra.mxu0 %v4437_v33  ;;  %4056 = vmatprep.subr.bf16.mxu1 %v4055_v26  ;;  %v4457_v33 = vpack.c.bf16 %v3323_v35, %v3321_v63  ;;  %v4075_v26 = vpack.c.bf16 %v2444_v28, %v2442_v0  ;;  %v3341_v63 = vld [vmem:[#allocation8 + $0x17e0] sm:$0xff]  ;;  %v3343_v35 = vld [vmem:[#allocation8 + $0x17f0] sm:$0xff]  ;;  %v3435_v28 = vld [vmem:[%s6005_s10 + $0x88] sm:$0xff] }
 0x803   :  { %4440 = vmatprep.subr.bf16.mxu0 %v4439_v34  ;;  %v4459_v34 = vpack.c.bf16 %v3328_v15, %v3326_v48  ;;  %v3434_v0 = vld [vmem:[%s6005_s10 + $0x80] sm:$0xff]  ;;  %v4093_v48 = vpack.c.bf16 %v2459_v6, %v2457_v45  ;;  %v4477_v15 = vpack.c.bf16 %v3343_v35, %v3341_v63 }
 0x805   :  { %4058 = vmatpush1.bf16.msra.mxu1 %v4057_v38  ;;  %v4077_v38 = vpack.c.bf16 %v2443_v19, %v2441_v9  ;;  %v3436_v9 = vld [vmem:[%s6005_s10 + $0x90] sm:$0xff]  ;;  %v3437_v19 = vld [vmem:[%s6005_s10 + $0x98] sm:$0xff] }
 0x806   :  { %4442 = vmatpush1.bf16.msra.mxu0 %v4441_v20  ;;  %4060 = vmatprep.subr.bf16.mxu1 %v4059_v31  ;;  %v4461_v20 = vpack.c.bf16 %v3327_v59, %v3325_v27  ;;  %v4079_v31 = vpack.c.bf16 %v2448_v41, %v2446_v36  ;;  %v3420_v59 = vld [vmem:[%s6005_s10 + $0x10] sm:$0xff]  ;;  %v3421_v36 = vld [vmem:[%s6005_s10 + $0x18] sm:$0xff]  ;;  %v3438_v41 = vld [vmem:[%s6005_s10 + $0xa0] sm:$0xff] }
 0x807   :  { %4444 = vmatprep.subr.bf16.mxu0 %v4443_v23  ;;  %v4463_v23 = vpack.c.bf16 %v3332_v54, %v3330_v44  ;;  %v3439_v44 = vld [vmem:[%s6005_s10 + $0xa8] sm:$0xff]  ;;  %v4485_v54 = vpack.c.bf16 %v3421_v36, %v3420_v59 }
 0x809   :  { %4062 = vmatpush1.bf16.msra.mxu1 %v4061_v32  ;;  %v4081_v32 = vpack.c.bf16 %v2447_v60, %v2445_v3  ;;  %v3440_v3 = vld [vmem:[%s6005_s10 + $0xb0] sm:$0xff] }
 0x80a   :  { %4446 = vmatpush1.bf16.msra.mxu0 %v4445_v49  ;;  %4064 = vmatprep.subr.bf16.mxu1 %v4063_v57  ;;  %v4465_v49 = vpack.c.bf16 %v3331_v46, %v3329_v29  ;;  %v4083_v57 = vpack.c.bf16 %v2452_v13, %v2450_v7  ;;  %v3424_v29 = vld [vmem:[%s6005_s10 + $0x30] sm:$0xff]  ;;  %v3442_v46 = vld [vmem:[%s6005_s10 + $0xc0] sm:$0xff]  ;;  %v3443_v7 = vld [vmem:[%s6005_s10 + $0xc8] sm:$0xff] }
 0x80b   :  { %4448 = vmatprep.subr.bf16.mxu0 %v4447_v2  ;;  %v4467_v2 = vpack.c.bf16 %v3336_v50, %v3334_v22  ;;  %v4495_v22 = vpack.c.bf16 %v3443_v7, %v3442_v46  ;;  %v3426_v50 = vld [vmem:[%s6005_s10 + $0x40] sm:$0xff] }
 0x80d   :  { %4066 = vmatpush1.bf16.msra.mxu1 %v4065_v43  ;;  %v4085_v43 = vpack.c.bf16 %v2451_v47, %v2449_v30 }
 0x80e   :  { %4450 = vmatpush1.bf16.msra.mxu0 %v4449_v21  ;;  %4068 = vmatprep.subr.bf16.mxu1 %v4067_v55  ;;  %v4469_v21 = vpack.c.bf16 %v3335_v4, %v3333_v8  ;;  %v4087_v55 = vpack.c.bf16 %v2456_v24, %v2454_v39  ;;  %v3428_v8 = vld [vmem:[%s6005_s10 + $0x50] sm:$0xff]  ;;  %v3446_v4 = vld [vmem:[%s6005_s10 + $0xe0] sm:$0xff]  ;;  %v3447_v39 = vld [vmem:[%s6005_s10 + $0xe8] sm:$0xff] }
 0x80f   :  { %4452 = vmatprep.subr.bf16.mxu0 %v4451_v16  ;;  %v4471_v16 = vpack.c.bf16 %v3340_v58, %v3338_v62  ;;  %v4503_v62 = vpack.c.bf16 %v3447_v39, %v3446_v4  ;;  %v3430_v58 = vld [vmem:[%s6005_s10 + $0x60] sm:$0xff] }
 0x811   :  { %4070 = vmatpush1.bf16.msra.mxu1 %v4069_v14  ;;  %v4089_v14 = vpack.c.bf16 %v2455_v12, %v2453_v61  ;;  %v3449_v61 = vld [vmem:[%s6005_s10 + $0xf8] sm:$0xff]  ;;  %v3432_v12 = vld [vmem:[%s6005_s10 + $0x70] sm:$0xff] }
 0x812   :  { %4454 = vmatpush1.bf16.msra.mxu0 %v4453_v5  ;;  %4072 = vmatprep.subr.bf16.mxu1 %v4071_v42  ;;  %v4473_v5 = vpack.c.bf16 %v3339_v17, %v3337_v25  ;;  %v4091_v42 = vpack.c.bf16 %v2460_v18, %v2458_v10  ;;  %v1636_v10 = vld [vmem:[#allocation10] sm:$0x3] }
 0x813   :  { %4456 = vmatprep.subr.bf16.mxu0 %v4455_v40  ;;  %v4475_v40 = vpack.c.bf16 %v3344_v37, %v3342_v52  ;;  %v1641_v18 = vrot.slane %v1636_v10, %v440_v56  ;;  %v6011_v52 = vsub.s32 1, %v5217_v53 }
 0x815   :  { %4074 = vmatpush1.bf16.msra.mxu1 %v4073_v51  ;;  %v4479_v51 = vpack.c.bf16 %v3435_v28, %v3434_v0  ;;  %v1645_v37 = vrot.slane %v1636_v10, %v6011_v52  ;;  %v3595_v28 = vld [vmem:[#allocation11] ss:$0 sm:$0xff] }
 0x816   :  { %4458 = vmatpush1.bf16.msra.mxu0 %v4457_v33  ;;  %4076 = vmatprep.subr.bf16.mxu1 %v4075_v26  ;;  %v3418_v33 = vld [vmem:[%s6005_s10] sm:$0xff]  ;;  %v3419_v26 = vld [vmem:[%s6005_s10 + $0x8] sm:$0xff] }
 0x817   :  { %4460 = vmatprep.subr.bf16.mxu0 %v4459_v34  ;;  %v4481_v27 = vpack.c.bf16 %v3419_v26, %v3418_v33  ;;  %v4483_v34 = vpack.c.bf16 %v3437_v19, %v3436_v9 }
 0x819   :  { %4078 = vmatpush1.bf16.msra.mxu1 %v4077_v38  ;;  %v4487_v38 = vpack.c.bf16 %v3439_v44, %v3438_v41 }
 0x81a   :  { %4462 = vmatpush1.bf16.msra.mxu0 %v4461_v20  ;;  %4080 = vmatprep.subr.bf16.mxu1 %v4079_v31  ;;  %v3422_v20 = vld [vmem:[%s6005_s10 + $0x20] sm:$0xff]  ;;  %v3423_v31 = vld [vmem:[%s6005_s10 + $0x28] sm:$0xff] }
 0x81b   :  { %4464 = vmatprep.subr.bf16.mxu0 %v4463_v23  ;;  %v3425_v23 = vld [vmem:[%s6005_s10 + $0x38] sm:$0xff] }
 0x81c   :  { %v4493_v13 = vpack.c.bf16 %v3425_v23, %v3424_v29 }
 0x81d   :  { %4082 = vmatpush1.bf16.msra.mxu1 %v4081_v32  ;;  %v3427_v32 = vld [vmem:[%s6005_s10 + $0x48] sm:$0xff] }
 0x81e   :  { %4466 = vmatpush1.bf16.msra.mxu0 %v4465_v49  ;;  %4084 = vmatprep.subr.bf16.mxu1 %v4083_v57  ;;  %v3444_v49 = vld [vmem:[%s6005_s10 + $0xd0] sm:$0xff]  ;;  %v3445_v57 = vld [vmem:[%s6005_s10 + $0xd8] sm:$0xff]  ;;  %v4497_v30 = vpack.c.bf16 %v3427_v32, %v3426_v50 }
 0x81f   :  { %4468 = vmatprep.subr.bf16.mxu0 %v4467_v2  ;;  %v4499_v47 = vpack.c.bf16 %v3445_v57, %v3444_v49  ;;  %v3429_v2 = vld [vmem:[%s6005_s10 + $0x58] sm:$0xff] }
 0x820   :  { %v4501_v24 = vpack.c.bf16 %v3429_v2, %v3428_v8 }
 0x821   :  { %4086 = vmatpush1.bf16.msra.mxu1 %v4085_v43  ;;  %v3431_v43 = vld [vmem:[%s6005_s10 + $0x68] sm:$0xff] }
 0x822   :  { %4470 = vmatpush1.bf16.msra.mxu0 %v4469_v21  ;;  %4088 = vmatprep.subr.bf16.mxu1 %v4087_v55  ;;  %v4505_v21 = vpack.c.bf16 %v3431_v43, %v3430_v58  ;;  %v3448_v55 = vld [vmem:[%s6005_s10 + $0xf0] sm:$0xff] }
 0x823   :  { %4472 = vmatprep.subr.bf16.mxu0 %v4471_v16  ;;  %v4507_v25 = vpack.c.bf16 %v3449_v61, %v3448_v55  ;;  %v3433_v16 = vld [vmem:[%s6005_s10 + $0x78] sm:$0xff] }
 0x824   :  { %v4509_v17 = vpack.c.bf16 %v3433_v16, %v3432_v12 }
 0x825   :  { %4090 = vmatpush1.bf16.msra.mxu1 %v4089_v14 }
 0x826   :  { %4474 = vmatpush1.bf16.msra.mxu0 %v4473_v5  ;;  %4092 = vmatprep.subr.bf16.mxu1 %v4091_v42 }
 0x827   :  { %4476 = vmatprep.subr.bf16.mxu0 %v4475_v40 }
 0x829   :  { %4094 = vmatpush1.bf16.msra.mxu1 %v4093_v48 }
 0x82a   :  { %4478 = vmatpush1.bf16.msra.mxu0 %v4477_v15  ;;  %4480 = vmatprep.subr.bf16.mxu1 %v4479_v51 }
 0x82c   :  { %2526 = vmatmul.mubr.f32.vlgmr.msra.gmra.mrb[20].mxu1 %v5853_v11  ;;  %v3441_v11 = vld [vmem:[%s6005_s10 + $0xb8] sm:$0xff]  ;;  %s4943_s10 = smov [#allocation13]  }
 0x82d   :  { %3410 = vmatmul.mubr.f32.vlgmr.msra.gmra.mrb[36].mxu0 %v5863_v1  ;;  %4482 = vmatpush3.bf16.msra.mxu1 %v4481_v27  ;;  %v4489_v1 = vpack.c.bf16 %v3423_v31, %v3422_v20  ;;  %v4491_v60 = vpack.c.bf16 %v3441_v11, %v3440_v3  ;;  %s3535_s20 = sshll.u32 %s4943_s10, 4  ;;  %s3536_s20 = int_to_ptr.vmem [resolvable:$true] %s3535_s20 }
 0x82e   :  { %4484 = vmatprep.subr.bf16.mxu1 %v4483_v34  ;;  %s4894_s2 = scalar_lea.vmem %s3536_s20, 32  ;;  %p4899_p7 = scmp.lt.s32.totalorder %s3536_s20, %s3536_s20 }
 0x82f   :  { %p4895_p6 = scmp.ne.s32.totalorder %s3536_s20, %s4894_s2  ;;  %p4900_p8 = scmp.lt.s32.totalorder %s4894_s2, %s4894_s2 }
 0x831   :  { %4486 = vmatpush3.bf16.msra.mxu1 %v4485_v54  ;;  %p4901_p9 = por %p4900_p8, %p4899_p7 }
 0x832   :  { %4488 = vmatprep.subr.bf16.mxu1 %v4487_v38 }
 0x833   :  { %p4902_p10 = pnand %p4901_p9, %p4895_p6 }
 0x835   :  { %4490 = vmatpush3.bf16.msra.mxu1 %v4489_v1 }
 0x836   :  { %4492 = vmatprep.subr.bf16.mxu1 %v4491_v60 }
 0x839   :  { %4494 = vmatpush3.bf16.msra.mxu1 %v4493_v13 }
 0x83a   :  { %4496 = vmatprep.subr.bf16.mxu1 %v4495_v22 }
 0x83d   :  { %4498 = vmatpush3.bf16.msra.mxu1 %v4497_v30 }
 0x83e   :  { %4500 = vmatprep.subr.bf16.mxu1 %v4499_v47 }
 0x841   :  { %4502 = vmatpush3.bf16.msra.mxu1 %v4501_v24 }
 0x842   :  { %4504 = vmatprep.subr.bf16.mxu1 %v4503_v62 }
 0x845   :  { %4506 = vmatpush3.bf16.msra.mxu1 %v4505_v21 }
 0x846   :  { %4508 = vmatprep.subr.bf16.mxu1 %v4507_v25 }
 0x849   :  { %4510 = vmatpush3.bf16.msra.mxu1 %v4509_v17 }
 0x8ff   :  { %v2527_v14 = vpop.f32.mrb[20].mxu1 }
 0x900   :  { %v4519_v5 = vadd.f32 %v2527_v14, %v1641_v18  ;;  %v3411_v42 = vpop.f32.mrb[36].mxu0  ;;  %v2529_v45 = vpop.f32.mrb[21].mxu1 }
 0x901   :  { %v4521_v6 = vadd.f32 %v2529_v45, %v1645_v37  ;;  %v3413_v63 = vpop.f32.mrb[37].mxu0 }
 0x902   :  { %v4520_v40 = vadd.f32 %v4519_v5, %v3411_v42 }
 0x903   :  { %v4522_v35 = vadd.f32 %v4521_v6, %v3413_v63 }
 0x905   :  { %3521 = vmatprep.mubr.f32.mxu1 %v4522_v35 }
 0x906   :  { %3522 = vmatmul.mubr.f32.vlgmr.msra.gmra.mrb[22].mxu1 %v4520_v40 }
 0x9d9   :  { %v3628_v0 = vpop.f32.mrb[22].mxu1 }
 0x9da   :  { %v3629_v48 = vpop.f32.mrb[23].mxu1 }
 0x9db   :  { %v3630_v15 = vadd.f32 %v3629_v48, %v3628_v0 }
 0x9dd   :  { %v3524_v56 = vadd.f32 %v3630_v15, %v3595_v28 }
 0x9df   :  { %3528 = vst.msk [vmem:[#allocation13] sm:$0x3] %vm3527_vm13, %v3524_v56 }
 0x9e0   :  { %4905 = shalt.err (!%p4902_p10)
}
 0x9e1   :  { %s4906_s21 = scalar_lea.hbm %s6007_s12, 32 }
 0x9e2   :  { %p4907_p11 = scmp.ne.s32.totalorder %s6007_s12, %s4906_s21  ;;  %p4910_p12 = scmp.lt.u32.totalorder %s4906_s21, %s6007_s12 }
 0x9e4   :  { %p4912_p13 = pnand %p4910_p12, %p4907_p11 }
 0x9e6   :  { %4915 = shalt.err (!%p4912_p13)
}
 0x9e7   :  { %3538 = dma.vmem_to_hbm [thread:$0]  %s3536_s20, 32, %s6007_s12, [#allocation4]  }
 0x9e8   :  { %4924 = dma.done.wait [#allocation4], 32  }
 0x9e9   :  { %4925 = vsyncadd [#allocation4], 4294967264 }
 0x9ea   :  { %3542 = vsyncpa [#allocation3], 1 }
 0x9eb   :  { %3543 = vsyncpa [#allocation6], 1 }
 0x9ec   :  { %3544 = vsyncpa [#allocation9], 1 }
 0x9ed   :  { %3545 = vsyncpa [#allocation12], 1 }
 0x9ee   :  { %3546 = vsyncpa [#allocation4], 1 }

</bundles_post_ra>
